<compile_context>
chip_gen: v7x
topology: tpu7x:2x2x1
jax: 0.10.0
libtpu: 0.0.40
codegen_flags: <defaults>
</compile_context>

<pallas_src>
import math
import jax
import jax.numpy as jnp
from jax.experimental import pallas as pl
from jax.experimental.pallas import tpu as pltpu


def qnetwork_kernel(xin_ref, xh_ref, w1_ref, b1_ref, w2_ref, b2_ref,
                    w3_ref, b3_ref, out_ref):
    """Fused 3-layer MLP forward, single invocation (no grid).

      xin_ref : (B, input_dim)           f32
      xh_ref  : (B, history_dim)         f32
      w1_ref  : (input_dim+history_dim, H) bf16
      b1_ref  : (1, H)                   f32
      w2_ref  : (H, H)                   bf16
      b2_ref  : (1, H)                   f32
      w3_ref  : (H, A)                   bf16
      b3_ref  : (1, A)                   f32
      out_ref : (B, A)                   f32
    """
    din = xin_ref.shape[1]
    x_in = xin_ref[...].astype(jnp.bfloat16)
    x_h = xh_ref[...].astype(jnp.bfloat16)

    # Layer 1: cat(x_in, x_hist) @ w1 == x_in @ w1[:din] + x_hist @ w1[din:]
    # (static row slices of the VMEM ref are free; avoids an in-kernel concat).
    h1 = jnp.dot(x_in, w1_ref[:din, :], preferred_element_type=jnp.float32)
    h1 = h1 + jnp.dot(x_h, w1_ref[din:, :], preferred_element_type=jnp.float32)
    h1 = jnp.maximum(h1 + b1_ref[...], 0.0).astype(jnp.bfloat16)

    # Layer 2
    h2 = jnp.dot(h1, w2_ref[...], preferred_element_type=jnp.float32) + b2_ref[...]
    h2 = jnp.maximum(h2, 0.0).astype(jnp.bfloat16)

    # Layer 3 (output)
    q = jnp.dot(h2, w3_ref[...], preferred_element_type=jnp.float32) + b3_ref[...]
    out_ref[...] = q.astype(out_ref.dtype)


def qnetwork_forward(input_features, history_features, params):
    """Launch the fused Pallas kernel (grid-less: whole arrays live in VMEM)."""
    w1, b1, w2, b2, w3, b3 = params
    B, Din = input_features.shape
    _, Dh = history_features.shape
    assert w1.shape[0] == Din + Dh
    A = w3.shape[1]

    return pl.pallas_call(
        qnetwork_kernel,
        out_shape=jax.ShapeDtypeStruct((B, A), jnp.float32),
        compiler_params=pltpu.CompilerParams(
            vmem_limit_bytes=16 << 20,
        ),
    )(input_features, history_features, w1, b1, w2, b2, w3, b3)


def xavier_uniform(key, fan_in, fan_out, dtype=jnp.float32):
    bound = math.sqrt(6.0 / (fan_in + fan_out))
    return jax.random.uniform(key, (fan_in, fan_out), dtype, minval=-bound, maxval=bound)


def init_qnetwork_params(key, input_dim, history_dim, num_actions, hidden=1024):
    """Xavier-uniform weights (matching PyTorch fan-in/fan-out), zero biases.
    Weights stored bf16 (inference), biases f32.  w1 stays merged (Din+Dh, H).
    Note: keep f32 masters outside this function if these params are trained."""
    total = input_dim + history_dim
    k1, k2, k3 = jax.random.split(key, 3)
    w1 = xavier_uniform(k1, total, hidden).astype(jnp.bfloat16)
    b1 = jnp.zeros((1, hidden), jnp.float32)
    w2 = xavier_uniform(k2, hidden, hidden).astype(jnp.bfloat16)
    b2 = jnp.zeros((1, hidden), jnp.float32)
    w3 = xavier_uniform(k3, hidden, num_actions).astype(jnp.bfloat16)
    b3 = jnp.zeros((1, num_actions), jnp.float32)
    return (w1, b1, w2, b2, w3, b3)


def qnetwork_reference(input_features, history_features, params):
    """Pure-JAX reference in the same mixed precision as the kernel
    (bf16 matmul inputs, f32 accumulation), for correctness checking."""
    w1, b1, w2, b2, w3, b3 = params
    x = jnp.concatenate([input_features, history_features], axis=1).astype(jnp.bfloat16)
    h1 = jnp.maximum(jnp.dot(x, w1, preferred_element_type=jnp.float32) + b1,
                     0.0).astype(jnp.bfloat16)
    h2 = jnp.maximum(jnp.dot(h1, w2, preferred_element_type=jnp.float32) + b2,
                     0.0).astype(jnp.bfloat16)
    return jnp.dot(h2, w3, preferred_element_type=jnp.float32) + b3


if __name__ == "__main__":
    # Small shapes consistent with the module's forward signature.
    batch = 8
    input_dim = 32
    history_dim = 32
    num_actions = 16

    key = jax.random.PRNGKey(0)
    k_params, k_in, k_hist = jax.random.split(key, 3)

    params = init_qnetwork_params(k_params, input_dim, history_dim, num_actions)
    input_features = jax.random.normal(k_in, (batch, input_dim), jnp.float32)
    history_features = jax.random.normal(k_hist, (batch, history_dim), jnp.float32)

    fwd = jax.jit(qnetwork_forward)
    q_pallas = fwd(input_features, history_features, params)
    jax.block_until_ready(q_pallas)

    q_ref = qnetwork_reference(input_features, history_features, params)
    assert q_pallas.shape == (batch, num_actions)
    # Only difference vs reference is the split layer-1 dot (f32 reassociation).
    assert jnp.allclose(q_pallas, q_ref, atol=2e-3, rtol=2e-3), "mismatch vs reference"

    print("KERNEL_OK")
</pallas_src>

<mosaic_0001>
module attributes {stable_mosaic.version = 11 : i64} {
  func.func @qnetwork_kernel(%arg0: memref<8x32xf32, #tpu.memory_space<vmem>>, %arg1: memref<8x32xf32, #tpu.memory_space<vmem>>, %arg2: memref<64x1024xbf16, #tpu.memory_space<vmem>>, %arg3: memref<1x1024xf32, #tpu.memory_space<vmem>>, %arg4: memref<1024x1024xbf16, #tpu.memory_space<vmem>>, %arg5: memref<1x1024xf32, #tpu.memory_space<vmem>>, %arg6: memref<1024x16xbf16, #tpu.memory_space<vmem>>, %arg7: memref<1x16xf32, #tpu.memory_space<vmem>>, %arg8: memref<8x16xf32, #tpu.memory_space<vmem>>) attributes {dimension_semantics = [], scalar_prefetch = 0 : i64, scratch_operands = 0 : i64, tpu.core_type = #tpu.core_type<tc>} {
    %c0 = arith.constant 0 : index
    %c0_0 = arith.constant 0 : index
    %0 = vector.load %arg0[%c0, %c0_0] : memref<8x32xf32, #tpu.memory_space<vmem>>, vector<8x32xf32>
    %1 = arith.truncf %0 : vector<8x32xf32> to vector<8x32xbf16>
    %c0_1 = arith.constant 0 : index
    %c0_2 = arith.constant 0 : index
    %2 = vector.load %arg1[%c0_1, %c0_2] : memref<8x32xf32, #tpu.memory_space<vmem>>, vector<8x32xf32>
    %3 = arith.truncf %2 : vector<8x32xf32> to vector<8x32xbf16>
    %c0_3 = arith.constant 0 : index
    %c0_4 = arith.constant 0 : index
    %4 = vector.load %arg2[%c0_3, %c0_4] : memref<64x1024xbf16, #tpu.memory_space<vmem>>, vector<32x1024xbf16>
    %cst = arith.constant dense<0.000000e+00> : vector<8x1024xf32>
    %5 = tpu.matmul %1, %4, %cst {dimension_numbers = #tpu.dot_dimension_numbers<[1], [0], [0], [1], [0, 0, 1, 1], [], []>} : vector<8x32xbf16>, vector<32x1024xbf16>, vector<8x1024xf32> -> vector<8x1024xf32>
    %c32 = arith.constant 32 : index
    %c0_5 = arith.constant 0 : index
    %6 = vector.load %arg2[%c32, %c0_5] : memref<64x1024xbf16, #tpu.memory_space<vmem>>, vector<32x1024xbf16>
    %cst_6 = arith.constant dense<0.000000e+00> : vector<8x1024xf32>
    %7 = tpu.matmul %3, %6, %cst_6 {dimension_numbers = #tpu.dot_dimension_numbers<[1], [0], [0], [1], [0, 0, 1, 1], [], []>} : vector<8x32xbf16>, vector<32x1024xbf16>, vector<8x1024xf32> -> vector<8x1024xf32>
    %8 = arith.addf %5, %7 : vector<8x1024xf32>
    %c0_7 = arith.constant 0 : index
    %c0_8 = arith.constant 0 : index
    %9 = vector.load %arg3[%c0_7, %c0_8] : memref<1x1024xf32, #tpu.memory_space<vmem>>, vector<1x1024xf32>
    %10 = vector.broadcast %9 : vector<1x1024xf32> to vector<8x1024xf32>
    %11 = arith.addf %8, %10 : vector<8x1024xf32>
    %cst_9 = arith.constant 0.000000e+00 : f32
    %12 = vector.broadcast %cst_9 : f32 to vector<8x1024xf32>
    %13 = arith.maximumf %11, %12 : vector<8x1024xf32>
    %14 = arith.truncf %13 : vector<8x1024xf32> to vector<8x1024xbf16>
    %c0_10 = arith.constant 0 : index
    %c0_11 = arith.constant 0 : index
    %15 = vector.load %arg4[%c0_10, %c0_11] : memref<1024x1024xbf16, #tpu.memory_space<vmem>>, vector<1024x1024xbf16>
    %cst_12 = arith.constant dense<0.000000e+00> : vector<8x1024xf32>
    %16 = tpu.matmul %14, %15, %cst_12 {dimension_numbers = #tpu.dot_dimension_numbers<[1], [0], [0], [1], [0, 0, 1, 1], [], []>} : vector<8x1024xbf16>, vector<1024x1024xbf16>, vector<8x1024xf32> -> vector<8x1024xf32>
    %c0_13 = arith.constant 0 : index
    %c0_14 = arith.constant 0 : index
    %17 = vector.load %arg5[%c0_13, %c0_14] : memref<1x1024xf32, #tpu.memory_space<vmem>>, vector<1x1024xf32>
    %18 = vector.broadcast %17 : vector<1x1024xf32> to vector<8x1024xf32>
    %19 = arith.addf %16, %18 : vector<8x1024xf32>
    %cst_15 = arith.constant 0.000000e+00 : f32
    %20 = vector.broadcast %cst_15 : f32 to vector<8x1024xf32>
    %21 = arith.maximumf %19, %20 : vector<8x1024xf32>
    %22 = arith.truncf %21 : vector<8x1024xf32> to vector<8x1024xbf16>
    %c0_16 = arith.constant 0 : index
    %c0_17 = arith.constant 0 : index
    %23 = vector.load %arg6[%c0_16, %c0_17] : memref<1024x16xbf16, #tpu.memory_space<vmem>>, vector<1024x16xbf16>
    %cst_18 = arith.constant dense<0.000000e+00> : vector<8x16xf32>
    %24 = tpu.matmul %22, %23, %cst_18 {dimension_numbers = #tpu.dot_dimension_numbers<[1], [0], [0], [1], [0, 0, 1, 1], [], []>} : vector<8x1024xbf16>, vector<1024x16xbf16>, vector<8x16xf32> -> vector<8x16xf32>
    %c0_19 = arith.constant 0 : index
    %c0_20 = arith.constant 0 : index
    %25 = vector.load %arg7[%c0_19, %c0_20] : memref<1x16xf32, #tpu.memory_space<vmem>>, vector<1x16xf32>
    %26 = vector.broadcast %25 : vector<1x16xf32> to vector<8x16xf32>
    %27 = arith.addf %24, %26 : vector<8x16xf32>
    %c0_21 = arith.constant 0 : index
    %c0_22 = arith.constant 0 : index
    %28 = vector.load %arg8[%c0_21, %c0_22] : memref<8x16xf32, #tpu.memory_space<vmem>>, vector<8x16xf32>
    tpu.vector_store %arg8[%c0_21, %c0_22], %27 {strides = array<i32>} : memref<8x16xf32, #tpu.memory_space<vmem>>, vector<8x16xf32>,
    return
  }
}

</mosaic_0001>

<bundles_post_ra>
// kernel: qnetwork_forward.1
= control target key start
LH: loop header
LB: loop body
LE: loop exit
PB: predicated region body
PF: predicated region fallthrough
CT: control target
= control target key end

     0   :  { %13 = vsyncpa [#allocation3], 0  ;;  %s6757_s0 = inlined_call_operand.hbm [shape: f32[8,32], index: 0, kind: input, shape index: {}]   ;;  %s6758_s1 = inlined_call_operand.hbm [shape: f32[8,32], index: 1, kind: input, shape index: {}]   ;;  %s6759_s2 = inlined_call_operand.hbm [shape: bf16[64,1024], index: 2, kind: input, shape index: {}]   ;;  %s6760_s3 = inlined_call_operand.hbm [shape: f32[1,1024], index: 3, kind: input, shape index: {}]   ;;  %s6761_s4 = inlined_call_operand.hbm [shape: bf16[1024,1024], index: 4, kind: input, shape index: {}]   ;;  %s6762_s5 = inlined_call_operand.hbm [shape: f32[1,1024], index: 5, kind: input, shape index: {}]   ;;  %s6763_s6 = inlined_call_operand.vmem [shape: bf16[1024,16], index: 6, kind: input, shape index: {}]   ;;  %s6764_s7 = inlined_call_operand.hbm [shape: f32[1,16], index: 7, kind: input, shape index: {}]   ;;  %s6765_s8 = inlined_call_operand.hbm [shape: f32[8,16], index: 8, kind: output, shape index: {}]  }
   0x1   :  { %14 = vsyncpa [#allocation6], 0 }
   0x2   :  { %15 = vsyncpa [#allocation9], 0 }
   0x3   :  { %16 = vsyncpa [#allocation12], 0 }
   0x4   :  { %17 = vsyncpa [#allocation4], 0  ;;  %s6220_s27 = smov [#allocation5]   ;;  %s6221_s29 = smov [#allocation8]  }
   0x5   :  { %s34_s28 = sshll.u32 %s6220_s27, 4  ;;  %s56_s30 = sshll.u32 %s6221_s29, 4  ;;  %s35_s28 = int_to_ptr.vmem [resolvable:$true] %s34_s28  ;;  %s57_s30 = int_to_ptr.vmem [resolvable:$true] %s56_s30 }
   0x6   :  { %s6034_s11 = scalar_lea.hbm %s6758_s1, 128 }
   0x7   :  { %p6035_p0 = scmp.ne.s32.totalorder %s6758_s1, %s6034_s11  ;;  %p6038_p1 = scmp.lt.u32.totalorder %s6034_s11, %s6758_s1 }
   0x9   :  { %p6040_p2 = pnand %p6038_p1, %p6035_p0 }
   0xb   :  { %6043 = shalt.err (!%p6040_p2)
}
   0xc   :  { %s6044_s16 = scalar_lea.vmem %s35_s28, 128  ;;  %p6049_p4 = scmp.lt.s32.totalorder %s35_s28, %s35_s28 }
   0xd   :  { %p6045_p3 = scmp.ne.s32.totalorder %s35_s28, %s6044_s16  ;;  %p6050_p5 = scmp.lt.s32.totalorder %s6044_s16, %s6044_s16 }
   0xf   :  { %p6051_p6 = por %p6050_p5, %p6049_p4 }
  0x11   :  { %p6052_p7 = pnand %p6051_p6, %p6045_p3 }
  0x13   :  { %6055 = shalt.err (!%p6052_p7)
}
  0x14   :  { %37 = dma.hbm_to_vmem [thread:$0]  %s6758_s1, 128, %s35_s28, [#allocation6]  }
  0x15   :  { %s6056_s21 = scalar_lea.hbm %s6760_s3, 128 }
  0x16   :  { %p6057_p8 = scmp.ne.s32.totalorder %s6760_s3, %s6056_s21  ;;  %p6060_p9 = scmp.lt.u32.totalorder %s6056_s21, %s6760_s3 }
  0x18   :  { %p6062_p10 = pnand %p6060_p9, %p6057_p8 }
  0x1a   :  { %6065 = shalt.err (!%p6062_p10)
}
  0x1b   :  { %s6066_s26 = scalar_lea.vmem %s57_s30, 128  ;;  %p6071_p12 = scmp.lt.s32.totalorder %s57_s30, %s57_s30 }
  0x1c   :  { %p6067_p11 = scmp.ne.s32.totalorder %s57_s30, %s6066_s26  ;;  %p6072_p13 = scmp.lt.s32.totalorder %s6066_s26, %s6066_s26 }
  0x1e   :  { %p6073_p0 = por %p6072_p13, %p6071_p12 }
  0x20   :  { %p6074_p1 = pnand %p6073_p0, %p6067_p11 }
  0x22   :  { %6077 = shalt.err (!%p6074_p1)
}
  0x23   :  { %59 = dma.hbm_to_vmem [thread:$0]  %s6760_s3, 128, %s57_s30, [#allocation9]  }
  0x24   :  { %s6222_s28 = smov [#allocation11]   ;;  %s6223_s9 = smov [#allocation2]  }
  0x25   :  { %s78_s29 = sshll.u32 %s6222_s28, 4  ;;  %s24_s10 = sshll.u32 %s6223_s9, 4  ;;  %s79_s29 = int_to_ptr.vmem [resolvable:$true] %s78_s29  ;;  %s25_s10 = int_to_ptr.vmem [resolvable:$true] %s24_s10 }
  0x26   :  { %s6078_s13 = scalar_lea.hbm %s6762_s5, 128 }
  0x27   :  { %p6079_p2 = scmp.ne.s32.totalorder %s6762_s5, %s6078_s13  ;;  %p6082_p3 = scmp.lt.u32.totalorder %s6078_s13, %s6762_s5 }
  0x29   :  { %p6084_p4 = pnand %p6082_p3, %p6079_p2 }
  0x2b   :  { %6087 = shalt.err (!%p6084_p4)
}
  0x2c   :  { %s6088_s3 = scalar_lea.vmem %s79_s29, 128  ;;  %p6093_p6 = scmp.lt.s32.totalorder %s79_s29, %s79_s29 }
  0x2d   :  { %p6089_p5 = scmp.ne.s32.totalorder %s79_s29, %s6088_s3  ;;  %p6094_p7 = scmp.lt.s32.totalorder %s6088_s3, %s6088_s3 }
  0x2f   :  { %p6095_p8 = por %p6094_p7, %p6093_p6 }
  0x31   :  { %p6096_p9 = pnand %p6095_p8, %p6089_p5 }
  0x33   :  { %6099 = shalt.err (!%p6096_p9)
}
  0x34   :  { %81 = dma.hbm_to_vmem [thread:$0]  %s6762_s5, 128, %s79_s29, [#allocation12]  }
  0x35   :  { %s6100_s21 = scalar_lea.hbm %s6757_s0, 128 }
  0x36   :  { %p6101_p10 = scmp.ne.s32.totalorder %s6757_s0, %s6100_s21  ;;  %p6104_p11 = scmp.lt.u32.totalorder %s6100_s21, %s6757_s0 }
  0x38   :  { %p6106_p12 = pnand %p6104_p11, %p6101_p10 }
  0x3a   :  { %6109 = shalt.err (!%p6106_p12)
}
  0x3b   :  { %s6110_s26 = scalar_lea.vmem %s25_s10, 128  ;;  %p6115_p0 = scmp.lt.s32.totalorder %s25_s10, %s25_s10 }
  0x3c   :  { %p6111_p13 = scmp.ne.s32.totalorder %s25_s10, %s6110_s26  ;;  %p6116_p1 = scmp.lt.s32.totalorder %s6110_s26, %s6110_s26 }
  0x3e   :  { %p6117_p2 = por %p6116_p1, %p6115_p0 }
  0x40   :  { %p6118_p3 = pnand %p6117_p2, %p6111_p13 }
  0x42   :  { %6121 = shalt.err (!%p6118_p3)
}
  0x43   :  { %27 = dma.hbm_to_vmem [thread:$0]  %s6757_s0, 128, %s25_s10, [#allocation3]  }
  0x44   :  { %s6224_s27 = smov [#allocation7]   ;;  %s6122_s11 = scalar_lea.hbm %s6759_s2, 4096 }
  0x45   :  { %s43_s28 = sshll.u32 %s6224_s27, 4  ;;  %p6123_p4 = scmp.ne.s32.totalorder %s6759_s2, %s6122_s11  ;;  %s44_s28 = int_to_ptr.vmem [resolvable:$true] %s43_s28 }
  0x46   :  { %p6126_p5 = scmp.lt.u32.totalorder %s6122_s11, %s6759_s2 }
  0x48   :  { %p6128_p6 = pnand %p6126_p5, %p6123_p4 }
  0x4a   :  { %6131 = shalt.err (!%p6128_p6)
}
  0x4b   :  { %s6132_s16 = scalar_lea.vmem %s44_s28, 4096  ;;  %p6137_p8 = scmp.lt.s32.totalorder %s44_s28, %s44_s28 }
  0x4c   :  { %p6133_p7 = scmp.ne.s32.totalorder %s44_s28, %s6132_s16  ;;  %p6138_p9 = scmp.lt.s32.totalorder %s6132_s16, %s6132_s16 }
  0x4e   :  { %p6139_p10 = por %p6138_p9, %p6137_p8 }
  0x50   :  { %p6140_p11 = pnand %p6139_p10, %p6133_p7 }
  0x52   :  { %6143 = shalt.err (!%p6140_p11)
}
  0x53   :  { %s6225_s0 = smov 512   ;;  %s6226_s10 = smov 32  }
  0x54   :  { %49 = dma.hbm_to_vmem [thread:$0]  %s6759_s2, 4096, %s44_s28, [#allocation6], %s6225_s0, %s6225_s0, %s6226_s10  }
  0x55   :  { %s6227_s30 = smov [#allocation10]   ;;  %s6228_s19 = smov [#allocation13]  }
  0x56   :  { %s65_s18 = sshll.u32 %s6227_s30, 4  ;;  %s90_s20 = sshll.u32 %s6228_s19, 4  ;;  %s66_s18 = int_to_ptr.vmem [resolvable:$true] %s65_s18  ;;  %s91_s20 = int_to_ptr.vmem [resolvable:$true] %s90_s20 }
  0x57   :  { %s6144_s23 = scalar_lea.hbm %s6761_s4, 65536 }
  0x58   :  { %p6145_p12 = scmp.ne.s32.totalorder %s6761_s4, %s6144_s23  ;;  %p6148_p13 = scmp.lt.u32.totalorder %s6144_s23, %s6761_s4 }
  0x5a   :  { %p6150_p0 = pnand %p6148_p13, %p6145_p12 }
  0x5c   :  { %6153 = shalt.err (!%p6150_p0)
}
  0x5d   :  { %s6154_s2 = scalar_lea.vmem %s66_s18, 65536  ;;  %p6159_p2 = scmp.lt.s32.totalorder %s66_s18, %s66_s18 }
  0x5e   :  { %p6155_p1 = scmp.ne.s32.totalorder %s66_s18, %s6154_s2  ;;  %p6160_p3 = scmp.lt.s32.totalorder %s6154_s2, %s6154_s2 }
  0x60   :  { %p6161_p4 = por %p6160_p3, %p6159_p2 }
  0x62   :  { %p6162_p5 = pnand %p6161_p4, %p6155_p1 }
  0x64   :  { %6165 = shalt.err (!%p6162_p5)
}
  0x65   :  { %71 = dma.hbm_to_vmem [thread:$0]  %s6761_s4, 65536, %s66_s18, [#allocation9], %s6225_s0, %s6225_s0, %s6226_s10  }
  0x66   :  { %s6166_s9 = scalar_lea.hbm %s6764_s7, 16 }
  0x67   :  { %p6167_p6 = scmp.ne.s32.totalorder %s6764_s7, %s6166_s9  ;;  %p6170_p7 = scmp.lt.u32.totalorder %s6166_s9, %s6764_s7 }
  0x69   :  { %p6172_p8 = pnand %p6170_p7, %p6167_p6 }
  0x6b   :  { %6175 = shalt.err (!%p6172_p8)
}
  0x6c   :  { %s6176_s15 = scalar_lea.vmem %s91_s20, 16  ;;  %s6180_s16 = scalar_lea.vmem %s91_s20, 32 }
  0x6d   :  { %p6177_p9 = scmp.ne.s32.totalorder %s91_s20, %s6176_s15  ;;  %p6181_p10 = scmp.lt.s32.totalorder %s91_s20, %s91_s20 }
  0x6e   :  { %p6182_p11 = scmp.lt.s32.totalorder %s6180_s16, %s6176_s15 }
  0x70   :  { %p6183_p12 = por %p6182_p11, %p6181_p10 }
  0x72   :  { %p6184_p13 = pnand %p6183_p12, %p6177_p9 }
  0x74   :  { %6187 = shalt.err (!%p6184_p13)
}
  0x75   :  { %93 = dma.hbm_to_vmem [thread:$0]  %s6764_s7, 16, %s91_s20, [#allocation12]  }
  0x76   :  { %6210 = dma.done.wait [#allocation3], 128  }
  0x77   :  { %6211 = vsyncadd [#allocation3], 4294967168 }
  0x78   :  { %6212 = dma.done.wait [#allocation6], 4224  }
  0x79   :  { %6213 = vsyncadd [#allocation6], 4294963072 }
  0x7a   :  { %6214 = dma.done.wait [#allocation9], 65664  }
  0x7b   :  { %6215 = vsyncadd [#allocation9], 4294901632 }
  0x7c   :  { %6216 = dma.done.wait [#allocation12], 144  }
  0x7d   :  { %6217 = vsyncadd [#allocation12], 4294967152  ;;  %v6229_v0 = vmov 0   ;;  %v136_v1 = vld [vmem:[#allocation7 + $0x80] sm:$0xff]  ;;  %v138_v8 = vld [vmem:[#allocation7 + $0x90] sm:$0xff]  ;;  %vm232_vm0 = vcmask 261120  }
  0x7e   :  { %268 = vmatprep.mubr.bf16.mxu0 %v6229_v0  ;;  %309 = vmatprep.mubr.bf16.mxu1 %v6229_v0  ;;  %v140_v2 = vld [vmem:[#allocation7 + $0xa0] sm:$0xff]  ;;  %v142_v9 = vld [vmem:[#allocation7 + $0xb0] sm:$0xff]  ;;  %v118_v11 = vld [vmem:[#allocation5] sm:$0xff]  ;;  %vm5178_vm1 = vcmask 130048  }
  0x7f   :  { %v144_v3 = vld [vmem:[#allocation7 + $0xc0] sm:$0xff]  ;;  %v5199_v4 = vcombine.high %v136_v1, %v140_v2  ;;  %v5198_v5 = vcombine.low %v136_v1, %v140_v2  ;;  %v5203_v12 = vcombine.high %v138_v8, %v142_v9  ;;  %v146_v13 = vld [vmem:[#allocation7 + $0xd0] sm:$0xff]  ;;  %v137_v15 = vld [vmem:[#allocation7 + $0x88] sm:$0xff]  ;;  %v6362_v18 = vpack.c.bf16 %v118_v11, %v118_v11 }
  0x80   :  { %v148_v6 = vld [vmem:[#allocation7 + $0xe0] sm:$0xff]  ;;  %v150_v14 = vld [vmem:[#allocation7 + $0xf0] sm:$0xff]  ;;  %v141_v16 = vld [vmem:[#allocation7 + $0xa8] sm:$0xff]  ;;  %v5202_v22 = vcombine.low %v138_v8, %v142_v9 }
  0x81   :  { %v5207_v7 = vcombine.high %v144_v3, %v148_v6  ;;  %236 = vmatprep.subr.bf16.mxu0 %v5199_v4  ;;  %v5206_v10 = vcombine.low %v144_v3, %v148_v6  ;;  %v145_v17 = vld [vmem:[#allocation7 + $0xc8] sm:$0xff]  ;;  %v5201_v19 = vcombine.high %v137_v15, %v141_v16  ;;  %v5200_v20 = vcombine.low %v137_v15, %v141_v16  ;;  %v139_v24 = vld [vmem:[#allocation7 + $0x98] sm:$0xff]  ;;  %v120_v27 = vld [vmem:[#allocation7] sm:$0xff] }
  0x82   :  { %237 = vmatpush1.bf16.msra.mxu0 %v5198_v5  ;;  %v149_v21 = vld [vmem:[#allocation7 + $0xe8] sm:$0xff]  ;;  %v143_v25 = vld [vmem:[#allocation7 + $0xb8] sm:$0xff]  ;;  %v5211_v26 = vcombine.high %v146_v13, %v150_v14  ;;  %v124_v28 = vld [vmem:[#allocation7 + $0x20] sm:$0xff]  ;;  %v5210_v31 = vcombine.low %v146_v13, %v150_v14 }
  0x83   :  { %238 = vmatprep.subr.bf16.mxu0 %v5207_v7  ;;  %v5209_v23 = vcombine.high %v145_v17, %v149_v21  ;;  %277 = vmatprep.subr.bf16.mxu1 %v5201_v19  ;;  %v5208_v29 = vcombine.low %v145_v17, %v149_v21  ;;  %v5205_v30 = vcombine.high %v139_v24, %v143_v25  ;;  %v147_v32 = vld [vmem:[#allocation7 + $0xd8] sm:$0xff]  ;;  %v128_v35 = vld [vmem:[#allocation7 + $0x40] sm:$0xff]  ;;  %v121_v40 = vld [vmem:[#allocation7 + $0x8] sm:$0xff] }
  0x84   :  { %278 = vmatpush1.bf16.msra.mxu1 %v5200_v20  ;;  %v151_v33 = vld [vmem:[#allocation7 + $0xf8] sm:$0xff]  ;;  %v5219_v34 = vcombine.high %v120_v27, %v124_v28  ;;  %v132_v36 = vld [vmem:[#allocation7 + $0x60] sm:$0xff]  ;;  %v5204_v37 = vcombine.low %v139_v24, %v143_v25  ;;  %v5218_v39 = vcombine.low %v120_v27, %v124_v28  ;;  %v125_v41 = vld [vmem:[#allocation7 + $0x28] sm:$0xff] }
  0x85   :  { %279 = vmatprep.subr.bf16.mxu1 %v5209_v23  ;;  %v5213_v38 = vcombine.high %v147_v32, %v151_v33  ;;  %v5227_v42 = vcombine.high %v128_v35, %v132_v36  ;;  %v122_v43 = vld [vmem:[#allocation7 + $0x10] sm:$0xff]  ;;  %v5212_v45 = vcombine.low %v147_v32, %v151_v33  ;;  %v5221_v46 = vcombine.high %v121_v40, %v125_v41  ;;  %v129_v49 = vld [vmem:[#allocation7 + $0x48] sm:$0xff]  ;;  %v123_v57 = vld [vmem:[#allocation7 + $0x18] sm:$0xff] }
  0x86   :  { %239 = vmatpush1.bf16.msra.mxu0 %v5206_v10  ;;  %v126_v44 = vld [vmem:[#allocation7 + $0x30] sm:$0xff]  ;;  %v5226_v47 = vcombine.low %v128_v35, %v132_v36  ;;  %v133_v50 = vld [vmem:[#allocation7 + $0x68] sm:$0xff]  ;;  %v5220_v54 = vcombine.low %v121_v40, %v125_v41  ;;  %v127_v58 = vld [vmem:[#allocation7 + $0x38] sm:$0xff] }
  0x87   :  { %318 = vmatprep.subr.bf16.mxu0 %v5203_v12  ;;  %v116_v48 = vld [vmem:[#allocation2] sm:$0xff]  ;;  %v5223_v51 = vcombine.high %v122_v43, %v126_v44  ;;  %v5229_v56 = vcombine.high %v129_v49, %v133_v50  ;;  %v5222_v59 = vcombine.low %v122_v43, %v126_v44  ;;  %v713_v60 = vld [vmem:[#allocation10] sm:$0xff]  ;;  %v5228_v63 = vcombine.low %v129_v49, %v133_v50  ;;  %v131_v1 = vld [vmem:[#allocation7 + $0x58] sm:$0xff] }
  0x88   :  { %280 = vmatpush1.bf16.msra.mxu1 %v5208_v29  ;;  %v130_v52 = vld [vmem:[#allocation7 + $0x50] sm:$0xff]  ;;  %v6373_v55 = vpack.c.bf16 %v116_v48, %v116_v48  ;;  %v717_v61 = vld [vmem:[#allocation10 + $0x20] sm:$0xff]  ;;  %v135_v2 = vld [vmem:[#allocation7 + $0x78] sm:$0xff]  ;;  %v5225_v3 = vcombine.high %v123_v57, %v127_v58  ;;  %v5224_v8 = vcombine.low %v123_v57, %v127_v58 }
  0x89   :  { %5214 = vmatmul.mubr.msk.bf16.vlgmr.msra.gmra.mrb[0].mxu0 %vm232_vm0, %v6362_v18  ;;  %359 = vmatprep.subr.bf16.mxu1 %v5205_v30  ;;  %v134_v53 = vld [vmem:[#allocation7 + $0x70] sm:$0xff]  ;;  %v721_v5 = vld [vmem:[#allocation10 + $0x40] sm:$0xff]  ;;  %v5239_v7 = vcombine.high %v713_v60, %v717_v61  ;;  %v5233_v11 = vcombine.high %v131_v1, %v135_v2  ;;  %v5238_v12 = vcombine.low %v713_v60, %v717_v61 }
  0x8a   :  { %319 = vmatpush1.bf16.msra.mxu0 %v5202_v22  ;;  %350 = vmatprep.mubr.bf16.mxu0 %v6229_v0  ;;  %v5231_v62 = vcombine.high %v130_v52, %v134_v53  ;;  %v5230_v4 = vcombine.low %v130_v52, %v134_v53  ;;  %v725_v6 = vld [vmem:[#allocation10 + $0x60] sm:$0xff]  ;;  %v714_v9 = vld [vmem:[#allocation10 + $0x8] sm:$0xff]  ;;  %v5232_v16 = vcombine.low %v131_v1, %v135_v2 }
  0x8b   :  { %320 = vmatprep.subr.bf16.mxu0 %v5211_v26  ;;  %5215 = vmatmul.mubr.msk.bf16.vlgmr.msra.gmra.mrb[0].mxu1 %vm232_vm0, %v6362_v18  ;;  %v718_v10 = vld [vmem:[#allocation10 + $0x28] sm:$0xff]  ;;  %v729_v13 = vld [vmem:[#allocation10 + $0x80] sm:$0xff]  ;;  %v5247_v15 = vcombine.high %v721_v5, %v725_v6  ;;  %v5246_v20 = vcombine.low %v721_v5, %v725_v6 }
  0x8c   :  { %360 = vmatpush1.bf16.msra.mxu1 %v5204_v37  ;;  %391 = vmatprep.mubr.bf16.mxu1 %v6229_v0  ;;  %v733_v14 = vld [vmem:[#allocation10 + $0xa0] sm:$0xff]  ;;  %v722_v17 = vld [vmem:[#allocation10 + $0x48] sm:$0xff]  ;;  %v5241_v19 = vcombine.high %v714_v9, %v718_v10  ;;  %v5240_v24 = vcombine.low %v714_v9, %v718_v10 }
  0x8d   :  { %361 = vmatprep.subr.bf16.mxu1 %v5213_v38  ;;  %v737_v21 = vld [vmem:[#allocation10 + $0xc0] sm:$0xff]  ;;  %v5255_v23 = vcombine.high %v729_v13, %v733_v14  ;;  %v730_v25 = vld [vmem:[#allocation10 + $0x88] sm:$0xff] }
  0x8e   :  { %321 = vmatpush1.bf16.msra.mxu0 %v5210_v31  ;;  %v741_v22 = vld [vmem:[#allocation10 + $0xe0] sm:$0xff]  ;;  %v734_v26 = vld [vmem:[#allocation10 + $0xa8] sm:$0xff] }
  0x8f   :  { %483 = vmatprep.subr.bf16.mxu0 %v5219_v34  ;;  %v745_v28 = vld [vmem:[#allocation10 + $0x100] sm:$0xff]  ;;  %v5263_v30 = vcombine.high %v737_v21, %v741_v22  ;;  %v738_v32 = vld [vmem:[#allocation10 + $0xc8] sm:$0xff]  ;;  %v5257_v34 = vcombine.high %v730_v25, %v734_v26  ;;  %v5262_v35 = vcombine.low %v737_v21, %v741_v22 }
  0x90   :  { %362 = vmatpush1.bf16.msra.mxu1 %v5212_v45  ;;  %v749_v29 = vld [vmem:[#allocation10 + $0x120] sm:$0xff]  ;;  %v742_v33 = vld [vmem:[#allocation10 + $0xe8] sm:$0xff] }
  0x91   :  { %5216 = vmatmul.mubr.msk.bf16.vlgmr.msra.gmra.mrb[4].mxu0 %vm232_vm0, %v6362_v18  ;;  %524 = vmatprep.subr.bf16.mxu1 %v5221_v46  ;;  %v753_v36 = vld [vmem:[#allocation10 + $0x140] sm:$0xff]  ;;  %v5271_v38 = vcombine.high %v745_v28, %v749_v29  ;;  %v746_v40 = vld [vmem:[#allocation10 + $0x108] sm:$0xff]  ;;  %v5270_v43 = vcombine.low %v745_v28, %v749_v29 }
  0x92   :  { %484 = vmatpush1.bf16.msra.mxu0 %v5218_v39  ;;  %515 = vmatprep.mubr.bf16.mxu0 %v6229_v0  ;;  %v757_v37 = vld [vmem:[#allocation10 + $0x160] sm:$0xff]  ;;  %v5256_v39 = vcombine.low %v730_v25, %v734_v26  ;;  %v750_v41 = vld [vmem:[#allocation10 + $0x128] sm:$0xff] }
  0x93   :  { %485 = vmatprep.subr.bf16.mxu0 %v5227_v42  ;;  %5217 = vmatmul.mubr.msk.bf16.vlgmr.msra.gmra.mrb[4].mxu1 %vm232_vm0, %v6362_v18  ;;  %v726_v18 = vld [vmem:[#allocation10 + $0x68] sm:$0xff]  ;;  %v5265_v42 = vcombine.high %v738_v32, %v742_v33  ;;  %v761_v44 = vld [vmem:[#allocation10 + $0x180] sm:$0xff]  ;;  %v5279_v46 = vcombine.high %v753_v36, %v757_v37  ;;  %v5273_v50 = vcombine.high %v746_v40, %v750_v41 }
  0x94   :  { %525 = vmatpush1.bf16.msra.mxu1 %v5220_v54  ;;  %556 = vmatprep.mubr.bf16.mxu1 %v6229_v0  ;;  %v5249_v27 = vcombine.high %v722_v17, %v726_v18  ;;  %v5248_v31 = vcombine.low %v722_v17, %v726_v18  ;;  %v765_v45 = vld [vmem:[#allocation10 + $0x1a0] sm:$0xff]  ;;  %v754_v48 = vld [vmem:[#allocation10 + $0x148] sm:$0xff] }
  0x95   :  { %526 = vmatprep.subr.bf16.mxu1 %v5229_v56  ;;  %v758_v49 = vld [vmem:[#allocation10 + $0x168] sm:$0xff]  ;;  %v769_v52 = vld [vmem:[#allocation10 + $0x1c0] sm:$0xff]  ;;  %v5287_v54 = vcombine.high %v761_v44, %v765_v45 }
  0x96   :  { %486 = vmatpush1.bf16.msra.mxu0 %v5226_v47  ;;  %v5264_v47 = vcombine.low %v738_v32, %v742_v33  ;;  %v773_v53 = vld [vmem:[#allocation10 + $0x1e0] sm:$0xff]  ;;  %v762_v56 = vld [vmem:[#allocation10 + $0x188] sm:$0xff]  ;;  %v5281_v58 = vcombine.high %v754_v48, %v758_v49 }
  0x97   :  { %565 = vmatprep.subr.bf16.mxu0 %v5223_v51  ;;  %v5278_v51 = vcombine.low %v753_v36, %v757_v37  ;;  %v766_v57 = vld [vmem:[#allocation10 + $0x1a8] sm:$0xff]  ;;  %v777_v60 = vld [vmem:[#allocation10 + $0x200] sm:$0xff] }
  0x98   :  { %527 = vmatpush1.bf16.msra.mxu1 %v5228_v63  ;;  %v781_v61 = vld [vmem:[#allocation10 + $0x220] sm:$0xff]  ;;  %v5280_v63 = vcombine.low %v754_v48, %v758_v49  ;;  %v770_v1 = vld [vmem:[#allocation10 + $0x1c8] sm:$0xff] }
  0x99   :  { %5234 = vmatmul.mubr.msk.bf16.vlgmr.msra.gmra.mrb[8].mxu0 %vm232_vm0, %v6373_v55  ;;  %606 = vmatprep.subr.bf16.mxu1 %v5225_v3  ;;  %v774_v2 = vld [vmem:[#allocation10 + $0x1e8] sm:$0xff]  ;;  %v5289_v3 = vcombine.high %v762_v56, %v766_v57  ;;  %v785_v5 = vld [vmem:[#allocation10 + $0x240] sm:$0xff] }
  0x9a   :  { %566 = vmatpush1.bf16.msra.mxu0 %v5222_v59  ;;  %597 = vmatprep.mubr.bf16.mxu0 %v6229_v0  ;;  %v5286_v59 = vcombine.low %v761_v44, %v765_v45  ;;  %v789_v6 = vld [vmem:[#allocation10 + $0x260] sm:$0xff]  ;;  %v778_v9 = vld [vmem:[#allocation10 + $0x208] sm:$0xff] }
  0x9b   :  { %567 = vmatprep.subr.bf16.mxu0 %v5231_v62  ;;  %5235 = vmatmul.mubr.msk.bf16.vlgmr.msra.gmra.mrb[8].mxu1 %vm232_vm0, %v6373_v55  ;;  %v5295_v62 = vcombine.high %v769_v52, %v773_v53  ;;  %v782_v10 = vld [vmem:[#allocation10 + $0x228] sm:$0xff]  ;;  %v793_v22 = vld [vmem:[#allocation10 + $0x280] sm:$0xff] }
  0x9c   :  { %607 = vmatpush1.bf16.msra.mxu1 %v5224_v8  ;;  %638 = vmatprep.mubr.bf16.mxu1 %v6229_v0  ;;  %v5254_v0 = vcombine.low %v729_v13, %v733_v14  ;;  %v5288_v8 = vcombine.low %v762_v56, %v766_v57  ;;  %v5311_v13 = vcombine.high %v785_v5, %v789_v6  ;;  %v786_v17 = vld [vmem:[#allocation10 + $0x248] sm:$0xff]  ;;  %v801_v29 = vld [vmem:[#allocation10 + $0x2c0] sm:$0xff] }
  0x9d   :  { %608 = vmatprep.subr.bf16.mxu1 %v5233_v11  ;;  %v5297_v11 = vcombine.high %v770_v1, %v774_v2  ;;  %v5296_v14 = vcombine.low %v770_v1, %v774_v2  ;;  %v790_v18 = vld [vmem:[#allocation10 + $0x268] sm:$0xff]  ;;  %v809_v37 = vld [vmem:[#allocation10 + $0x300] sm:$0xff] }
  0x9e   :  { %568 = vmatpush1.bf16.msra.mxu0 %v5230_v4  ;;  %v5294_v4 = vcombine.low %v769_v52, %v773_v53  ;;  %v5312_v21 = vcombine.low %v786_v17, %v790_v18  ;;  %v798_v26 = vld [vmem:[#allocation10 + $0x2a8] sm:$0xff]  ;;  %v817_v45 = vld [vmem:[#allocation10 + $0x340] sm:$0xff] }
  0x9f   :  { %3827 = vmatprep.subr.bf16.mxu0 %v5239_v7  ;;  %v5303_v7 = vcombine.high %v777_v60, %v781_v61  ;;  %v825_v53 = vld [vmem:[#allocation10 + $0x380] sm:$0xff]  ;;  %v830_v57 = vld [vmem:[#allocation10 + $0x3a8] sm:$0xff] }
  0xa0   :  { %609 = vmatpush1.bf16.msra.mxu1 %v5232_v16  ;;  %v5310_v16 = vcombine.low %v785_v5, %v789_v6  ;;  %v838_v2 = vld [vmem:[#allocation10 + $0x3e8] sm:$0xff]  ;;  %v6388_v6 = vld [vmem:[#allocation10 + $0x400] sm:$0xff] }
  0xa1   :  { %5236 = vmatmul.mubr.msk.bf16.vlgmr.msra.gmra.mrb[12].mxu0 %vm232_vm0, %v6373_v55  ;;  %3991 = vmatprep.subr.bf16.mxu1 %v5241_v19  ;;  %v5304_v19 = vcombine.low %v778_v9, %v782_v10 }
  0xa2   :  { %3828 = vmatpush1.bf16.msra.mxu0 %v5238_v12  ;;  %v5302_v12 = vcombine.low %v777_v60, %v781_v61  ;;  %v833_v61 = vld [vmem:[#allocation10 + $0x3c0] sm:$0xff] }
  0xa3   :  { %3829 = vmatprep.subr.bf16.mxu0 %v5247_v15  ;;  %5237 = vmatmul.mubr.msk.bf16.vlgmr.msra.gmra.mrb[12].mxu1 %vm232_vm0, %v6373_v55  ;;  %v5272_v55 = vcombine.low %v746_v40, %v750_v41  ;;  %v5305_v15 = vcombine.high %v778_v9, %v782_v10  ;;  %v814_v41 = vld [vmem:[#allocation10 + $0x328] sm:$0xff] }
  0xa4   :  { %3992 = vmatpush1.bf16.msra.mxu1 %v5240_v24  ;;  %v794_v24 = vld [vmem:[#allocation10 + $0x288] sm:$0xff] }
  0xa5   :  { %3993 = vmatprep.subr.bf16.mxu1 %v5249_v27  ;;  %v5321_v28 = vcombine.high %v794_v24, %v798_v26  ;;  %v6396_v10 = vld [vmem:[#allocation10 + $0x428] sm:$0xff] }
  0xa6   :  { %3830 = vmatpush1.bf16.msra.mxu0 %v5246_v20  ;;  %v5313_v20 = vcombine.high %v786_v17, %v790_v18  ;;  %v649_v18 = vlaneseq }
  0xa7   :  { %3831 = vmatprep.subr.bf16.mxu0 %v5255_v23  ;;  %v797_v23 = vld [vmem:[#allocation10 + $0x2a0] sm:$0xff] }
  0xa8   :  { %3994 = vmatpush1.bf16.msra.mxu1 %v5248_v31  ;;  %v5319_v25 = vcombine.high %v793_v22, %v797_v23  ;;  %v5318_v27 = vcombine.low %v793_v22, %v797_v23  ;;  %v802_v31 = vld [vmem:[#allocation10 + $0x2c8] sm:$0xff] }
  0xa9   :  { %3995 = vmatprep.subr.bf16.mxu1 %v5257_v34  ;;  %v806_v34 = vld [vmem:[#allocation10 + $0x2e8] sm:$0xff] }
  0xaa   :  { %3832 = vmatpush1.bf16.msra.mxu0 %v5254_v0  ;;  %v5320_v0 = vcombine.low %v794_v24, %v798_v26  ;;  %v5329_v36 = vcombine.high %v802_v31, %v806_v34 }
  0xab   :  { %3833 = vmatprep.subr.bf16.mxu0 %v5263_v30  ;;  %v805_v30 = vld [vmem:[#allocation10 + $0x2e0] sm:$0xff] }
  0xac   :  { %3996 = vmatpush1.bf16.msra.mxu1 %v5256_v39  ;;  %v5326_v32 = vcombine.low %v801_v29, %v805_v30  ;;  %v5327_v33 = vcombine.high %v801_v29, %v805_v30  ;;  %v810_v39 = vld [vmem:[#allocation10 + $0x308] sm:$0xff] }
  0xad   :  { %3997 = vmatprep.subr.bf16.mxu1 %v5265_v42  ;;  %v5337_v44 = vcombine.high %v810_v39, %v814_v41 }
  0xae   :  { %3834 = vmatpush1.bf16.msra.mxu0 %v5262_v35  ;;  %v5328_v35 = vcombine.low %v802_v31, %v806_v34 }
  0xaf   :  { %3835 = vmatprep.subr.bf16.mxu0 %v5271_v38  ;;  %v813_v38 = vld [vmem:[#allocation10 + $0x320] sm:$0xff] }
  0xb0   :  { %3998 = vmatpush1.bf16.msra.mxu1 %v5264_v47  ;;  %v5335_v40 = vcombine.high %v809_v37, %v813_v38  ;;  %v5334_v42 = vcombine.low %v809_v37, %v813_v38  ;;  %v818_v47 = vld [vmem:[#allocation10 + $0x348] sm:$0xff] }
  0xb1   :  { %3999 = vmatprep.subr.bf16.mxu1 %v5273_v50  ;;  %v822_v50 = vld [vmem:[#allocation10 + $0x368] sm:$0xff] }
  0xb2   :  { %3836 = vmatpush1.bf16.msra.mxu0 %v5270_v43  ;;  %v5336_v43 = vcombine.low %v810_v39, %v814_v41  ;;  %v5345_v52 = vcombine.high %v818_v47, %v822_v50 }
  0xb3   :  { %3837 = vmatprep.subr.bf16.mxu0 %v5279_v46  ;;  %v821_v46 = vld [vmem:[#allocation10 + $0x360] sm:$0xff] }
  0xb4   :  { %4000 = vmatpush1.bf16.msra.mxu1 %v5272_v55  ;;  %v5342_v48 = vcombine.low %v817_v45, %v821_v46  ;;  %v5343_v49 = vcombine.high %v817_v45, %v821_v46  ;;  %v826_v55 = vld [vmem:[#allocation10 + $0x388] sm:$0xff] }
  0xb5   :  { %4001 = vmatprep.subr.bf16.mxu1 %v5281_v58  ;;  %v5353_v60 = vcombine.high %v826_v55, %v830_v57 }
  0xb6   :  { %3838 = vmatpush1.bf16.msra.mxu0 %v5278_v51  ;;  %v5344_v51 = vcombine.low %v818_v47, %v822_v50  ;;  %v853_v50 = vld [vmem:[#allocation10 + $0x460] sm:$0xff] }
  0xb7   :  { %3839 = vmatprep.subr.bf16.mxu0 %v5287_v54  ;;  %v829_v54 = vld [vmem:[#allocation10 + $0x3a0] sm:$0xff] }
  0xb8   :  { %4002 = vmatpush1.bf16.msra.mxu1 %v5280_v63  ;;  %v5351_v56 = vcombine.high %v825_v53, %v829_v54  ;;  %v5350_v58 = vcombine.low %v825_v53, %v829_v54  ;;  %v834_v63 = vld [vmem:[#allocation10 + $0x3c8] sm:$0xff] }
  0xb9   :  { %4003 = vmatprep.subr.bf16.mxu1 %v5289_v3  ;;  %v5361_v5 = vcombine.high %v834_v63, %v838_v2 }
  0xba   :  { %3840 = vmatpush1.bf16.msra.mxu0 %v5286_v59  ;;  %v5352_v59 = vcombine.low %v826_v55, %v830_v57 }
  0xbb   :  { %3841 = vmatprep.subr.bf16.mxu0 %v5295_v62  ;;  %v837_v62 = vld [vmem:[#allocation10 + $0x3e0] sm:$0xff] }
  0xbc   :  { %4004 = vmatpush1.bf16.msra.mxu1 %v5288_v8  ;;  %v5359_v1 = vcombine.high %v833_v61, %v837_v62  ;;  %v5358_v3 = vcombine.low %v833_v61, %v837_v62  ;;  %v6392_v8 = vld [vmem:[#allocation10 + $0x408] sm:$0xff] }
  0xbd   :  { %4005 = vmatprep.subr.bf16.mxu1 %v5297_v11 }
  0xbe   :  { %3842 = vmatpush1.bf16.msra.mxu0 %v5294_v4  ;;  %v5360_v4 = vcombine.low %v834_v63, %v838_v2 }
  0xbf   :  { %3843 = vmatprep.subr.bf16.mxu0 %v5303_v7  ;;  %v6390_v7 = vld [vmem:[#allocation10 + $0x420] sm:$0xff] }
  0xc0   :  { %4006 = vmatpush1.bf16.msra.mxu1 %v5296_v14  ;;  %v5367_v9 = vcombine.high %v6388_v6, %v6390_v7  ;;  %v5366_v11 = vcombine.low %v6388_v6, %v6390_v7  ;;  %v870_v6 = vld [vmem:[#allocation10 + $0x4e8] sm:$0xff] }
  0xc1   :  { %4007 = vmatprep.subr.bf16.mxu1 %v5305_v15 }
  0xc2   :  { %3844 = vmatpush1.bf16.msra.mxu0 %v5302_v12  ;;  %v5368_v12 = vcombine.low %v6392_v8, %v6396_v10 }
  0xc3   :  { %3845 = vmatprep.subr.bf16.mxu0 %v5311_v13  ;;  %v5369_v13 = vcombine.high %v6392_v8, %v6396_v10 }
  0xc4   :  { %4008 = vmatpush1.bf16.msra.mxu1 %v5304_v19 }
  0xc5   :  { %4009 = vmatprep.subr.bf16.mxu1 %v5313_v20  ;;  %v6404_v20 = vshrl.u32 %v649_v18, 7  ;;  %v861_v18 = vld [vmem:[#allocation10 + $0x4a0] sm:$0xff] }
  0xc6   :  { %3846 = vmatpush1.bf16.msra.mxu0 %v5310_v16 }
  0xc7   :  { %3847 = vmatprep.subr.bf16.mxu0 %v5319_v25  ;;  %v655_v29 = vsub.s32 1, %v6404_v20  ;;  %v659_v39 = vsub.s32 2, %v6404_v20  ;;  %v667_v45 = vsub.s32 4, %v6404_v20  ;;  %v671_v46 = vsub.s32 5, %v6404_v20 }
  0xc8   :  { %4010 = vmatpush1.bf16.msra.mxu1 %v5312_v21 }
  0xc9   :  { %4011 = vmatprep.subr.bf16.mxu1 %v5321_v28  ;;  %v6407_v28 = vld [vmem:[#allocation8] sm:$0xff] }
  0xca   :  { %3848 = vmatpush1.bf16.msra.mxu0 %v5318_v27  ;;  %v656_v34 = vrot.slane %v6407_v28, %v655_v29  ;;  %v660_v53 = vrot.slane %v6407_v28, %v659_v39  ;;  %v668_v57 = vrot.slane %v6407_v28, %v667_v45 }
  0xcb   :  { %3849 = vmatprep.subr.bf16.mxu0 %v5327_v33 }
  0xcc   :  { %4012 = vmatpush1.bf16.msra.mxu1 %v5320_v0  ;;  %v651_v0 = vsub.s32 0, %v6404_v20 }
  0xcd   :  { %4013 = vmatprep.subr.bf16.mxu1 %v5329_v36 }
  0xce   :  { %3850 = vmatpush1.bf16.msra.mxu0 %v5326_v32  ;;  %v652_v31 = vrot.slane %v6407_v28, %v651_v0 }
  0xcf   :  { %3851 = vmatprep.subr.bf16.mxu0 %v5335_v40 }
  0xd0   :  { %4014 = vmatpush1.bf16.msra.mxu1 %v5328_v35 }
  0xd1   :  { %4015 = vmatprep.subr.bf16.mxu1 %v5337_v44 }
  0xd2   :  { %3852 = vmatpush1.bf16.msra.mxu0 %v5334_v42  ;;  %v663_v42 = vsub.s32 3, %v6404_v20 }
  0xd3   :  { %3853 = vmatprep.subr.bf16.mxu0 %v5343_v49 }
  0xd4   :  { %4016 = vmatpush1.bf16.msra.mxu1 %v5336_v43 }
  0xd5   :  { %4017 = vmatprep.subr.bf16.mxu1 %v5345_v52  ;;  %v854_v52 = vld [vmem:[#allocation10 + $0x468] sm:$0xff] }
  0xd6   :  { %3854 = vmatpush1.bf16.msra.mxu0 %v5342_v48  ;;  %v849_v48 = vld [vmem:[#allocation10 + $0x440] sm:$0xff] }
  0xd7   :  { %3855 = vmatprep.subr.bf16.mxu0 %v5351_v56  ;;  %v664_v56 = vrot.slane %v6407_v28, %v663_v42  ;;  %v5375_v63 = vcombine.high %v849_v48, %v853_v50 }
  0xd8   :  { %4018 = vmatpush1.bf16.msra.mxu1 %v5344_v51  ;;  %v850_v51 = vld [vmem:[#allocation10 + $0x448] sm:$0xff] }
  0xd9   :  { %4019 = vmatprep.subr.bf16.mxu1 %v5353_v60 }
  0xda   :  { %3856 = vmatpush1.bf16.msra.mxu0 %v5350_v58  ;;  %v672_v58 = vrot.slane %v6407_v28, %v671_v46 }
  0xdb   :  { %3857 = vmatprep.subr.bf16.mxu0 %v5359_v1  ;;  %v5377_v1 = vcombine.high %v850_v51, %v854_v52 }
  0xdc   :  { %4020 = vmatpush1.bf16.msra.mxu1 %v5352_v59 }
  0xdd   :  { %4021 = vmatprep.subr.bf16.mxu1 %v5361_v5 }
  0xde   :  { %3858 = vmatpush1.bf16.msra.mxu0 %v5358_v3 }
  0xdf   :  { %3868 = vmatprep.subr.bf16.mxu0 %v5367_v9 }
  0xe0   :  { %4022 = vmatpush1.bf16.msra.mxu1 %v5360_v4 }
  0xe1   :  { %4032 = vmatprep.subr.bf16.mxu1 %v5369_v13  ;;  %v857_v13 = vld [vmem:[#allocation10 + $0x480] sm:$0xff] }
 0x15c   :  { %v270_v14 = vpop.f32.mrb[0].mxu0 }
 0x15d   :  { %v272_v15 = vpop.f32.mrb[1].mxu0 }
 0x15e   :  { %v274_v16 = vpop.f32.mrb[2].mxu0  ;;  %v311_v19 = vpop.f32.mrb[0].mxu1 }
 0x15f   :  { %v275_v17 = vpop.f32.mrb[3].mxu0  ;;  %v313_v21 = vpop.f32.mrb[1].mxu1  ;;  %v675_v16 = vsub.s32 6, %v6404_v20 }
 0x160   :  { %v315_v23 = vpop.f32.mrb[2].mxu1 }
 0x161   :  { %v316_v25 = vpop.f32.mrb[3].mxu1  ;;  %v862_v23 = vld [vmem:[#allocation10 + $0x4a8] sm:$0xff] }
 0x162   :  { %v679_v25 = vsub.s32 7, %v6404_v20 }
 0x164   :  { %v352_v22 = vpop.f32.mrb[4].mxu0  ;;  %v680_v8 = vrot.slane %v6407_v28, %v679_v25 }
 0x165   :  { %v354_v24 = vpop.f32.mrb[5].mxu0 }
 0x166   :  { %v356_v26 = vpop.f32.mrb[6].mxu0  ;;  %v6410_v30 = vpop.f32.mrb[4].mxu1 }
 0x167   :  { %v357_v27 = vpop.f32.mrb[7].mxu0  ;;  %v6415_v32 = vpop.f32.mrb[5].mxu1 }
 0x168   :  { %v397_v35 = vpop.f32.mrb[6].mxu1 }
 0x169   :  { %v398_v38 = vpop.f32.mrb[7].mxu1  ;;  %v5383_v35 = vcombine.high %v857_v13, %v861_v18 }
 0x16a   :  { %v676_v38 = vrot.slane %v6407_v28, %v675_v16  ;;  %v874_v28 = vld [vmem:[#allocation10 + $0x508] sm:$0xff] }
 0x16c   :  { %v517_v33 = vpop.f32.mrb[8].mxu0 }
 0x16d   :  { %v518_v36 = vadd.f32 %v517_v33, %v270_v14  ;;  %v519_v37 = vpop.f32.mrb[9].mxu0  ;;  %v5376_v33 = vcombine.low %v850_v51, %v854_v52  ;;  %v873_v51 = vld [vmem:[#allocation10 + $0x500] sm:$0xff] }
 0x16e   :  { %v520_v40 = vadd.f32 %v519_v37, %v272_v15  ;;  %v521_v41 = vpop.f32.mrb[10].mxu0  ;;  %v558_v55 = vpop.f32.mrb[8].mxu1  ;;  %v865_v37 = vld [vmem:[#allocation10 + $0x4c0] sm:$0xff] }
 0x16f   :  { %v689_v43 = vadd.f32 %v652_v31, %v518_v36  ;;  %v522_v44 = vpop.f32.mrb[11].mxu0  ;;  %v559_v59 = vadd.f32 %v558_v55, %v311_v19  ;;  %v560_v60 = vpop.f32.mrb[9].mxu1  ;;  %v858_v19 = vld [vmem:[#allocation10 + $0x488] sm:$0xff] }
 0x170   :  { %v690_v47 = vadd.f32 %v656_v34, %v520_v40  ;;  %v561_v2 = vadd.f32 %v560_v60, %v313_v21  ;;  %v562_v3 = vpop.f32.mrb[10].mxu1  ;;  %v5385_v36 = vcombine.high %v858_v19, %v862_v23  ;;  %v869_v40 = vld [vmem:[#allocation10 + $0x4e0] sm:$0xff]  ;;  %v866_v41 = vld [vmem:[#allocation10 + $0x4c8] sm:$0xff]  ;;  %v5384_v44 = vcombine.low %v858_v19, %v862_v23 }
 0x171   :  { %v697_v49 = vmax.f32 %v689_v43, 0.0  ;;  %v6440_v14 = vadd.f32 %v660_v53, %v559_v59  ;;  %v563_v15 = vpop.f32.mrb[11].mxu1  ;;  %v5382_v43 = vcombine.low %v857_v13, %v861_v18  ;;  %v878_v55 = vld [vmem:[#allocation10 + $0x528] sm:$0xff]  ;;  %v881_v59 = vld [vmem:[#allocation10 + $0x540] sm:$0xff] }
 0x172   :  { %v698_v54 = vmax.f32 %v690_v47, 0.0  ;;  %v692_v21 = vadd.f32 %v664_v56, %v561_v2  ;;  %v5392_v56 = vcombine.low %v866_v41, %v870_v6  ;;  %v885_v60 = vld [vmem:[#allocation10 + $0x560] sm:$0xff]  ;;  %v5400_v2 = vcombine.low %v874_v28, %v878_v55  ;;  %v890_v15 = vld [vmem:[#allocation10 + $0x588] sm:$0xff] }
 0x173   :  { %v6438_v4 = vpack.c.bf16 %v697_v49, %v697_v49  ;;  %v5391_v49 = vcombine.high %v865_v37, %v869_v40  ;;  %v5407_v3 = vcombine.high %v881_v59, %v885_v60  ;;  %v893_v13 = vld [vmem:[#allocation10 + $0x5a0] sm:$0xff]  ;;  %v5406_v18 = vcombine.low %v881_v59, %v885_v60 }
 0x174   :  { %v6436_v61 = vpack.c.bf16 %v698_v54, %v698_v54  ;;  %v599_v62 = vpop.f32.mrb[12].mxu0  ;;  %v700_v34 = vmax.f32 %v692_v21, 0.0  ;;  %v877_v54 = vld [vmem:[#allocation10 + $0x520] sm:$0xff] }
 0x175   :  { %v600_v5 = vadd.f32 %v599_v62, %v352_v22  ;;  %v601_v9 = vpop.f32.mrb[13].mxu0  ;;  %v882_v62 = vld [vmem:[#allocation10 + $0x548] sm:$0xff]  ;;  %v929_v60 = vld [vmem:[#allocation10 + $0x6c0] sm:$0xff] }
 0x176   :  { %v602_v17 = vadd.f32 %v601_v9, %v354_v24  ;;  %3859 = vmatprep.mubr.bf16.mxu0 %v6436_v61  ;;  %4023 = vmatprep.mubr.bf16.mxu1 %v6436_v61  ;;  %v603_v26 = vpop.f32.mrb[14].mxu0  ;;  %v5374_v24 = vcombine.low %v849_v48, %v853_v50  ;;  %v6461_v7 = vpack.c.bf16 %v700_v34, %v700_v34  ;;  %v889_v9 = vld [vmem:[#allocation10 + $0x580] sm:$0xff] }
 0x177   :  { %v6446_v22 = vadd.f32 %v668_v57, %v600_v5  ;;  %3860 = vmatmul.mubr.bf16.vlgmr.msra.gmra.mrb[16].mxu0 %v6438_v4  ;;  %4024 = vmatmul.mubr.bf16.vlgmr.msra.gmra.mrb[16].mxu1 %v6438_v4  ;;  %v604_v27 = vpop.f32.mrb[15].mxu0  ;;  %v5393_v50 = vcombine.high %v866_v41, %v870_v6  ;;  %v5399_v57 = vcombine.high %v873_v51, %v877_v54  ;;  %v897_v26 = vld [vmem:[#allocation10 + $0x5c0] sm:$0xff]  ;;  %v906_v41 = vld [vmem:[#allocation10 + $0x608] sm:$0xff] }
 0x178   :  { %v6450_v31 = vadd.f32 %v672_v58, %v602_v17  ;;  %3869 = vmatpush1.bf16.msra.mxu0 %v5366_v11  ;;  %4033 = vmatpush1.bf16.msra.mxu1 %v5368_v12  ;;  %v640_v11 = vpop.f32.mrb[12].mxu1  ;;  %v5401_v58 = vcombine.high %v874_v28, %v878_v55  ;;  %v894_v17 = vld [vmem:[#allocation10 + $0x5a8] sm:$0xff]  ;;  %v5415_v23 = vcombine.high %v889_v9, %v893_v13  ;;  %v901_v27 = vld [vmem:[#allocation10 + $0x5e0] sm:$0xff] }
 0x179   :  { %3870 = vmatprep.subr.bf16.mxu0 %v5375_v63  ;;  %4034 = vmatprep.subr.bf16.mxu1 %v5377_v1  ;;  %v641_v10 = vadd.f32 %v640_v11, %v6410_v30  ;;  %v642_v12 = vpop.f32.mrb[13].mxu1  ;;  %v886_v63 = vld [vmem:[#allocation10 + $0x568] sm:$0xff]  ;;  %v5398_v1 = vcombine.low %v873_v51, %v877_v54  ;;  %v5417_v21 = vcombine.high %v890_v15, %v894_v17  ;;  %v921_v54 = vld [vmem:[#allocation10 + $0x680] sm:$0xff] }
 0x17a   :  { %v643_v47 = vadd.f32 %v642_v12, %v6415_v32  ;;  %v644_v48 = vpop.f32.mrb[14].mxu1  ;;  %3900 = vmatprep.mubr.bf16.mxu0 %v6461_v7  ;;  %4064 = vmatprep.mubr.bf16.mxu1 %v6461_v7  ;;  %v5390_v32 = vcombine.low %v865_v37, %v869_v40  ;;  %v5409_v5 = vcombine.high %v882_v62, %v886_v63  ;;  %v909_v40 = vld [vmem:[#allocation10 + $0x620] sm:$0xff]  ;;  %v910_v6 = vld [vmem:[#allocation10 + $0x628] sm:$0xff] }
 0x17b   :  { %v6468_v52 = vadd.f32 %v676_v38, %v641_v10  ;;  %v645_v53 = vpop.f32.mrb[15].mxu1  ;;  %v5408_v19 = vcombine.low %v882_v62, %v886_v63  ;;  %v5414_v34 = vcombine.low %v889_v9, %v893_v13  ;;  %v905_v38 = vld [vmem:[#allocation10 + $0x600] sm:$0xff]  ;;  %v5422_v11 = vcombine.low %v897_v26, %v901_v27  ;;  %v918_v48 = vld [vmem:[#allocation10 + $0x668] sm:$0xff] }
 0x17c   :  { %3871 = vmatpush1.bf16.msra.mxu0 %v5374_v24  ;;  %4035 = vmatpush1.bf16.msra.mxu1 %v5376_v33  ;;  %v6470_v30 = vadd.f32 %v680_v8, %v643_v47  ;;  %v898_v24 = vld [vmem:[#allocation10 + $0x5c8] sm:$0xff]  ;;  %v5431_v10 = vcombine.high %v905_v38, %v909_v40  ;;  %v5433_v12 = vcombine.high %v906_v41, %v910_v6  ;;  %v925_v28 = vld [vmem:[#allocation10 + $0x6a0] sm:$0xff] }
 0x17d   :  { %3872 = vmatprep.subr.bf16.mxu0 %v5383_v35  ;;  %4036 = vmatprep.subr.bf16.mxu1 %v5385_v36  ;;  %v902_v33 = vld [vmem:[#allocation10 + $0x5e8] sm:$0xff]  ;;  %v5416_v35 = vcombine.low %v890_v15, %v894_v17  ;;  %v5423_v36 = vcombine.high %v897_v26, %v901_v27  ;;  %v933_v62 = vld [vmem:[#allocation10 + $0x6e0] sm:$0xff] }
 0x17e   :  { %v5425_v37 = vcombine.high %v898_v24, %v902_v33  ;;  %v5424_v8 = vcombine.low %v898_v24, %v902_v33  ;;  %v914_v47 = vld [vmem:[#allocation10 + $0x648] sm:$0xff]  ;;  %v937_v13 = vld [vmem:[#allocation10 + $0x700] sm:$0xff] }
 0x17f   :  { %v5441_v53 = vcombine.high %v914_v47, %v918_v48  ;;  %v922_v55 = vld [vmem:[#allocation10 + $0x688] sm:$0xff]  ;;  %v941_v15 = vld [vmem:[#allocation10 + $0x720] sm:$0xff] }
 0x180   :  { %3873 = vmatpush1.bf16.msra.mxu0 %v5382_v43  ;;  %4037 = vmatpush1.bf16.msra.mxu1 %v5384_v44  ;;  %v913_v43 = vld [vmem:[#allocation10 + $0x640] sm:$0xff]  ;;  %v930_v63 = vld [vmem:[#allocation10 + $0x6c8] sm:$0xff] }
 0x181   :  { %3874 = vmatprep.subr.bf16.mxu0 %v5391_v49  ;;  %4038 = vmatprep.subr.bf16.mxu1 %v5393_v50  ;;  %v917_v44 = vld [vmem:[#allocation10 + $0x660] sm:$0xff]  ;;  %v5430_v49 = vcombine.low %v905_v38, %v909_v40  ;;  %v5432_v50 = vcombine.low %v906_v41, %v910_v6  ;;  %v938_v17 = vld [vmem:[#allocation10 + $0x708] sm:$0xff] }
 0x182   :  { %v5439_v51 = vcombine.high %v913_v43, %v917_v44  ;;  %v945_v27 = vld [vmem:[#allocation10 + $0x740] sm:$0xff]  ;;  %v946_v33 = vld [vmem:[#allocation10 + $0x748] sm:$0xff] }
 0x183   :  { %v949_v24 = vld [vmem:[#allocation10 + $0x760] sm:$0xff]  ;;  %v954_v6 = vld [vmem:[#allocation10 + $0x788] sm:$0xff] }
 0x184   :  { %3875 = vmatpush1.bf16.msra.mxu0 %v5390_v32  ;;  %4039 = vmatpush1.bf16.msra.mxu1 %v5392_v56  ;;  %v926_v32 = vld [vmem:[#allocation10 + $0x6a8] sm:$0xff]  ;;  %v5438_v56 = vcombine.low %v913_v43, %v917_v44  ;;  %v953_v40 = vld [vmem:[#allocation10 + $0x780] sm:$0xff] }
 0x185   :  { %3876 = vmatprep.subr.bf16.mxu0 %v5399_v57  ;;  %4040 = vmatprep.subr.bf16.mxu1 %v5401_v58  ;;  %v5440_v57 = vcombine.low %v914_v47, %v918_v48  ;;  %v5447_v58 = vcombine.high %v921_v54, %v925_v28  ;;  %v5449_v59 = vcombine.high %v922_v55, %v926_v32  ;;  %v957_v41 = vld [vmem:[#allocation10 + $0x7a0] sm:$0xff]  ;;  %v962_v48 = vld [vmem:[#allocation10 + $0x7c8] sm:$0xff] }
 0x186   :  { %v961_v44 = vld [vmem:[#allocation10 + $0x7c0] sm:$0xff] }
 0x187   :  { %v965_v47 = vld [vmem:[#allocation10 + $0x7e0] sm:$0xff] }
 0x188   :  { %3877 = vmatpush1.bf16.msra.mxu0 %v5398_v1  ;;  %4041 = vmatpush1.bf16.msra.mxu1 %v5400_v2  ;;  %v934_v1 = vld [vmem:[#allocation10 + $0x6e8] sm:$0xff]  ;;  %v5446_v2 = vcombine.low %v921_v54, %v925_v28  ;;  %v969_v28 = vld [vmem:[#allocation10 + $0x800] sm:$0xff] }
 0x189   :  { %3878 = vmatprep.subr.bf16.mxu0 %v5407_v3  ;;  %4042 = vmatprep.subr.bf16.mxu1 %v5409_v5  ;;  %v5448_v3 = vcombine.low %v922_v55, %v926_v32  ;;  %v5455_v5 = vcombine.high %v929_v60, %v933_v62  ;;  %v5457_v9 = vcombine.high %v930_v63, %v934_v1  ;;  %v973_v55 = vld [vmem:[#allocation10 + $0x820] sm:$0xff]  ;;  %v970_v32 = vld [vmem:[#allocation10 + $0x808] sm:$0xff] }
 0x18c   :  { %3879 = vmatpush1.bf16.msra.mxu0 %v5406_v18  ;;  %4043 = vmatpush1.bf16.msra.mxu1 %v5408_v19  ;;  %v942_v18 = vld [vmem:[#allocation10 + $0x728] sm:$0xff]  ;;  %v5454_v19 = vcombine.low %v929_v60, %v933_v62  ;;  %v5495_v60 = vcombine.high %v969_v28, %v973_v55 }
 0x18d   :  { %3880 = vmatprep.subr.bf16.mxu0 %v5415_v23  ;;  %4044 = vmatprep.subr.bf16.mxu1 %v5417_v21  ;;  %v5456_v23 = vcombine.low %v930_v63, %v934_v1  ;;  %v5463_v21 = vcombine.high %v937_v13, %v941_v15  ;;  %v5465_v26 = vcombine.high %v938_v17, %v942_v18  ;;  %v702_v63 = vmax.f32 %v6450_v31, 0.0  ;;  %v977_v1 = vld [vmem:[#allocation10 + $0x840] sm:$0xff]  ;;  %v986_v31 = vld [vmem:[#allocation10 + $0x888] sm:$0xff] }
 0x190   :  { %3881 = vmatpush1.bf16.msra.mxu0 %v5414_v34  ;;  %4045 = vmatpush1.bf16.msra.mxu1 %v5416_v35  ;;  %v950_v34 = vld [vmem:[#allocation10 + $0x768] sm:$0xff]  ;;  %v5462_v35 = vcombine.low %v937_v13, %v941_v15 }
 0x191   :  { %3882 = vmatprep.subr.bf16.mxu0 %v5423_v36  ;;  %4046 = vmatprep.subr.bf16.mxu1 %v5425_v37  ;;  %v5464_v36 = vcombine.low %v938_v17, %v942_v18  ;;  %v5471_v37 = vcombine.high %v945_v27, %v949_v24  ;;  %v5473_v38 = vcombine.high %v946_v33, %v950_v34 }
 0x192   :  { %v6478_v17 = vpack.c.bf16 %v702_v63, %v702_v63 }
 0x194   :  { %3883 = vmatpush1.bf16.msra.mxu0 %v5422_v11  ;;  %4047 = vmatpush1.bf16.msra.mxu1 %v5424_v8  ;;  %v958_v11 = vld [vmem:[#allocation10 + $0x7a8] sm:$0xff]  ;;  %v5470_v8 = vcombine.low %v945_v27, %v949_v24 }
 0x195   :  { %3884 = vmatprep.subr.bf16.mxu0 %v5431_v10  ;;  %4048 = vmatprep.subr.bf16.mxu1 %v5433_v12  ;;  %v5472_v10 = vcombine.low %v946_v33, %v950_v34  ;;  %v5479_v12 = vcombine.high %v953_v40, %v957_v41  ;;  %v5481_v43 = vcombine.high %v954_v6, %v958_v11  ;;  %v993_v34 = vld [vmem:[#allocation10 + $0x8c0] sm:$0xff] }
 0x198   :  { %3885 = vmatpush1.bf16.msra.mxu0 %v5430_v49  ;;  %4049 = vmatpush1.bf16.msra.mxu1 %v5432_v50  ;;  %v966_v49 = vld [vmem:[#allocation10 + $0x7e8] sm:$0xff]  ;;  %v5478_v50 = vcombine.low %v953_v40, %v957_v41 }
 0x199   :  { %3886 = vmatprep.subr.bf16.mxu0 %v5439_v51  ;;  %4050 = vmatprep.subr.bf16.mxu1 %v5441_v53  ;;  %v5480_v51 = vcombine.low %v954_v6, %v958_v11  ;;  %v5487_v53 = vcombine.high %v961_v44, %v965_v47  ;;  %v5489_v54 = vcombine.high %v962_v48, %v966_v49  ;;  %v1001_v11 = vld [vmem:[#allocation10 + $0x900] sm:$0xff] }
 0x19c   :  { %3887 = vmatpush1.bf16.msra.mxu0 %v5438_v56  ;;  %4051 = vmatpush1.bf16.msra.mxu1 %v5440_v57  ;;  %v974_v56 = vld [vmem:[#allocation10 + $0x828] sm:$0xff]  ;;  %v5486_v57 = vcombine.low %v961_v44, %v965_v47 }
 0x19d   :  { %3888 = vmatprep.subr.bf16.mxu0 %v5447_v58  ;;  %4052 = vmatprep.subr.bf16.mxu1 %v5449_v59  ;;  %v5488_v58 = vcombine.low %v962_v48, %v966_v49  ;;  %v699_v59 = vmax.f32 %v6440_v14, 0.0  ;;  %v5497_v62 = vcombine.high %v970_v32, %v974_v56  ;;  %v5496_v15 = vcombine.low %v970_v32, %v974_v56  ;;  %v1009_v49 = vld [vmem:[#allocation10 + $0x940] sm:$0xff] }
 0x19e   :  { %v1017_v56 = vld [vmem:[#allocation10 + $0x980] sm:$0xff] }
 0x19f   :  { %v6476_v13 = vpack.c.bf16 %v699_v59, %v699_v59  ;;  %v1022_v59 = vld [vmem:[#allocation10 + $0x9a8] sm:$0xff] }
 0x1a0   :  { %3889 = vmatpush1.bf16.msra.mxu0 %v5446_v2  ;;  %4053 = vmatpush1.bf16.msra.mxu1 %v5448_v3  ;;  %v981_v2 = vld [vmem:[#allocation10 + $0x860] sm:$0xff]  ;;  %v978_v3 = vld [vmem:[#allocation10 + $0x848] sm:$0xff] }
 0x1a1   :  { %3890 = vmatprep.subr.bf16.mxu0 %v5455_v5  ;;  %4054 = vmatprep.subr.bf16.mxu1 %v5457_v9  ;;  %v982_v5 = vld [vmem:[#allocation10 + $0x868] sm:$0xff]  ;;  %v5494_v9 = vcombine.low %v969_v28, %v973_v55  ;;  %v5503_v14 = vcombine.high %v977_v1, %v981_v2 }
 0x1a2   :  { %v5505_v18 = vcombine.high %v978_v3, %v982_v5  ;;  %v5504_v27 = vcombine.low %v978_v3, %v982_v5  ;;  %v1029_v3 = vld [vmem:[#allocation10 + $0x9e0] sm:$0xff]  ;;  %v1026_v5 = vld [vmem:[#allocation10 + $0x9c8] sm:$0xff] }
 0x1a4   :  { %3891 = vmatpush1.bf16.msra.mxu0 %v5454_v19  ;;  %4055 = vmatpush1.bf16.msra.mxu1 %v5456_v23  ;;  %v985_v19 = vld [vmem:[#allocation10 + $0x880] sm:$0xff] }
 0x1a5   :  { %3892 = vmatprep.subr.bf16.mxu0 %v5463_v21  ;;  %4056 = vmatprep.subr.bf16.mxu1 %v5465_v26  ;;  %v989_v23 = vld [vmem:[#allocation10 + $0x8a0] sm:$0xff]  ;;  %v990_v21 = vld [vmem:[#allocation10 + $0x8a8] sm:$0xff]  ;;  %v5502_v26 = vcombine.low %v977_v1, %v981_v2 }
 0x1a6   :  { %v5511_v24 = vcombine.high %v985_v19, %v989_v23  ;;  %v5513_v33 = vcombine.high %v986_v31, %v990_v21  ;;  %v5512_v40 = vcombine.low %v986_v31, %v990_v21  ;;  %v1025_v2 = vld [vmem:[#allocation10 + $0x9c0] sm:$0xff]  ;;  %v1034_v21 = vld [vmem:[#allocation10 + $0xa08] sm:$0xff] }
 0x1a7   :  { %v1037_v31 = vld [vmem:[#allocation10 + $0xa20] sm:$0xff] }
 0x1a8   :  { %3893 = vmatpush1.bf16.msra.mxu0 %v5462_v35  ;;  %4057 = vmatpush1.bf16.msra.mxu1 %v5464_v36  ;;  %v997_v35 = vld [vmem:[#allocation10 + $0x8e0] sm:$0xff]  ;;  %v994_v36 = vld [vmem:[#allocation10 + $0x8c8] sm:$0xff] }
 0x1a9   :  { %3894 = vmatprep.subr.bf16.mxu0 %v5471_v37  ;;  %4058 = vmatprep.subr.bf16.mxu1 %v5473_v38  ;;  %v998_v37 = vld [vmem:[#allocation10 + $0x8e8] sm:$0xff]  ;;  %v5510_v38 = vcombine.low %v985_v19, %v989_v23  ;;  %v5519_v41 = vcombine.high %v993_v34, %v997_v35  ;;  %v1033_v23 = vld [vmem:[#allocation10 + $0xa00] sm:$0xff] }
 0x1aa   :  { %v5521_v6 = vcombine.high %v994_v36, %v998_v37  ;;  %v5520_v44 = vcombine.low %v994_v36, %v998_v37  ;;  %v1045_v36 = vld [vmem:[#allocation10 + $0xa60] sm:$0xff]  ;;  %v1042_v37 = vld [vmem:[#allocation10 + $0xa48] sm:$0xff] }
 0x1ac   :  { %3895 = vmatpush1.bf16.msra.mxu0 %v5470_v8  ;;  %4059 = vmatpush1.bf16.msra.mxu1 %v5472_v10  ;;  %v1005_v8 = vld [vmem:[#allocation10 + $0x920] sm:$0xff]  ;;  %v1002_v10 = vld [vmem:[#allocation10 + $0x908] sm:$0xff] }
 0x1ad   :  { %3896 = vmatprep.subr.bf16.mxu0 %v5479_v12  ;;  %4060 = vmatprep.subr.bf16.mxu1 %v5481_v43  ;;  %v1006_v12 = vld [vmem:[#allocation10 + $0x928] sm:$0xff]  ;;  %v5518_v43 = vcombine.low %v993_v34, %v997_v35  ;;  %v5527_v47 = vcombine.high %v1001_v11, %v1005_v8  ;;  %v1041_v35 = vld [vmem:[#allocation10 + $0xa40] sm:$0xff] }
 0x1ae   :  { %v5529_v48 = vcombine.high %v1002_v10, %v1006_v12  ;;  %v5528_v28 = vcombine.low %v1002_v10, %v1006_v12  ;;  %v1053_v10 = vld [vmem:[#allocation10 + $0xaa0] sm:$0xff]  ;;  %v1050_v12 = vld [vmem:[#allocation10 + $0xa88] sm:$0xff] }
 0x1b0   :  { %3897 = vmatpush1.bf16.msra.mxu0 %v5478_v50  ;;  %4061 = vmatpush1.bf16.msra.mxu1 %v5480_v51  ;;  %v1013_v50 = vld [vmem:[#allocation10 + $0x960] sm:$0xff]  ;;  %v1010_v51 = vld [vmem:[#allocation10 + $0x948] sm:$0xff] }
 0x1b1   :  { %3898 = vmatprep.subr.bf16.mxu0 %v5487_v53  ;;  %4062 = vmatprep.subr.bf16.mxu1 %v5489_v54  ;;  %v1014_v53 = vld [vmem:[#allocation10 + $0x968] sm:$0xff]  ;;  %v5526_v54 = vcombine.low %v1001_v11, %v1005_v8  ;;  %v5535_v55 = vcombine.high %v1009_v49, %v1013_v50  ;;  %v1049_v8 = vld [vmem:[#allocation10 + $0xa80] sm:$0xff] }
 0x1b2   :  { %v5537_v32 = vcombine.high %v1010_v51, %v1014_v53 }
 0x1b4   :  { %3899 = vmatpush1.bf16.msra.mxu0 %v5486_v57  ;;  %4063 = vmatpush1.bf16.msra.mxu1 %v5488_v58  ;;  %v1021_v57 = vld [vmem:[#allocation10 + $0x9a0] sm:$0xff]  ;;  %v1018_v58 = vld [vmem:[#allocation10 + $0x988] sm:$0xff] }
 0x1b5   :  { %3909 = vmatprep.subr.bf16.mxu0 %v5495_v60  ;;  %4073 = vmatprep.subr.bf16.mxu1 %v5497_v62  ;;  %v5534_v60 = vcombine.low %v1009_v49, %v1013_v50  ;;  %v5536_v62 = vcombine.low %v1010_v51, %v1014_v53  ;;  %v5543_v63 = vcombine.high %v1017_v56, %v1021_v57  ;;  %v1057_v50 = vld [vmem:[#allocation10 + $0xac0] sm:$0xff]  ;;  %v1058_v53 = vld [vmem:[#allocation10 + $0xac8] sm:$0xff] }
 0x1b6   :  { %v5545_v1 = vcombine.high %v1018_v58, %v1022_v59  ;;  %v1061_v51 = vld [vmem:[#allocation10 + $0xae0] sm:$0xff] }
 0x1b7   :  { %3901 = vmatmul.mubr.bf16.vlgmr.msra.gmra.mrb[16].mxu0 %v6476_v13  ;;  %4065 = vmatmul.mubr.bf16.vlgmr.msra.gmra.mrb[16].mxu1 %v6476_v13 }
 0x1b8   :  { %3910 = vmatpush1.bf16.msra.mxu0 %v5494_v9  ;;  %3941 = vmatprep.mubr.bf16.mxu0 %v6478_v17  ;;  %v1030_v9 = vld [vmem:[#allocation10 + $0x9e8] sm:$0xff] }
 0x1b9   :  { %4074 = vmatpush1.bf16.msra.mxu1 %v5496_v15  ;;  %4105 = vmatprep.mubr.bf16.mxu1 %v6478_v17  ;;  %v5542_v15 = vcombine.low %v1017_v56, %v1021_v57  ;;  %v5553_v19 = vcombine.high %v1026_v5, %v1030_v9  ;;  %v1065_v57 = vld [vmem:[#allocation10 + $0xb00] sm:$0xff] }
 0x1ba   :  { %3911 = vmatprep.subr.bf16.mxu0 %v5503_v14  ;;  %4075 = vmatprep.subr.bf16.mxu1 %v5505_v18  ;;  %v5544_v14 = vcombine.low %v1018_v58, %v1022_v59  ;;  %v5551_v18 = vcombine.high %v1025_v2, %v1029_v3  ;;  %v1069_v58 = vld [vmem:[#allocation10 + $0xb20] sm:$0xff]  ;;  %v1066_v59 = vld [vmem:[#allocation10 + $0xb08] sm:$0xff] }
 0x1bc   :  { %3912 = vmatpush1.bf16.msra.mxu0 %v5502_v26  ;;  %v1038_v26 = vld [vmem:[#allocation10 + $0xa28] sm:$0xff] }
 0x1bd   :  { %4076 = vmatpush1.bf16.msra.mxu1 %v5504_v27  ;;  %3913 = vmatprep.subr.bf16.mxu0 %v5511_v24  ;;  %v5550_v27 = vcombine.low %v1025_v2, %v1029_v3  ;;  %v5552_v24 = vcombine.low %v1026_v5, %v1030_v9  ;;  %v5561_v34 = vcombine.high %v1034_v21, %v1038_v26  ;;  %v1073_v3 = vld [vmem:[#allocation10 + $0xb40] sm:$0xff]  ;;  %v1074_v9 = vld [vmem:[#allocation10 + $0xb48] sm:$0xff] }
 0x1be   :  { %4077 = vmatprep.subr.bf16.mxu1 %v5513_v33  ;;  %v5559_v33 = vcombine.high %v1033_v23, %v1037_v31  ;;  %v1077_v5 = vld [vmem:[#allocation10 + $0xb60] sm:$0xff] }
 0x1c0   :  { %3914 = vmatpush1.bf16.msra.mxu0 %v5510_v38  ;;  %v1046_v38 = vld [vmem:[#allocation10 + $0xa68] sm:$0xff] }
 0x1c1   :  { %4078 = vmatpush1.bf16.msra.mxu1 %v5512_v40  ;;  %3915 = vmatprep.subr.bf16.mxu0 %v5519_v41  ;;  %v5558_v40 = vcombine.low %v1033_v23, %v1037_v31  ;;  %v5560_v41 = vcombine.low %v1034_v21, %v1038_v26  ;;  %v5569_v11 = vcombine.high %v1042_v37, %v1046_v38  ;;  %v1081_v31 = vld [vmem:[#allocation10 + $0xb80] sm:$0xff]  ;;  %v1082_v26 = vld [vmem:[#allocation10 + $0xb88] sm:$0xff] }
 0x1c2   :  { %4079 = vmatprep.subr.bf16.mxu1 %v5521_v6  ;;  %v5567_v6 = vcombine.high %v1041_v35, %v1045_v36  ;;  %v1085_v21 = vld [vmem:[#allocation10 + $0xba0] sm:$0xff] }
 0x1c4   :  { %3916 = vmatpush1.bf16.msra.mxu0 %v5518_v43  ;;  %v1054_v43 = vld [vmem:[#allocation10 + $0xaa8] sm:$0xff] }
 0x1c5   :  { %4080 = vmatpush1.bf16.msra.mxu1 %v5520_v44  ;;  %3917 = vmatprep.subr.bf16.mxu0 %v5527_v47  ;;  %v5566_v44 = vcombine.low %v1041_v35, %v1045_v36  ;;  %v5568_v47 = vcombine.low %v1042_v37, %v1046_v38  ;;  %v5577_v49 = vcombine.high %v1050_v12, %v1054_v43  ;;  %v1089_v36 = vld [vmem:[#allocation10 + $0xbc0] sm:$0xff]  ;;  %v1090_v38 = vld [vmem:[#allocation10 + $0xbc8] sm:$0xff] }
 0x1c6   :  { %4081 = vmatprep.subr.bf16.mxu1 %v5529_v48  ;;  %v5575_v48 = vcombine.high %v1049_v8, %v1053_v10  ;;  %v1093_v37 = vld [vmem:[#allocation10 + $0xbe0] sm:$0xff] }
 0x1c8   :  { %3918 = vmatpush1.bf16.msra.mxu0 %v5526_v54  ;;  %v1062_v54 = vld [vmem:[#allocation10 + $0xae8] sm:$0xff] }
 0x1c9   :  { %4082 = vmatpush1.bf16.msra.mxu1 %v5528_v28  ;;  %3919 = vmatprep.subr.bf16.mxu0 %v5535_v55  ;;  %v5574_v28 = vcombine.low %v1049_v8, %v1053_v10  ;;  %v5576_v55 = vcombine.low %v1050_v12, %v1054_v43  ;;  %v5585_v56 = vcombine.high %v1058_v53, %v1062_v54  ;;  %v1097_v10 = vld [vmem:[#allocation10 + $0xc00] sm:$0xff]  ;;  %v1098_v43 = vld [vmem:[#allocation10 + $0xc08] sm:$0xff] }
 0x1ca   :  { %4083 = vmatprep.subr.bf16.mxu1 %v5537_v32  ;;  %v5583_v32 = vcombine.high %v1057_v50, %v1061_v51  ;;  %v1101_v12 = vld [vmem:[#allocation10 + $0xc20] sm:$0xff] }
 0x1cc   :  { %3920 = vmatpush1.bf16.msra.mxu0 %v5534_v60  ;;  %v1070_v60 = vld [vmem:[#allocation10 + $0xb28] sm:$0xff] }
 0x1cd   :  { %4084 = vmatpush1.bf16.msra.mxu1 %v5536_v62  ;;  %3921 = vmatprep.subr.bf16.mxu0 %v5543_v63  ;;  %v5582_v62 = vcombine.low %v1057_v50, %v1061_v51  ;;  %v5584_v63 = vcombine.low %v1058_v53, %v1062_v54  ;;  %v5593_v2 = vcombine.high %v1066_v59, %v1070_v60  ;;  %v704_v53 = vmax.f32 %v6470_v30, 0.0  ;;  %v1105_v54 = vld [vmem:[#allocation10 + $0xc40] sm:$0xff] }
 0x1ce   :  { %4085 = vmatprep.subr.bf16.mxu1 %v5545_v1  ;;  %v5591_v1 = vcombine.high %v1065_v57, %v1069_v58  ;;  %v5623_v50 = vcombine.high %v1097_v10, %v1101_v12 }
 0x1d0   :  { %3922 = vmatpush1.bf16.msra.mxu0 %v5542_v15  ;;  %v1078_v15 = vld [vmem:[#allocation10 + $0xb68] sm:$0xff] }
 0x1d1   :  { %4086 = vmatpush1.bf16.msra.mxu1 %v5544_v14  ;;  %3923 = vmatprep.subr.bf16.mxu0 %v5551_v18  ;;  %v5590_v14 = vcombine.low %v1065_v57, %v1069_v58  ;;  %v5592_v18 = vcombine.low %v1066_v59, %v1070_v60  ;;  %v5601_v23 = vcombine.high %v1074_v9, %v1078_v15  ;;  %v1113_v59 = vld [vmem:[#allocation10 + $0xc80] sm:$0xff] }
 0x1d2   :  { %4087 = vmatprep.subr.bf16.mxu1 %v5553_v19  ;;  %v5599_v19 = vcombine.high %v1073_v3, %v1077_v5  ;;  %v1117_v60 = vld [vmem:[#allocation10 + $0xca0] sm:$0xff] }
 0x1d4   :  { %3924 = vmatpush1.bf16.msra.mxu0 %v5550_v27  ;;  %v1086_v27 = vld [vmem:[#allocation10 + $0xba8] sm:$0xff] }
 0x1d5   :  { %4088 = vmatpush1.bf16.msra.mxu1 %v5552_v24  ;;  %3925 = vmatprep.subr.bf16.mxu0 %v5559_v33  ;;  %v5598_v24 = vcombine.low %v1073_v3, %v1077_v5  ;;  %v5600_v33 = vcombine.low %v1074_v9, %v1078_v15  ;;  %v5609_v35 = vcombine.high %v1082_v26, %v1086_v27  ;;  %v1121_v15 = vld [vmem:[#allocation10 + $0xcc0] sm:$0xff] }
 0x1d6   :  { %4089 = vmatprep.subr.bf16.mxu1 %v5561_v34  ;;  %v5607_v34 = vcombine.high %v1081_v31, %v1085_v21  ;;  %v5639_v5 = vcombine.high %v1113_v59, %v1117_v60 }
 0x1d8   :  { %3926 = vmatpush1.bf16.msra.mxu0 %v5558_v40  ;;  %v1094_v40 = vld [vmem:[#allocation10 + $0xbe8] sm:$0xff] }
 0x1d9   :  { %4090 = vmatpush1.bf16.msra.mxu1 %v5560_v41  ;;  %3927 = vmatprep.subr.bf16.mxu0 %v5567_v6  ;;  %v5606_v41 = vcombine.low %v1081_v31, %v1085_v21  ;;  %v5608_v6 = vcombine.low %v1082_v26, %v1086_v27  ;;  %v5617_v8 = vcombine.high %v1090_v38, %v1094_v40  ;;  %v1129_v27 = vld [vmem:[#allocation10 + $0xd00] sm:$0xff] }
 0x1da   :  { %4091 = vmatprep.subr.bf16.mxu1 %v5569_v11  ;;  %v5615_v11 = vcombine.high %v1089_v36, %v1093_v37 }
 0x1dc   :  { %3928 = vmatpush1.bf16.msra.mxu0 %v5566_v44  ;;  %v1102_v44 = vld [vmem:[#allocation10 + $0xc28] sm:$0xff] }
 0x1dd   :  { %4092 = vmatpush1.bf16.msra.mxu1 %v5568_v47  ;;  %3929 = vmatprep.subr.bf16.mxu0 %v5575_v48  ;;  %v5614_v47 = vcombine.low %v1089_v36, %v1093_v37  ;;  %v701_v48 = vmax.f32 %v6446_v22, 0.0  ;;  %v5625_v51 = vcombine.high %v1098_v43, %v1102_v44  ;;  %v5624_v58 = vcombine.low %v1098_v43, %v1102_v44  ;;  %v1145_v44 = vld [vmem:[#allocation10 + $0xd80] sm:$0xff] }
 0x1de   :  { %4093 = vmatprep.subr.bf16.mxu1 %v5577_v49  ;;  %v5616_v49 = vcombine.low %v1090_v38, %v1094_v40  ;;  %v1137_v40 = vld [vmem:[#allocation10 + $0xd40] sm:$0xff] }
 0x1df   :  { %v6486_v57 = vpack.c.bf16 %v701_v48, %v701_v48  ;;  %v1146_v48 = vld [vmem:[#allocation10 + $0xd88] sm:$0xff] }
 0x1e0   :  { %3930 = vmatpush1.bf16.msra.mxu0 %v5574_v28  ;;  %v1109_v28 = vld [vmem:[#allocation10 + $0xc60] sm:$0xff] }
 0x1e1   :  { %4094 = vmatpush1.bf16.msra.mxu1 %v5576_v55  ;;  %3931 = vmatprep.subr.bf16.mxu0 %v5583_v32  ;;  %v5622_v55 = vcombine.low %v1097_v10, %v1101_v12  ;;  %v1106_v32 = vld [vmem:[#allocation10 + $0xc48] sm:$0xff]  ;;  %v5631_v22 = vcombine.high %v1105_v54, %v1109_v28 }
 0x1e2   :  { %4095 = vmatprep.subr.bf16.mxu1 %v5585_v56  ;;  %v1110_v56 = vld [vmem:[#allocation10 + $0xc68] sm:$0xff] }
 0x1e3   :  { %v5633_v30 = vcombine.high %v1106_v32, %v1110_v56  ;;  %v5632_v3 = vcombine.low %v1106_v32, %v1110_v56  ;;  %v1154_v32 = vld [vmem:[#allocation10 + $0xdc8] sm:$0xff] }
 0x1e4   :  { %3932 = vmatpush1.bf16.msra.mxu0 %v5582_v62  ;;  %v6488_v62 = vpack.c.bf16 %v704_v53, %v704_v53  ;;  %v1158_v56 = vld [vmem:[#allocation10 + $0xde8] sm:$0xff] }
 0x1e5   :  { %4096 = vmatpush1.bf16.msra.mxu1 %v5584_v63  ;;  %3933 = vmatprep.subr.bf16.mxu0 %v5591_v1  ;;  %v1114_v63 = vld [vmem:[#allocation10 + $0xc88] sm:$0xff] }
 0x1e6   :  { %4097 = vmatprep.subr.bf16.mxu1 %v5593_v2  ;;  %v1118_v1 = vld [vmem:[#allocation10 + $0xca8] sm:$0xff]  ;;  %v5630_v2 = vcombine.low %v1105_v54, %v1109_v28  ;;  %v1153_v28 = vld [vmem:[#allocation10 + $0xdc0] sm:$0xff] }
 0x1e7   :  { %v5641_v9 = vcombine.high %v1114_v63, %v1118_v1  ;;  %v5640_v31 = vcombine.low %v1114_v63, %v1118_v1  ;;  %v1165_v63 = vld [vmem:[#allocation10 + $0xe20] sm:$0xff]  ;;  %v1162_v1 = vld [vmem:[#allocation10 + $0xe08] sm:$0xff] }
 0x1e8   :  { %3934 = vmatpush1.bf16.msra.mxu0 %v5590_v14  ;;  %v1125_v14 = vld [vmem:[#allocation10 + $0xce0] sm:$0xff] }
 0x1e9   :  { %4098 = vmatpush1.bf16.msra.mxu1 %v5592_v18  ;;  %3935 = vmatprep.subr.bf16.mxu0 %v5599_v19  ;;  %v1122_v18 = vld [vmem:[#allocation10 + $0xcc8] sm:$0xff]  ;;  %v5647_v21 = vcombine.high %v1121_v15, %v1125_v14 }
 0x1ea   :  { %4099 = vmatprep.subr.bf16.mxu1 %v5601_v23  ;;  %v1126_v19 = vld [vmem:[#allocation10 + $0xce8] sm:$0xff]  ;;  %v5638_v23 = vcombine.low %v1113_v59, %v1117_v60  ;;  %v5681_v60 = vcombine.high %v1154_v32, %v1158_v56 }
 0x1eb   :  { %v5649_v26 = vcombine.high %v1122_v18, %v1126_v19  ;;  %v5648_v36 = vcombine.low %v1122_v18, %v1126_v19  ;;  %v1173_v18 = vld [vmem:[#allocation10 + $0xe60] sm:$0xff]  ;;  %v1170_v19 = vld [vmem:[#allocation10 + $0xe48] sm:$0xff] }
 0x1ec   :  { %3936 = vmatpush1.bf16.msra.mxu0 %v5598_v24  ;;  %v1133_v24 = vld [vmem:[#allocation10 + $0xd20] sm:$0xff] }
 0x1ed   :  { %4100 = vmatpush1.bf16.msra.mxu1 %v5600_v33  ;;  %3937 = vmatprep.subr.bf16.mxu0 %v5607_v34  ;;  %v1130_v33 = vld [vmem:[#allocation10 + $0xd08] sm:$0xff]  ;;  %v5655_v37 = vcombine.high %v1129_v27, %v1133_v24 }
 0x1ee   :  { %4101 = vmatprep.subr.bf16.mxu1 %v5609_v35  ;;  %v1134_v34 = vld [vmem:[#allocation10 + $0xd28] sm:$0xff]  ;;  %v5646_v35 = vcombine.low %v1121_v15, %v1125_v14  ;;  %v1169_v14 = vld [vmem:[#allocation10 + $0xe40] sm:$0xff] }
 0x1ef   :  { %v5657_v38 = vcombine.high %v1130_v33, %v1134_v34  ;;  %v5656_v10 = vcombine.low %v1130_v33, %v1134_v34  ;;  %v1181_v33 = vld [vmem:[#allocation10 + $0xea0] sm:$0xff]  ;;  %v1178_v34 = vld [vmem:[#allocation10 + $0xe88] sm:$0xff] }
 0x1f0   :  { %3938 = vmatpush1.bf16.msra.mxu0 %v5606_v41  ;;  %v1141_v41 = vld [vmem:[#allocation10 + $0xd60] sm:$0xff] }
 0x1f1   :  { %4102 = vmatpush1.bf16.msra.mxu1 %v5608_v6  ;;  %3939 = vmatprep.subr.bf16.mxu0 %v5615_v11  ;;  %v1138_v6 = vld [vmem:[#allocation10 + $0xd48] sm:$0xff]  ;;  %v5663_v12 = vcombine.high %v1137_v40, %v1141_v41 }
 0x1f2   :  { %4103 = vmatprep.subr.bf16.mxu1 %v5617_v8  ;;  %v1142_v11 = vld [vmem:[#allocation10 + $0xd68] sm:$0xff]  ;;  %v5654_v8 = vcombine.low %v1129_v27, %v1133_v24  ;;  %v1177_v24 = vld [vmem:[#allocation10 + $0xe80] sm:$0xff] }
 0x1f3   :  { %v5665_v43 = vcombine.high %v1138_v6, %v1142_v11 }
 0x1f4   :  { %3940 = vmatpush1.bf16.msra.mxu0 %v5614_v47  ;;  %v1149_v47 = vld [vmem:[#allocation10 + $0xda0] sm:$0xff] }
 0x1f5   :  { %4104 = vmatpush1.bf16.msra.mxu1 %v5616_v49  ;;  %3950 = vmatprep.subr.bf16.mxu0 %v5623_v50  ;;  %v1150_v49 = vld [vmem:[#allocation10 + $0xda8] sm:$0xff]  ;;  %v5662_v50 = vcombine.low %v1137_v40, %v1141_v41  ;;  %v5671_v53 = vcombine.high %v1145_v44, %v1149_v47  ;;  %v1185_v41 = vld [vmem:[#allocation10 + $0xec0] sm:$0xff] }
 0x1f6   :  { %4114 = vmatprep.subr.bf16.mxu1 %v5625_v51  ;;  %v5664_v51 = vcombine.low %v1138_v6, %v1142_v11  ;;  %v5673_v54 = vcombine.high %v1146_v48, %v1150_v49  ;;  %v1189_v6 = vld [vmem:[#allocation10 + $0xee0] sm:$0xff]  ;;  %v1186_v11 = vld [vmem:[#allocation10 + $0xec8] sm:$0xff] }
 0x1f7   :  { %3942 = vmatmul.mubr.bf16.vlgmr.msra.gmra.mrb[16].mxu0 %v6486_v57 }
 0x1f8   :  { %4106 = vmatmul.mubr.bf16.vlgmr.msra.gmra.mrb[16].mxu1 %v6486_v57  ;;  %3951 = vmatpush1.bf16.msra.mxu0 %v5622_v55  ;;  %v1157_v55 = vld [vmem:[#allocation10 + $0xde0] sm:$0xff] }
 0x1f9   :  { %3982 = vmatprep.mubr.bf16.mxu0 %v6488_v62  ;;  %4115 = vmatpush1.bf16.msra.mxu1 %v5624_v58  ;;  %v5670_v58 = vcombine.low %v1145_v44, %v1149_v47  ;;  %v5679_v59 = vcombine.high %v1153_v28, %v1157_v55  ;;  %v1193_v47 = vld [vmem:[#allocation10 + $0xf00] sm:$0xff] }
 0x1fa   :  { %4146 = vmatprep.mubr.bf16.mxu1 %v6488_v62  ;;  %3952 = vmatprep.subr.bf16.mxu0 %v5631_v22  ;;  %v5672_v22 = vcombine.low %v1146_v48, %v1150_v49  ;;  %v1197_v48 = vld [vmem:[#allocation10 + $0xf20] sm:$0xff]  ;;  %v1194_v49 = vld [vmem:[#allocation10 + $0xf08] sm:$0xff] }
 0x1fb   :  { %4116 = vmatprep.subr.bf16.mxu1 %v5633_v30  ;;  %v1161_v30 = vld [vmem:[#allocation10 + $0xe00] sm:$0xff] }
 0x1fc   :  { %3953 = vmatpush1.bf16.msra.mxu0 %v5630_v2  ;;  %v1166_v2 = vld [vmem:[#allocation10 + $0xe28] sm:$0xff] }
 0x1fd   :  { %4117 = vmatpush1.bf16.msra.mxu1 %v5632_v3  ;;  %3954 = vmatprep.subr.bf16.mxu0 %v5639_v5  ;;  %v5678_v3 = vcombine.low %v1153_v28, %v1157_v55  ;;  %v5680_v5 = vcombine.low %v1154_v32, %v1158_v56  ;;  %v5689_v15 = vcombine.high %v1162_v1, %v1166_v2  ;;  %v1201_v55 = vld [vmem:[#allocation10 + $0xf40] sm:$0xff]  ;;  %v1202_v56 = vld [vmem:[#allocation10 + $0xf48] sm:$0xff] }
 0x1fe   :  { %4118 = vmatprep.subr.bf16.mxu1 %v5641_v9  ;;  %v5687_v9 = vcombine.high %v1161_v30, %v1165_v63  ;;  %v1205_v32 = vld [vmem:[#allocation10 + $0xf60] sm:$0xff] }
 0x200   :  { %3955 = vmatpush1.bf16.msra.mxu0 %v5638_v23  ;;  %v1174_v23 = vld [vmem:[#allocation10 + $0xe68] sm:$0xff] }
 0x201   :  { %4119 = vmatpush1.bf16.msra.mxu1 %v5640_v31  ;;  %3956 = vmatprep.subr.bf16.mxu0 %v5647_v21  ;;  %v5686_v31 = vcombine.low %v1161_v30, %v1165_v63  ;;  %v5688_v21 = vcombine.low %v1162_v1, %v1166_v2  ;;  %v5697_v27 = vcombine.high %v1170_v19, %v1174_v23  ;;  %v1209_v63 = vld [vmem:[#allocation10 + $0xf80] sm:$0xff]  ;;  %v1210_v2 = vld [vmem:[#allocation10 + $0xf88] sm:$0xff] }
 0x202   :  { %4120 = vmatprep.subr.bf16.mxu1 %v5649_v26  ;;  %v5695_v26 = vcombine.high %v1169_v14, %v1173_v18  ;;  %v1213_v1 = vld [vmem:[#allocation10 + $0xfa0] sm:$0xff] }
 0x204   :  { %3957 = vmatpush1.bf16.msra.mxu0 %v5646_v35  ;;  %v1182_v35 = vld [vmem:[#allocation10 + $0xea8] sm:$0xff] }
 0x205   :  { %4121 = vmatpush1.bf16.msra.mxu1 %v5648_v36  ;;  %3958 = vmatprep.subr.bf16.mxu0 %v5655_v37  ;;  %v5694_v36 = vcombine.low %v1169_v14, %v1173_v18  ;;  %v5696_v37 = vcombine.low %v1170_v19, %v1174_v23  ;;  %v5705_v40 = vcombine.high %v1178_v34, %v1182_v35  ;;  %v1217_v18 = vld [vmem:[#allocation10 + $0xfc0] sm:$0xff]  ;;  %v1218_v23 = vld [vmem:[#allocation10 + $0xfc8] sm:$0xff] }
 0x206   :  { %4122 = vmatprep.subr.bf16.mxu1 %v5657_v38  ;;  %v5703_v38 = vcombine.high %v1177_v24, %v1181_v33  ;;  %v1221_v19 = vld [vmem:[#allocation10 + $0xfe0] sm:$0xff] }
 0x208   :  { %3959 = vmatpush1.bf16.msra.mxu0 %v5654_v8  ;;  %v1190_v8 = vld [vmem:[#allocation10 + $0xee8] sm:$0xff] }
 0x209   :  { %4123 = vmatpush1.bf16.msra.mxu1 %v5656_v10  ;;  %3960 = vmatprep.subr.bf16.mxu0 %v5663_v12  ;;  %v5702_v10 = vcombine.low %v1177_v24, %v1181_v33  ;;  %v5704_v12 = vcombine.low %v1178_v34, %v1182_v35  ;;  %v5713_v44 = vcombine.high %v1186_v11, %v1190_v8  ;;  %v715_v33 = vld [vmem:[#allocation10 + $0x10] sm:$0xff]  ;;  %v716_v35 = vld [vmem:[#allocation10 + $0x18] sm:$0xff] }
 0x20a   :  { %4124 = vmatprep.subr.bf16.mxu1 %v5665_v43  ;;  %v5711_v43 = vcombine.high %v1185_v41, %v1189_v6  ;;  %v719_v34 = vld [vmem:[#allocation10 + $0x30] sm:$0xff] }
 0x20c   :  { %3961 = vmatpush1.bf16.msra.mxu0 %v5662_v50  ;;  %v1198_v50 = vld [vmem:[#allocation10 + $0xf28] sm:$0xff] }
 0x20d   :  { %4125 = vmatpush1.bf16.msra.mxu1 %v5664_v51  ;;  %3962 = vmatprep.subr.bf16.mxu0 %v5671_v53  ;;  %v5710_v51 = vcombine.low %v1185_v41, %v1189_v6  ;;  %v5712_v53 = vcombine.low %v1186_v11, %v1190_v8  ;;  %v5721_v28 = vcombine.high %v1194_v49, %v1198_v50  ;;  %v723_v11 = vld [vmem:[#allocation10 + $0x50] sm:$0xff] }
 0x20e   :  { %4126 = vmatprep.subr.bf16.mxu1 %v5673_v54  ;;  %v5719_v54 = vcombine.high %v1193_v47, %v1197_v48  ;;  %v5243_v41 = vcombine.high %v715_v33, %v719_v34  ;;  %v727_v8 = vld [vmem:[#allocation10 + $0x70] sm:$0xff] }
 0x210   :  { %3963 = vmatpush1.bf16.msra.mxu0 %v5670_v58  ;;  %v1206_v58 = vld [vmem:[#allocation10 + $0xf68] sm:$0xff] }
 0x211   :  { %4127 = vmatpush1.bf16.msra.mxu1 %v5672_v22  ;;  %3964 = vmatprep.subr.bf16.mxu0 %v5679_v59  ;;  %v5718_v22 = vcombine.low %v1193_v47, %v1197_v48  ;;  %v5720_v59 = vcombine.low %v1194_v49, %v1198_v50  ;;  %v5729_v30 = vcombine.high %v1202_v56, %v1206_v58  ;;  %v735_v49 = vld [vmem:[#allocation10 + $0xb0] sm:$0xff] }
 0x212   :  { %4128 = vmatprep.subr.bf16.mxu1 %v5681_v60  ;;  %v5727_v60 = vcombine.high %v1201_v55, %v1205_v32  ;;  %v5251_v48 = vcombine.high %v723_v11, %v727_v8 }
 0x214   :  { %3965 = vmatpush1.bf16.msra.mxu0 %v5678_v3  ;;  %v1214_v3 = vld [vmem:[#allocation10 + $0xfa8] sm:$0xff] }
 0x215   :  { %4129 = vmatpush1.bf16.msra.mxu1 %v5680_v5  ;;  %3966 = vmatprep.subr.bf16.mxu0 %v5687_v9  ;;  %v5726_v5 = vcombine.low %v1201_v55, %v1205_v32  ;;  %v5728_v9 = vcombine.low %v1202_v56, %v1206_v58  ;;  %v5737_v14 = vcombine.high %v1210_v2, %v1214_v3  ;;  %v739_v56 = vld [vmem:[#allocation10 + $0xd0] sm:$0xff] }
 0x216   :  { %4130 = vmatprep.subr.bf16.mxu1 %v5689_v15  ;;  %v5735_v15 = vcombine.high %v1209_v63, %v1213_v1  ;;  %v743_v58 = vld [vmem:[#allocation10 + $0xf0] sm:$0xff] }
 0x218   :  { %3967 = vmatpush1.bf16.msra.mxu0 %v5686_v31  ;;  %v1222_v31 = vld [vmem:[#allocation10 + $0xfe8] sm:$0xff] }
 0x219   :  { %4131 = vmatpush1.bf16.msra.mxu1 %v5688_v21  ;;  %3968 = vmatprep.subr.bf16.mxu0 %v5695_v26  ;;  %v5734_v21 = vcombine.low %v1209_v63, %v1213_v1  ;;  %v5736_v26 = vcombine.low %v1210_v2, %v1214_v3  ;;  %v5745_v24 = vcombine.high %v1218_v23, %v1222_v31  ;;  %v747_v2 = vld [vmem:[#allocation10 + $0x110] sm:$0xff] }
 0x21a   :  { %4132 = vmatprep.subr.bf16.mxu1 %v5697_v27  ;;  %v5743_v27 = vcombine.high %v1217_v18, %v1221_v19  ;;  %v5267_v63 = vcombine.high %v739_v56, %v743_v58  ;;  %v751_v3 = vld [vmem:[#allocation10 + $0x130] sm:$0xff] }
 0x21c   :  { %3969 = vmatpush1.bf16.msra.mxu0 %v5694_v36  ;;  %v720_v36 = vld [vmem:[#allocation10 + $0x38] sm:$0xff] }
 0x21d   :  { %4133 = vmatpush1.bf16.msra.mxu1 %v5696_v37  ;;  %3970 = vmatprep.subr.bf16.mxu0 %v5703_v38  ;;  %v5742_v37 = vcombine.low %v1217_v18, %v1221_v19  ;;  %v703_v38 = vmax.f32 %v6468_v52, 0.0  ;;  %v5245_v6 = vcombine.high %v716_v35, %v720_v36  ;;  %v5244_v47 = vcombine.low %v716_v35, %v720_v36  ;;  %v731_v52 = vld [vmem:[#allocation10 + $0x90] sm:$0xff]  ;;  %v764_v36 = vld [vmem:[#allocation10 + $0x198] sm:$0xff] }
 0x21e   :  { %4134 = vmatprep.subr.bf16.mxu1 %v5705_v40  ;;  %v5744_v40 = vcombine.low %v1218_v23, %v1222_v31  ;;  %v5259_v55 = vcombine.high %v731_v52, %v735_v49  ;;  %v755_v19 = vld [vmem:[#allocation10 + $0x150] sm:$0xff]  ;;  %v756_v31 = vld [vmem:[#allocation10 + $0x158] sm:$0xff] }
 0x21f   :  { %v759_v23 = vld [vmem:[#allocation10 + $0x170] sm:$0xff] }
 0x220   :  { %3971 = vmatpush1.bf16.msra.mxu0 %v5702_v10  ;;  %v5242_v10 = vcombine.low %v715_v33, %v719_v34  ;;  %v763_v34 = vld [vmem:[#allocation10 + $0x190] sm:$0xff] }
 0x221   :  { %4135 = vmatpush1.bf16.msra.mxu1 %v5704_v12  ;;  %3972 = vmatprep.subr.bf16.mxu0 %v5711_v43  ;;  %v724_v12 = vld [vmem:[#allocation10 + $0x58] sm:$0xff]  ;;  %v767_v35 = vld [vmem:[#allocation10 + $0x1b0] sm:$0xff] }
 0x222   :  { %4136 = vmatprep.subr.bf16.mxu1 %v5713_v44  ;;  %v728_v43 = vld [vmem:[#allocation10 + $0x78] sm:$0xff]  ;;  %v6495_v44 = vpack.c.bf16 %v703_v38, %v703_v38  ;;  %v5282_v38 = vcombine.low %v755_v19, %v759_v23 }
 0x223   :  { %v5253_v50 = vcombine.high %v724_v12, %v728_v43 }
 0x224   :  { %3973 = vmatpush1.bf16.msra.mxu0 %v5710_v51  ;;  %v732_v51 = vld [vmem:[#allocation10 + $0x98] sm:$0xff] }
 0x225   :  { %4137 = vmatpush1.bf16.msra.mxu1 %v5712_v53  ;;  %3974 = vmatprep.subr.bf16.mxu0 %v5719_v54  ;;  %v736_v53 = vld [vmem:[#allocation10 + $0xb8] sm:$0xff]  ;;  %v5250_v54 = vcombine.low %v723_v11, %v727_v8  ;;  %v771_v11 = vld [vmem:[#allocation10 + $0x1d0] sm:$0xff] }
 0x226   :  { %4138 = vmatprep.subr.bf16.mxu1 %v5721_v28  ;;  %v5252_v28 = vcombine.low %v724_v12, %v728_v43  ;;  %v5261_v32 = vcombine.high %v732_v51, %v736_v53  ;;  %v775_v8 = vld [vmem:[#allocation10 + $0x1f0] sm:$0xff]  ;;  %v776_v12 = vld [vmem:[#allocation10 + $0x1f8] sm:$0xff]  ;;  %v5290_v43 = vcombine.low %v763_v34, %v767_v35 }
 0x228   :  { %3975 = vmatpush1.bf16.msra.mxu0 %v5718_v22  ;;  %v740_v22 = vld [vmem:[#allocation10 + $0xd8] sm:$0xff] }
 0x229   :  { %4139 = vmatpush1.bf16.msra.mxu1 %v5720_v59  ;;  %3976 = vmatprep.subr.bf16.mxu0 %v5727_v60  ;;  %v744_v59 = vld [vmem:[#allocation10 + $0xf8] sm:$0xff]  ;;  %v5258_v60 = vcombine.low %v731_v52, %v735_v49  ;;  %v779_v49 = vld [vmem:[#allocation10 + $0x210] sm:$0xff] }
 0x22a   :  { %4140 = vmatprep.subr.bf16.mxu1 %v5729_v30  ;;  %v5260_v30 = vcombine.low %v732_v51, %v736_v53  ;;  %v5269_v1 = vcombine.high %v740_v22, %v744_v59  ;;  %v780_v51 = vld [vmem:[#allocation10 + $0x218] sm:$0xff] }
 0x22b   :  { %v784_v53 = vld [vmem:[#allocation10 + $0x238] sm:$0xff] }
 0x22c   :  { %3977 = vmatpush1.bf16.msra.mxu0 %v5726_v5  ;;  %v748_v5 = vld [vmem:[#allocation10 + $0x118] sm:$0xff] }
 0x22d   :  { %4141 = vmatpush1.bf16.msra.mxu1 %v5728_v9  ;;  %3978 = vmatprep.subr.bf16.mxu0 %v5735_v15  ;;  %v752_v9 = vld [vmem:[#allocation10 + $0x138] sm:$0xff]  ;;  %v5268_v15 = vcombine.low %v740_v22, %v744_v59 }
 0x22e   :  { %4142 = vmatprep.subr.bf16.mxu1 %v5737_v14  ;;  %v5275_v14 = vcombine.high %v747_v2, %v751_v3  ;;  %v5277_v18 = vcombine.high %v748_v5, %v752_v9  ;;  %v788_v22 = vld [vmem:[#allocation10 + $0x258] sm:$0xff] }
 0x22f   :  { %v792_v59 = vld [vmem:[#allocation10 + $0x278] sm:$0xff] }
 0x230   :  { %3979 = vmatpush1.bf16.msra.mxu0 %v5734_v21  ;;  %v760_v21 = vld [vmem:[#allocation10 + $0x178] sm:$0xff] }
 0x231   :  { %4143 = vmatpush1.bf16.msra.mxu1 %v5736_v26  ;;  %3980 = vmatprep.subr.bf16.mxu0 %v5743_v27  ;;  %v5274_v26 = vcombine.low %v747_v2, %v751_v3  ;;  %v5276_v27 = vcombine.low %v748_v5, %v752_v9  ;;  %v5285_v33 = vcombine.high %v756_v31, %v760_v21  ;;  %v795_v2 = vld [vmem:[#allocation10 + $0x290] sm:$0xff]  ;;  %v796_v5 = vld [vmem:[#allocation10 + $0x298] sm:$0xff] }
 0x232   :  { %4144 = vmatprep.subr.bf16.mxu1 %v5745_v24  ;;  %v5283_v24 = vcombine.high %v755_v19, %v759_v23  ;;  %v799_v3 = vld [vmem:[#allocation10 + $0x2b0] sm:$0xff]  ;;  %v800_v9 = vld [vmem:[#allocation10 + $0x2b8] sm:$0xff] }
 0x233   :  { %v803_v19 = vld [vmem:[#allocation10 + $0x2d0] sm:$0xff] }
 0x234   :  { %3981 = vmatpush1.bf16.msra.mxu0 %v5742_v37  ;;  %v768_v37 = vld [vmem:[#allocation10 + $0x1b8] sm:$0xff]  ;;  %v807_v23 = vld [vmem:[#allocation10 + $0x2f0] sm:$0xff] }
 0x235   :  { %4145 = vmatpush1.bf16.msra.mxu1 %v5744_v40  ;;  %4155 = vmatprep.subr.bf16.mxu0 %v5243_v41  ;;  %v5284_v40 = vcombine.low %v756_v31, %v760_v21  ;;  %v5291_v41 = vcombine.high %v763_v34, %v767_v35  ;;  %v804_v31 = vld [vmem:[#allocation10 + $0x2d8] sm:$0xff]  ;;  %v811_v34 = vld [vmem:[#allocation10 + $0x310] sm:$0xff] }
 0x236   :  { %4319 = vmatprep.subr.bf16.mxu1 %v5245_v6  ;;  %v5293_v6 = vcombine.high %v764_v36, %v768_v37  ;;  %v808_v21 = vld [vmem:[#allocation10 + $0x2f8] sm:$0xff]  ;;  %v815_v35 = vld [vmem:[#allocation10 + $0x330] sm:$0xff] }
 0x237   :  { %3983 = vmatmul.mubr.bf16.vlgmr.msra.gmra.mrb[16].mxu0 %v6495_v44 }
 0x238   :  { %4147 = vmatmul.mubr.bf16.vlgmr.msra.gmra.mrb[16].mxu1 %v6495_v44  ;;  %4156 = vmatpush1.bf16.msra.mxu0 %v5242_v10  ;;  %v772_v10 = vld [vmem:[#allocation10 + $0x1d8] sm:$0xff] }
 0x239   :  { %4187 = vmatprep.mubr.bf16.mxu0 %v6436_v61  ;;  %4320 = vmatpush1.bf16.msra.mxu1 %v5244_v47  ;;  %v5292_v47 = vcombine.low %v764_v36, %v768_v37  ;;  %v5301_v52 = vcombine.high %v772_v10, %v776_v12  ;;  %v812_v36 = vld [vmem:[#allocation10 + $0x318] sm:$0xff] }
 0x23a   :  { %4351 = vmatprep.mubr.bf16.mxu1 %v6436_v61  ;;  %4157 = vmatprep.subr.bf16.mxu0 %v5251_v48  ;;  %v5266_v61 = vcombine.low %v739_v56, %v743_v58  ;;  %v5299_v48 = vcombine.high %v771_v11, %v775_v8  ;;  %v787_v56 = vld [vmem:[#allocation10 + $0x250] sm:$0xff]  ;;  %v816_v37 = vld [vmem:[#allocation10 + $0x338] sm:$0xff] }
 0x23b   :  { %4321 = vmatprep.subr.bf16.mxu1 %v5253_v50  ;;  %v783_v50 = vld [vmem:[#allocation10 + $0x230] sm:$0xff] }
 0x23c   :  { %4158 = vmatpush1.bf16.msra.mxu0 %v5250_v54  ;;  %v5298_v54 = vcombine.low %v771_v11, %v775_v8  ;;  %v791_v58 = vld [vmem:[#allocation10 + $0x270] sm:$0xff] }
 0x23d   :  { %4322 = vmatpush1.bf16.msra.mxu1 %v5252_v28  ;;  %4159 = vmatprep.subr.bf16.mxu0 %v5259_v55  ;;  %v5300_v28 = vcombine.low %v772_v10, %v776_v12  ;;  %v5307_v55 = vcombine.high %v779_v49, %v783_v50  ;;  %v819_v11 = vld [vmem:[#allocation10 + $0x350] sm:$0xff]  ;;  %v820_v10 = vld [vmem:[#allocation10 + $0x358] sm:$0xff] }
 0x23e   :  { %4323 = vmatprep.subr.bf16.mxu1 %v5261_v32  ;;  %v5309_v32 = vcombine.high %v780_v51, %v784_v53  ;;  %v823_v8 = vld [vmem:[#allocation10 + $0x370] sm:$0xff]  ;;  %v824_v12 = vld [vmem:[#allocation10 + $0x378] sm:$0xff] }
 0x240   :  { %4160 = vmatpush1.bf16.msra.mxu0 %v5258_v60  ;;  %v5306_v60 = vcombine.low %v779_v49, %v783_v50  ;;  %v827_v49 = vld [vmem:[#allocation10 + $0x390] sm:$0xff] }
 0x241   :  { %4324 = vmatpush1.bf16.msra.mxu1 %v5260_v30  ;;  %4161 = vmatprep.subr.bf16.mxu0 %v5267_v63  ;;  %v5308_v30 = vcombine.low %v780_v51, %v784_v53  ;;  %v5315_v63 = vcombine.high %v787_v56, %v791_v58  ;;  %v831_v50 = vld [vmem:[#allocation10 + $0x3b0] sm:$0xff]  ;;  %v828_v51 = vld [vmem:[#allocation10 + $0x398] sm:$0xff] }
 0x242   :  { %4325 = vmatprep.subr.bf16.mxu1 %v5269_v1  ;;  %v5317_v1 = vcombine.high %v788_v22, %v792_v59  ;;  %v832_v53 = vld [vmem:[#allocation10 + $0x3b8] sm:$0xff] }
 0x244   :  { %4162 = vmatpush1.bf16.msra.mxu0 %v5266_v61  ;;  %v5314_v61 = vcombine.low %v787_v56, %v791_v58  ;;  %v835_v56 = vld [vmem:[#allocation10 + $0x3d0] sm:$0xff] }
 0x245   :  { %4326 = vmatpush1.bf16.msra.mxu1 %v5268_v15  ;;  %4163 = vmatprep.subr.bf16.mxu0 %v5275_v14  ;;  %v5316_v15 = vcombine.low %v788_v22, %v792_v59  ;;  %v5323_v14 = vcombine.high %v795_v2, %v799_v3  ;;  %v839_v58 = vld [vmem:[#allocation10 + $0x3f0] sm:$0xff]  ;;  %v836_v22 = vld [vmem:[#allocation10 + $0x3d8] sm:$0xff] }
 0x246   :  { %4327 = vmatprep.subr.bf16.mxu1 %v5277_v18  ;;  %v5325_v18 = vcombine.high %v796_v5, %v800_v9  ;;  %v840_v59 = vld [vmem:[#allocation10 + $0x3f8] sm:$0xff] }
 0x248   :  { %4164 = vmatpush1.bf16.msra.mxu0 %v5274_v26  ;;  %v5322_v26 = vcombine.low %v795_v2, %v799_v3  ;;  %v843_v2 = vld [vmem:[#allocation10 + $0x410] sm:$0xff] }
 0x249   :  { %4328 = vmatpush1.bf16.msra.mxu1 %v5276_v27  ;;  %4165 = vmatprep.subr.bf16.mxu0 %v5283_v24  ;;  %v5324_v27 = vcombine.low %v796_v5, %v800_v9  ;;  %v5331_v24 = vcombine.high %v803_v19, %v807_v23  ;;  %v847_v3 = vld [vmem:[#allocation10 + $0x430] sm:$0xff]  ;;  %v844_v5 = vld [vmem:[#allocation10 + $0x418] sm:$0xff] }
 0x24a   :  { %4329 = vmatprep.subr.bf16.mxu1 %v5285_v33  ;;  %v5333_v33 = vcombine.high %v804_v31, %v808_v21  ;;  %v848_v9 = vld [vmem:[#allocation10 + $0x438] sm:$0xff] }
 0x24c   :  { %4166 = vmatpush1.bf16.msra.mxu0 %v5282_v38  ;;  %v5330_v38 = vcombine.low %v803_v19, %v807_v23  ;;  %v851_v19 = vld [vmem:[#allocation10 + $0x450] sm:$0xff] }
 0x24d   :  { %4330 = vmatpush1.bf16.msra.mxu1 %v5284_v40  ;;  %4167 = vmatprep.subr.bf16.mxu0 %v5291_v41  ;;  %v5332_v40 = vcombine.low %v804_v31, %v808_v21  ;;  %v5339_v41 = vcombine.high %v811_v34, %v815_v35  ;;  %v855_v23 = vld [vmem:[#allocation10 + $0x470] sm:$0xff]  ;;  %v5370_v31 = vcombine.low %v843_v2, %v847_v3  ;;  %v852_v21 = vld [vmem:[#allocation10 + $0x458] sm:$0xff] }
 0x24e   :  { %4331 = vmatprep.subr.bf16.mxu1 %v5293_v6  ;;  %v5341_v6 = vcombine.high %v812_v36, %v816_v37 }
 0x250   :  { %4168 = vmatpush1.bf16.msra.mxu0 %v5290_v43  ;;  %v5338_v43 = vcombine.low %v811_v34, %v815_v35  ;;  %v863_v34 = vld [vmem:[#allocation10 + $0x4b0] sm:$0xff] }
 0x251   :  { %4332 = vmatpush1.bf16.msra.mxu1 %v5292_v47  ;;  %4169 = vmatprep.subr.bf16.mxu0 %v5299_v48  ;;  %v5340_v47 = vcombine.low %v812_v36, %v816_v37  ;;  %v5347_v48 = vcombine.high %v819_v11, %v823_v8  ;;  %v860_v36 = vld [vmem:[#allocation10 + $0x498] sm:$0xff] }
 0x252   :  { %4333 = vmatprep.subr.bf16.mxu1 %v5301_v52  ;;  %v5349_v52 = vcombine.high %v820_v10, %v824_v12  ;;  %v864_v37 = vld [vmem:[#allocation10 + $0x4b8] sm:$0xff] }
 0x254   :  { %4170 = vmatpush1.bf16.msra.mxu0 %v5298_v54  ;;  %v5346_v54 = vcombine.low %v819_v11, %v823_v8  ;;  %v867_v11 = vld [vmem:[#allocation10 + $0x4d0] sm:$0xff] }
 0x255   :  { %4334 = vmatpush1.bf16.msra.mxu1 %v5300_v28  ;;  %4171 = vmatprep.subr.bf16.mxu0 %v5307_v55  ;;  %v5348_v28 = vcombine.low %v820_v10, %v824_v12  ;;  %v5355_v55 = vcombine.high %v827_v49, %v831_v50  ;;  %v871_v8 = vld [vmem:[#allocation10 + $0x4f0] sm:$0xff]  ;;  %v868_v10 = vld [vmem:[#allocation10 + $0x4d8] sm:$0xff] }
 0x256   :  { %4335 = vmatprep.subr.bf16.mxu1 %v5309_v32  ;;  %v5357_v32 = vcombine.high %v828_v51, %v832_v53  ;;  %v872_v12 = vld [vmem:[#allocation10 + $0x4f8] sm:$0xff] }
 0x258   :  { %4172 = vmatpush1.bf16.msra.mxu0 %v5306_v60  ;;  %v5354_v60 = vcombine.low %v827_v49, %v831_v50  ;;  %v879_v49 = vld [vmem:[#allocation10 + $0x530] sm:$0xff]  ;;  %v876_v50 = vld [vmem:[#allocation10 + $0x518] sm:$0xff] }
 0x259   :  { %4336 = vmatpush1.bf16.msra.mxu1 %v5308_v30  ;;  %4173 = vmatprep.subr.bf16.mxu0 %v5315_v63  ;;  %v5356_v30 = vcombine.low %v828_v51, %v832_v53  ;;  %v5363_v63 = vcombine.high %v835_v56, %v839_v58  ;;  %v880_v51 = vld [vmem:[#allocation10 + $0x538] sm:$0xff]  ;;  %v5396_v53 = vcombine.low %v868_v10, %v872_v12 }
 0x25a   :  { %4337 = vmatprep.subr.bf16.mxu1 %v5317_v1  ;;  %v5365_v1 = vcombine.high %v836_v22, %v840_v59 }
 0x25c   :  { %4174 = vmatpush1.bf16.msra.mxu0 %v5314_v61  ;;  %v5362_v61 = vcombine.low %v835_v56, %v839_v58  ;;  %v884_v56 = vld [vmem:[#allocation10 + $0x558] sm:$0xff] }
 0x25d   :  { %4338 = vmatpush1.bf16.msra.mxu1 %v5316_v15  ;;  %4175 = vmatprep.subr.bf16.mxu0 %v5323_v14  ;;  %v5364_v15 = vcombine.low %v836_v22, %v840_v59  ;;  %v5371_v14 = vcombine.high %v843_v2, %v847_v3  ;;  %v888_v58 = vld [vmem:[#allocation10 + $0x578] sm:$0xff]  ;;  %v5404_v59 = vcombine.low %v876_v50, %v880_v51 }
 0x25e   :  { %4339 = vmatprep.subr.bf16.mxu1 %v5325_v18  ;;  %v5373_v18 = vcombine.high %v844_v5, %v848_v9  ;;  %v892_v2 = vld [vmem:[#allocation10 + $0x598] sm:$0xff] }
 0x25f   :  { %v896_v3 = vld [vmem:[#allocation10 + $0x5b8] sm:$0xff] }
 0x260   :  { %4176 = vmatpush1.bf16.msra.mxu0 %v5322_v26  ;;  %v856_v26 = vld [vmem:[#allocation10 + $0x478] sm:$0xff] }
 0x261   :  { %4340 = vmatpush1.bf16.msra.mxu1 %v5324_v27  ;;  %4177 = vmatprep.subr.bf16.mxu0 %v5331_v24  ;;  %v5372_v27 = vcombine.low %v844_v5, %v848_v9  ;;  %v5379_v24 = vcombine.high %v851_v19, %v855_v23  ;;  %v5381_v35 = vcombine.high %v852_v21, %v856_v26 }
 0x262   :  { %4341 = vmatprep.subr.bf16.mxu1 %v5333_v33  ;;  %v859_v33 = vld [vmem:[#allocation10 + $0x490] sm:$0xff]  ;;  %v5412_v9 = vcombine.low %v884_v56, %v888_v58 }
 0x264   :  { %4178 = vmatpush1.bf16.msra.mxu0 %v5330_v38  ;;  %v5378_v38 = vcombine.low %v851_v19, %v855_v23  ;;  %v900_v19 = vld [vmem:[#allocation10 + $0x5d8] sm:$0xff] }
 0x265   :  { %4342 = vmatpush1.bf16.msra.mxu1 %v5332_v40  ;;  %4179 = vmatprep.subr.bf16.mxu0 %v5339_v41  ;;  %v5380_v40 = vcombine.low %v852_v21, %v856_v26  ;;  %v5387_v41 = vcombine.high %v859_v33, %v863_v34  ;;  %v904_v23 = vld [vmem:[#allocation10 + $0x5f8] sm:$0xff]  ;;  %v5420_v21 = vcombine.low %v892_v2, %v896_v3 }
 0x266   :  { %4343 = vmatprep.subr.bf16.mxu1 %v5341_v6  ;;  %v5389_v6 = vcombine.high %v860_v36, %v864_v37 }
 0x268   :  { %4180 = vmatpush1.bf16.msra.mxu0 %v5338_v43  ;;  %v5386_v43 = vcombine.low %v859_v33, %v863_v34  ;;  %v911_v33 = vld [vmem:[#allocation10 + $0x630] sm:$0xff]  ;;  %v908_v34 = vld [vmem:[#allocation10 + $0x618] sm:$0xff] }
 0x269   :  { %4344 = vmatpush1.bf16.msra.mxu1 %v5340_v47  ;;  %4181 = vmatprep.subr.bf16.mxu0 %v5347_v48  ;;  %v5395_v47 = vcombine.high %v867_v11, %v871_v8  ;;  %v5397_v48 = vcombine.high %v868_v10, %v872_v12 }
 0x26a   :  { %4345 = vmatprep.subr.bf16.mxu1 %v5349_v52  ;;  %v875_v52 = vld [vmem:[#allocation10 + $0x510] sm:$0xff] }
 0x26b   :  { %v5402_v22 = vcombine.low %v875_v52, %v879_v49 }
 0x26c   :  { %4182 = vmatpush1.bf16.msra.mxu0 %v5346_v54  ;;  %v5403_v54 = vcombine.high %v875_v52, %v879_v49  ;;  %v924_v52 = vld [vmem:[#allocation10 + $0x698] sm:$0xff] }
 0x26d   :  { %4346 = vmatpush1.bf16.msra.mxu1 %v5348_v28  ;;  %4183 = vmatprep.subr.bf16.mxu0 %v5355_v55  ;;  %v5405_v28 = vcombine.high %v876_v50, %v880_v51  ;;  %v883_v55 = vld [vmem:[#allocation10 + $0x550] sm:$0xff]  ;;  %v928_v49 = vld [vmem:[#allocation10 + $0x6b8] sm:$0xff] }
 0x26e   :  { %4347 = vmatprep.subr.bf16.mxu1 %v5357_v32  ;;  %v887_v32 = vld [vmem:[#allocation10 + $0x570] sm:$0xff] }
 0x26f   :  { %v5410_v5 = vcombine.low %v883_v55, %v887_v32 }
 0x270   :  { %4184 = vmatpush1.bf16.msra.mxu0 %v5354_v60  ;;  %v5411_v60 = vcombine.high %v883_v55, %v887_v32  ;;  %v932_v55 = vld [vmem:[#allocation10 + $0x6d8] sm:$0xff] }
 0x271   :  { %4348 = vmatpush1.bf16.msra.mxu1 %v5356_v30  ;;  %4185 = vmatprep.subr.bf16.mxu0 %v5363_v63  ;;  %v5413_v30 = vcombine.high %v884_v56, %v888_v58  ;;  %v891_v63 = vld [vmem:[#allocation10 + $0x590] sm:$0xff]  ;;  %v936_v32 = vld [vmem:[#allocation10 + $0x6f8] sm:$0xff]  ;;  %v5452_v58 = vcombine.low %v924_v52, %v928_v49 }
 0x272   :  { %4349 = vmatprep.subr.bf16.mxu1 %v5365_v1  ;;  %v895_v1 = vld [vmem:[#allocation10 + $0x5b0] sm:$0xff] }
 0x274   :  { %4186 = vmatpush1.bf16.msra.mxu0 %v5362_v61  ;;  %v5419_v61 = vcombine.high %v891_v63, %v895_v1 }
 0x275   :  { %4350 = vmatpush1.bf16.msra.mxu1 %v5364_v15  ;;  %4196 = vmatprep.subr.bf16.mxu0 %v5371_v14  ;;  %v5421_v15 = vcombine.high %v892_v2, %v896_v3  ;;  %v899_v14 = vld [vmem:[#allocation10 + $0x5d0] sm:$0xff]  ;;  %v5460_v3 = vcombine.low %v932_v55, %v936_v32 }
 0x276   :  { %4360 = vmatprep.subr.bf16.mxu1 %v5373_v18  ;;  %v903_v18 = vld [vmem:[#allocation10 + $0x5f0] sm:$0xff] }
 0x277   :  { %4188 = vmatmul.mubr.bf16.vlgmr.msra.gmra.mrb[20].mxu0 %v6438_v4  ;;  %v5427_v26 = vcombine.high %v899_v14, %v903_v18 }
 0x278   :  { %4352 = vmatmul.mubr.bf16.vlgmr.msra.gmra.mrb[20].mxu1 %v6438_v4  ;;  %4197 = vmatpush1.bf16.msra.mxu0 %v5370_v31  ;;  %v5388_v4 = vcombine.low %v860_v36, %v864_v37  ;;  %v5418_v31 = vcombine.low %v891_v63, %v895_v1  ;;  %v5426_v36 = vcombine.low %v899_v14, %v903_v18  ;;  %v940_v63 = vld [vmem:[#allocation10 + $0x718] sm:$0xff] }
 0x279   :  { %4228 = vmatprep.mubr.bf16.mxu0 %v6461_v7  ;;  %4361 = vmatpush1.bf16.msra.mxu1 %v5372_v27  ;;  %v5429_v27 = vcombine.high %v900_v19, %v904_v23  ;;  %v5428_v37 = vcombine.low %v900_v19, %v904_v23  ;;  %v944_v1 = vld [vmem:[#allocation10 + $0x738] sm:$0xff] }
 0x27a   :  { %4392 = vmatprep.mubr.bf16.mxu1 %v6461_v7  ;;  %4198 = vmatprep.subr.bf16.mxu0 %v5379_v24  ;;  %v5394_v7 = vcombine.low %v867_v11, %v871_v8  ;;  %v907_v24 = vld [vmem:[#allocation10 + $0x610] sm:$0xff]  ;;  %v916_v11 = vld [vmem:[#allocation10 + $0x658] sm:$0xff]  ;;  %v5468_v23 = vcombine.low %v940_v63, %v944_v1 }
 0x27b   :  { %4362 = vmatprep.subr.bf16.mxu1 %v5381_v35  ;;  %v912_v35 = vld [vmem:[#allocation10 + $0x638] sm:$0xff]  ;;  %v5434_v10 = vcombine.low %v907_v24, %v911_v33 }
 0x27c   :  { %4199 = vmatpush1.bf16.msra.mxu0 %v5378_v38  ;;  %v5435_v38 = vcombine.high %v907_v24, %v911_v33  ;;  %v920_v8 = vld [vmem:[#allocation10 + $0x678] sm:$0xff]  ;;  %v5436_v12 = vcombine.low %v908_v34, %v912_v35 }
 0x27d   :  { %4363 = vmatpush1.bf16.msra.mxu1 %v5380_v40  ;;  %4200 = vmatprep.subr.bf16.mxu0 %v5387_v41  ;;  %v5437_v40 = vcombine.high %v908_v34, %v912_v35  ;;  %v915_v41 = vld [vmem:[#allocation10 + $0x650] sm:$0xff]  ;;  %v5444_v51 = vcombine.low %v916_v11, %v920_v8  ;;  %v948_v14 = vld [vmem:[#allocation10 + $0x758] sm:$0xff] }
 0x27e   :  { %4364 = vmatprep.subr.bf16.mxu1 %v5389_v6  ;;  %v919_v6 = vld [vmem:[#allocation10 + $0x670] sm:$0xff]  ;;  %v952_v18 = vld [vmem:[#allocation10 + $0x778] sm:$0xff] }
 0x27f   :  { %v5442_v50 = vcombine.low %v915_v41, %v919_v6  ;;  %v956_v24 = vld [vmem:[#allocation10 + $0x798] sm:$0xff]  ;;  %v5476_v35 = vcombine.low %v948_v14, %v952_v18 }
 0x280   :  { %4201 = vmatpush1.bf16.msra.mxu0 %v5386_v43  ;;  %v5443_v43 = vcombine.high %v915_v41, %v919_v6  ;;  %v960_v33 = vld [vmem:[#allocation10 + $0x7b8] sm:$0xff] }
 0x281   :  { %4365 = vmatpush1.bf16.msra.mxu1 %v5388_v4  ;;  %4202 = vmatprep.subr.bf16.mxu0 %v5395_v47  ;;  %v5445_v4 = vcombine.high %v916_v11, %v920_v8  ;;  %v923_v47 = vld [vmem:[#allocation10 + $0x690] sm:$0xff]  ;;  %v964_v41 = vld [vmem:[#allocation10 + $0x7d8] sm:$0xff]  ;;  %v5484_v8 = vcombine.low %v956_v24, %v960_v33 }
 0x282   :  { %4366 = vmatprep.subr.bf16.mxu1 %v5397_v48  ;;  %v927_v48 = vld [vmem:[#allocation10 + $0x6b0] sm:$0xff]  ;;  %v968_v6 = vld [vmem:[#allocation10 + $0x7f8] sm:$0xff] }
 0x283   :  { %v5450_v56 = vcombine.low %v923_v47, %v927_v48 }
 0x284   :  { %4203 = vmatpush1.bf16.msra.mxu0 %v5394_v7  ;;  %v5451_v7 = vcombine.high %v923_v47, %v927_v48  ;;  %v972_v47 = vld [vmem:[#allocation10 + $0x818] sm:$0xff] }
 0x285   :  { %4367 = vmatpush1.bf16.msra.mxu1 %v5396_v53  ;;  %4204 = vmatprep.subr.bf16.mxu0 %v5403_v54  ;;  %v5453_v53 = vcombine.high %v924_v52, %v928_v49  ;;  %v931_v54 = vld [vmem:[#allocation10 + $0x6d0] sm:$0xff]  ;;  %v976_v48 = vld [vmem:[#allocation10 + $0x838] sm:$0xff]  ;;  %v5492_v49 = vcombine.low %v964_v41, %v968_v6 }
 0x286   :  { %4368 = vmatprep.subr.bf16.mxu1 %v5405_v28  ;;  %v935_v28 = vld [vmem:[#allocation10 + $0x6f0] sm:$0xff] }
 0x287   :  { %v5458_v2 = vcombine.low %v931_v54, %v935_v28 }
 0x288   :  { %4205 = vmatpush1.bf16.msra.mxu0 %v5402_v22  ;;  %v5459_v22 = vcombine.high %v931_v54, %v935_v28  ;;  %v980_v28 = vld [vmem:[#allocation10 + $0x858] sm:$0xff] }
 0x289   :  { %4369 = vmatpush1.bf16.msra.mxu1 %v5404_v59  ;;  %4206 = vmatprep.subr.bf16.mxu0 %v5411_v60  ;;  %v5461_v59 = vcombine.high %v932_v55, %v936_v32  ;;  %v939_v60 = vld [vmem:[#allocation10 + $0x710] sm:$0xff]  ;;  %v984_v55 = vld [vmem:[#allocation10 + $0x878] sm:$0xff]  ;;  %v5500_v32 = vcombine.low %v972_v47, %v976_v48 }
 0x28a   :  { %4370 = vmatprep.subr.bf16.mxu1 %v5413_v30  ;;  %v943_v30 = vld [vmem:[#allocation10 + $0x730] sm:$0xff] }
 0x28b   :  { %v5466_v19 = vcombine.low %v939_v60, %v943_v30 }
 0x28c   :  { %4207 = vmatpush1.bf16.msra.mxu0 %v5410_v5  ;;  %v5467_v5 = vcombine.high %v939_v60, %v943_v30  ;;  %v988_v60 = vld [vmem:[#allocation10 + $0x898] sm:$0xff] }
 0x28d   :  { %4371 = vmatpush1.bf16.msra.mxu1 %v5412_v9  ;;  %4208 = vmatprep.subr.bf16.mxu0 %v5419_v61  ;;  %v5469_v9 = vcombine.high %v940_v63, %v944_v1  ;;  %v947_v61 = vld [vmem:[#allocation10 + $0x750] sm:$0xff]  ;;  %v992_v30 = vld [vmem:[#allocation10 + $0x8b8] sm:$0xff]  ;;  %v5508_v1 = vcombine.low %v980_v28, %v984_v55 }
 0x28e   :  { %4372 = vmatprep.subr.bf16.mxu1 %v5421_v15  ;;  %v951_v15 = vld [vmem:[#allocation10 + $0x770] sm:$0xff] }
 0x28f   :  { %v5474_v34 = vcombine.low %v947_v61, %v951_v15 }
 0x290   :  { %4209 = vmatpush1.bf16.msra.mxu0 %v5418_v31  ;;  %v5475_v31 = vcombine.high %v947_v61, %v951_v15  ;;  %v996_v61 = vld [vmem:[#allocation10 + $0x8d8] sm:$0xff] }
 0x291   :  { %4373 = vmatpush1.bf16.msra.mxu1 %v5420_v21  ;;  %4210 = vmatprep.subr.bf16.mxu0 %v5427_v26  ;;  %v5477_v21 = vcombine.high %v948_v14, %v952_v18  ;;  %v955_v26 = vld [vmem:[#allocation10 + $0x790] sm:$0xff]  ;;  %v1000_v15 = vld [vmem:[#allocation10 + $0x8f8] sm:$0xff] }
 0x292   :  { %4374 = vmatprep.subr.bf16.mxu1 %v5429_v27  ;;  %v959_v27 = vld [vmem:[#allocation10 + $0x7b0] sm:$0xff] }
 0x293   :  { %v5482_v11 = vcombine.low %v955_v26, %v959_v27 }
 0x294   :  { %4211 = vmatpush1.bf16.msra.mxu0 %v5426_v36  ;;  %v5483_v36 = vcombine.high %v955_v26, %v959_v27  ;;  %v1008_v26 = vld [vmem:[#allocation10 + $0x938] sm:$0xff]  ;;  %v5524_v27 = vcombine.low %v996_v61, %v1000_v15 }
 0x295   :  { %4375 = vmatpush1.bf16.msra.mxu1 %v5428_v37  ;;  %4212 = vmatprep.subr.bf16.mxu0 %v5435_v38  ;;  %v5485_v37 = vcombine.high %v956_v24, %v960_v33  ;;  %v963_v38 = vld [vmem:[#allocation10 + $0x7d0] sm:$0xff] }
 0x296   :  { %4376 = vmatprep.subr.bf16.mxu1 %v5437_v40  ;;  %v967_v40 = vld [vmem:[#allocation10 + $0x7f0] sm:$0xff] }
 0x297   :  { %v5490_v52 = vcombine.low %v963_v38, %v967_v40 }
 0x298   :  { %4213 = vmatpush1.bf16.msra.mxu0 %v5434_v10  ;;  %v5491_v10 = vcombine.high %v963_v38, %v967_v40 }
 0x299   :  { %4377 = vmatpush1.bf16.msra.mxu1 %v5436_v12  ;;  %4214 = vmatprep.subr.bf16.mxu0 %v5443_v43  ;;  %v5493_v12 = vcombine.high %v964_v41, %v968_v6  ;;  %v971_v43 = vld [vmem:[#allocation10 + $0x810] sm:$0xff] }
 0x29a   :  { %4378 = vmatprep.subr.bf16.mxu1 %v5445_v4  ;;  %v975_v4 = vld [vmem:[#allocation10 + $0x830] sm:$0xff] }
 0x29b   :  { %v5498_v54 = vcombine.low %v971_v43, %v975_v4 }
 0x29c   :  { %4215 = vmatpush1.bf16.msra.mxu0 %v5442_v50  ;;  %v5499_v50 = vcombine.high %v971_v43, %v975_v4 }
 0x29d   :  { %4379 = vmatpush1.bf16.msra.mxu1 %v5444_v51  ;;  %4216 = vmatprep.subr.bf16.mxu0 %v5451_v7  ;;  %v5501_v51 = vcombine.high %v972_v47, %v976_v48  ;;  %v979_v7 = vld [vmem:[#allocation10 + $0x850] sm:$0xff] }
 0x29e   :  { %4380 = vmatprep.subr.bf16.mxu1 %v5453_v53  ;;  %v983_v53 = vld [vmem:[#allocation10 + $0x870] sm:$0xff] }
 0x29f   :  { %v5506_v63 = vcombine.low %v979_v7, %v983_v53 }
 0x2a0   :  { %4217 = vmatpush1.bf16.msra.mxu0 %v5450_v56  ;;  %v5507_v56 = vcombine.high %v979_v7, %v983_v53 }
 0x2a1   :  { %4381 = vmatpush1.bf16.msra.mxu1 %v5452_v58  ;;  %4218 = vmatprep.subr.bf16.mxu0 %v5459_v22  ;;  %v987_v58 = vld [vmem:[#allocation10 + $0x890] sm:$0xff] }
 0x2a2   :  { %4382 = vmatprep.subr.bf16.mxu1 %v5461_v59  ;;  %v991_v22 = vld [vmem:[#allocation10 + $0x8b0] sm:$0xff]  ;;  %v5509_v59 = vcombine.high %v980_v28, %v984_v55 }
 0x2a3   :  { %v5514_v14 = vcombine.low %v987_v58, %v991_v22  ;;  %v1035_v55 = vld [vmem:[#allocation10 + $0xa10] sm:$0xff] }
 0x2a4   :  { %4219 = vmatpush1.bf16.msra.mxu0 %v5458_v2  ;;  %v5515_v2 = vcombine.high %v987_v58, %v991_v22  ;;  %v1040_v58 = vld [vmem:[#allocation10 + $0xa38] sm:$0xff] }
 0x2a5   :  { %4383 = vmatpush1.bf16.msra.mxu1 %v5460_v3  ;;  %4220 = vmatprep.subr.bf16.mxu0 %v5467_v5  ;;  %v5517_v3 = vcombine.high %v988_v60, %v992_v30  ;;  %v995_v5 = vld [vmem:[#allocation10 + $0x8d0] sm:$0xff] }
 0x2a6   :  { %4384 = vmatprep.subr.bf16.mxu1 %v5469_v9  ;;  %v999_v9 = vld [vmem:[#allocation10 + $0x8f0] sm:$0xff] }
 0x2a7   :  { %v5523_v18 = vcombine.high %v995_v5, %v999_v9 }
 0x2a8   :  { %4221 = vmatpush1.bf16.msra.mxu0 %v5466_v19  ;;  %v5525_v19 = vcombine.high %v996_v61, %v1000_v15 }
 0x2a9   :  { %4385 = vmatpush1.bf16.msra.mxu1 %v5468_v23  ;;  %4222 = vmatprep.subr.bf16.mxu0 %v5475_v31  ;;  %v1003_v23 = vld [vmem:[#allocation10 + $0x910] sm:$0xff] }
 0x2aa   :  { %4386 = vmatprep.subr.bf16.mxu1 %v5477_v21  ;;  %v1007_v31 = vld [vmem:[#allocation10 + $0x930] sm:$0xff]  ;;  %v1004_v21 = vld [vmem:[#allocation10 + $0x918] sm:$0xff] }
 0x2ab   :  { %v5531_v24 = vcombine.high %v1003_v23, %v1007_v31  ;;  %v5533_v33 = vcombine.high %v1004_v21, %v1008_v26  ;;  %v5530_v38 = vcombine.low %v1003_v23, %v1007_v31  ;;  %v5532_v40 = vcombine.low %v1004_v21, %v1008_v26 }
 0x2ac   :  { %4223 = vmatpush1.bf16.msra.mxu0 %v5474_v34  ;;  %v1011_v34 = vld [vmem:[#allocation10 + $0x950] sm:$0xff] }
 0x2ad   :  { %4387 = vmatpush1.bf16.msra.mxu1 %v5476_v35  ;;  %4224 = vmatprep.subr.bf16.mxu0 %v5483_v36  ;;  %v1015_v35 = vld [vmem:[#allocation10 + $0x970] sm:$0xff]  ;;  %v1012_v36 = vld [vmem:[#allocation10 + $0x958] sm:$0xff] }
 0x2ae   :  { %4388 = vmatprep.subr.bf16.mxu1 %v5485_v37  ;;  %v1016_v37 = vld [vmem:[#allocation10 + $0x978] sm:$0xff]  ;;  %v5539_v41 = vcombine.high %v1011_v34, %v1015_v35  ;;  %v5538_v43 = vcombine.low %v1011_v34, %v1015_v35 }
 0x2af   :  { %v5541_v6 = vcombine.high %v1012_v36, %v1016_v37  ;;  %v5540_v4 = vcombine.low %v1012_v36, %v1016_v37 }
 0x2b0   :  { %4225 = vmatpush1.bf16.msra.mxu0 %v5482_v11  ;;  %v1019_v11 = vld [vmem:[#allocation10 + $0x990] sm:$0xff] }
 0x2b1   :  { %4389 = vmatpush1.bf16.msra.mxu1 %v5484_v8  ;;  %4226 = vmatprep.subr.bf16.mxu0 %v5491_v10  ;;  %v1023_v8 = vld [vmem:[#allocation10 + $0x9b0] sm:$0xff]  ;;  %v1020_v10 = vld [vmem:[#allocation10 + $0x998] sm:$0xff] }
 0x2b2   :  { %4390 = vmatprep.subr.bf16.mxu1 %v5493_v12  ;;  %v1024_v12 = vld [vmem:[#allocation10 + $0x9b8] sm:$0xff]  ;;  %v5547_v47 = vcombine.high %v1019_v11, %v1023_v8  ;;  %v5546_v7 = vcombine.low %v1019_v11, %v1023_v8 }
 0x2b3   :  { %v5549_v48 = vcombine.high %v1020_v10, %v1024_v12  ;;  %v5548_v53 = vcombine.low %v1020_v10, %v1024_v12 }
 0x2b4   :  { %4227 = vmatpush1.bf16.msra.mxu0 %v5490_v52  ;;  %v1027_v52 = vld [vmem:[#allocation10 + $0x9d0] sm:$0xff] }
 0x2b5   :  { %4391 = vmatpush1.bf16.msra.mxu1 %v5492_v49  ;;  %4237 = vmatprep.subr.bf16.mxu0 %v5499_v50  ;;  %v1031_v49 = vld [vmem:[#allocation10 + $0x9f0] sm:$0xff]  ;;  %v1028_v50 = vld [vmem:[#allocation10 + $0x9d8] sm:$0xff] }
 0x2b6   :  { %4401 = vmatprep.subr.bf16.mxu1 %v5501_v51  ;;  %v1032_v51 = vld [vmem:[#allocation10 + $0x9f8] sm:$0xff]  ;;  %v5554_v22 = vcombine.low %v1027_v52, %v1031_v49 }
 0x2b7   :  { %4229 = vmatmul.mubr.bf16.vlgmr.msra.gmra.mrb[20].mxu0 %v6476_v13  ;;  %v5557_v28 = vcombine.high %v1028_v50, %v1032_v51 }
 0x2b8   :  { %4393 = vmatmul.mubr.bf16.vlgmr.msra.gmra.mrb[20].mxu1 %v6476_v13  ;;  %4238 = vmatpush1.bf16.msra.mxu0 %v5498_v54  ;;  %v5516_v13 = vcombine.low %v988_v60, %v992_v30  ;;  %v5555_v54 = vcombine.high %v1027_v52, %v1031_v49 }
 0x2b9   :  { %4269 = vmatprep.mubr.bf16.mxu0 %v6478_v17  ;;  %4402 = vmatpush1.bf16.msra.mxu1 %v5500_v32  ;;  %v1039_v32 = vld [vmem:[#allocation10 + $0xa30] sm:$0xff] }
 0x2ba   :  { %4433 = vmatprep.mubr.bf16.mxu1 %v6478_v17  ;;  %4239 = vmatprep.subr.bf16.mxu0 %v5507_v56  ;;  %v5522_v17 = vcombine.low %v995_v5, %v999_v9  ;;  %v1036_v56 = vld [vmem:[#allocation10 + $0xa18] sm:$0xff]  ;;  %v5563_v60 = vcombine.high %v1035_v55, %v1039_v32  ;;  %v5562_v5 = vcombine.low %v1035_v55, %v1039_v32 }
 0x2bb   :  { %4403 = vmatprep.subr.bf16.mxu1 %v5509_v59  ;;  %v5556_v59 = vcombine.low %v1028_v50, %v1032_v51  ;;  %v5565_v30 = vcombine.high %v1036_v56, %v1040_v58  ;;  %v5564_v9 = vcombine.low %v1036_v56, %v1040_v58 }
 0x2bc   :  { %4240 = vmatpush1.bf16.msra.mxu0 %v5506_v63  ;;  %v1043_v63 = vld [vmem:[#allocation10 + $0xa50] sm:$0xff] }
 0x2bd   :  { %4404 = vmatpush1.bf16.msra.mxu1 %v5508_v1  ;;  %4241 = vmatprep.subr.bf16.mxu0 %v5515_v2  ;;  %v1047_v1 = vld [vmem:[#allocation10 + $0xa70] sm:$0xff]  ;;  %v1044_v2 = vld [vmem:[#allocation10 + $0xa58] sm:$0xff] }
 0x2be   :  { %4405 = vmatprep.subr.bf16.mxu1 %v5517_v3  ;;  %v1048_v3 = vld [vmem:[#allocation10 + $0xa78] sm:$0xff]  ;;  %v5571_v61 = vcombine.high %v1043_v63, %v1047_v1  ;;  %v5570_v23 = vcombine.low %v1043_v63, %v1047_v1 }
 0x2bf   :  { %v5573_v15 = vcombine.high %v1044_v2, %v1048_v3  ;;  %v5572_v31 = vcombine.low %v1044_v2, %v1048_v3 }
 0x2c0   :  { %4242 = vmatpush1.bf16.msra.mxu0 %v5514_v14  ;;  %v1051_v14 = vld [vmem:[#allocation10 + $0xa90] sm:$0xff] }
 0x2c1   :  { %4406 = vmatpush1.bf16.msra.mxu1 %v5516_v13  ;;  %4243 = vmatprep.subr.bf16.mxu0 %v5523_v18  ;;  %v1055_v13 = vld [vmem:[#allocation10 + $0xab0] sm:$0xff]  ;;  %v1052_v18 = vld [vmem:[#allocation10 + $0xa98] sm:$0xff] }
 0x2c2   :  { %4407 = vmatprep.subr.bf16.mxu1 %v5525_v19  ;;  %v1056_v19 = vld [vmem:[#allocation10 + $0xab8] sm:$0xff]  ;;  %v5579_v21 = vcombine.high %v1051_v14, %v1055_v13  ;;  %v5578_v34 = vcombine.low %v1051_v14, %v1055_v13 }
 0x2c3   :  { %v5581_v26 = vcombine.high %v1052_v18, %v1056_v19  ;;  %v5580_v35 = vcombine.low %v1052_v18, %v1056_v19 }
 0x2c4   :  { %4244 = vmatpush1.bf16.msra.mxu0 %v5522_v17  ;;  %v1059_v17 = vld [vmem:[#allocation10 + $0xad0] sm:$0xff] }
 0x2c5   :  { %4408 = vmatpush1.bf16.msra.mxu1 %v5524_v27  ;;  %4245 = vmatprep.subr.bf16.mxu0 %v5531_v24  ;;  %v1063_v27 = vld [vmem:[#allocation10 + $0xaf0] sm:$0xff]  ;;  %v1060_v24 = vld [vmem:[#allocation10 + $0xad8] sm:$0xff] }
 0x2c6   :  { %4409 = vmatprep.subr.bf16.mxu1 %v5533_v33  ;;  %v1064_v33 = vld [vmem:[#allocation10 + $0xaf8] sm:$0xff]  ;;  %v5587_v36 = vcombine.high %v1059_v17, %v1063_v27  ;;  %v5586_v11 = vcombine.low %v1059_v17, %v1063_v27 }
 0x2c7   :  { %v5589_v37 = vcombine.high %v1060_v24, %v1064_v33  ;;  %v5588_v8 = vcombine.low %v1060_v24, %v1064_v33  ;;  %v1112_v17 = vld [vmem:[#allocation10 + $0xc78] sm:$0xff]  ;;  %v1115_v33 = vld [vmem:[#allocation10 + $0xc90] sm:$0xff] }
 0x2c8   :  { %4246 = vmatpush1.bf16.msra.mxu0 %v5530_v38  ;;  %v1067_v38 = vld [vmem:[#allocation10 + $0xb10] sm:$0xff] }
 0x2c9   :  { %4410 = vmatpush1.bf16.msra.mxu1 %v5532_v40  ;;  %4247 = vmatprep.subr.bf16.mxu0 %v5539_v41  ;;  %v1071_v40 = vld [vmem:[#allocation10 + $0xb30] sm:$0xff]  ;;  %v1068_v41 = vld [vmem:[#allocation10 + $0xb18] sm:$0xff] }
 0x2ca   :  { %4411 = vmatprep.subr.bf16.mxu1 %v5541_v6  ;;  %v1072_v6 = vld [vmem:[#allocation10 + $0xb38] sm:$0xff]  ;;  %v5595_v10 = vcombine.high %v1067_v38, %v1071_v40  ;;  %v5594_v52 = vcombine.low %v1067_v38, %v1071_v40 }
 0x2cb   :  { %v5597_v12 = vcombine.high %v1068_v41, %v1072_v6  ;;  %v5596_v49 = vcombine.low %v1068_v41, %v1072_v6 }
 0x2cc   :  { %4248 = vmatpush1.bf16.msra.mxu0 %v5538_v43  ;;  %v1075_v43 = vld [vmem:[#allocation10 + $0xb50] sm:$0xff] }
 0x2cd   :  { %4412 = vmatpush1.bf16.msra.mxu1 %v5540_v4  ;;  %4249 = vmatprep.subr.bf16.mxu0 %v5547_v47  ;;  %v1079_v4 = vld [vmem:[#allocation10 + $0xb70] sm:$0xff]  ;;  %v1076_v47 = vld [vmem:[#allocation10 + $0xb58] sm:$0xff] }
 0x2ce   :  { %4413 = vmatprep.subr.bf16.mxu1 %v5549_v48  ;;  %v1080_v48 = vld [vmem:[#allocation10 + $0xb78] sm:$0xff]  ;;  %v5603_v50 = vcombine.high %v1075_v43, %v1079_v4  ;;  %v5602_v55 = vcombine.low %v1075_v43, %v1079_v4 }
 0x2cf   :  { %v5605_v51 = vcombine.high %v1076_v47, %v1080_v48  ;;  %v5604_v32 = vcombine.low %v1076_v47, %v1080_v48  ;;  %v1131_v48 = vld [vmem:[#allocation10 + $0xd10] sm:$0xff] }
 0x2d0   :  { %4250 = vmatpush1.bf16.msra.mxu0 %v5546_v7  ;;  %v1083_v7 = vld [vmem:[#allocation10 + $0xb90] sm:$0xff] }
 0x2d1   :  { %4414 = vmatpush1.bf16.msra.mxu1 %v5548_v53  ;;  %4251 = vmatprep.subr.bf16.mxu0 %v5555_v54  ;;  %v1087_v53 = vld [vmem:[#allocation10 + $0xbb0] sm:$0xff]  ;;  %v1084_v54 = vld [vmem:[#allocation10 + $0xb98] sm:$0xff] }
 0x2d2   :  { %4415 = vmatprep.subr.bf16.mxu1 %v5557_v28  ;;  %v1088_v28 = vld [vmem:[#allocation10 + $0xbb8] sm:$0xff]  ;;  %v5611_v56 = vcombine.high %v1083_v7, %v1087_v53  ;;  %v5610_v63 = vcombine.low %v1083_v7, %v1087_v53 }
 0x2d3   :  { %v5613_v58 = vcombine.high %v1084_v54, %v1088_v28  ;;  %v5612_v1 = vcombine.low %v1084_v54, %v1088_v28  ;;  %v1139_v54 = vld [vmem:[#allocation10 + $0xd50] sm:$0xff] }
 0x2d4   :  { %4252 = vmatpush1.bf16.msra.mxu0 %v5554_v22  ;;  %v1091_v22 = vld [vmem:[#allocation10 + $0xbd0] sm:$0xff] }
 0x2d5   :  { %4416 = vmatpush1.bf16.msra.mxu1 %v5556_v59  ;;  %4253 = vmatprep.subr.bf16.mxu0 %v5563_v60  ;;  %v1095_v59 = vld [vmem:[#allocation10 + $0xbf0] sm:$0xff]  ;;  %v1092_v60 = vld [vmem:[#allocation10 + $0xbd8] sm:$0xff] }
 0x2d6   :  { %4417 = vmatprep.subr.bf16.mxu1 %v5565_v30  ;;  %v1096_v30 = vld [vmem:[#allocation10 + $0xbf8] sm:$0xff]  ;;  %v5619_v2 = vcombine.high %v1091_v22, %v1095_v59  ;;  %v5618_v14 = vcombine.low %v1091_v22, %v1095_v59  ;;  %v1143_v28 = vld [vmem:[#allocation10 + $0xd70] sm:$0xff] }
 0x2d7   :  { %v5621_v3 = vcombine.high %v1092_v60, %v1096_v30  ;;  %v5620_v13 = vcombine.low %v1092_v60, %v1096_v30  ;;  %v5667_v22 = vcombine.high %v1139_v54, %v1143_v28  ;;  %v1147_v60 = vld [vmem:[#allocation10 + $0xd90] sm:$0xff] }
 0x2d8   :  { %4254 = vmatpush1.bf16.msra.mxu0 %v5562_v5  ;;  %v1099_v5 = vld [vmem:[#allocation10 + $0xc10] sm:$0xff] }
 0x2d9   :  { %4418 = vmatpush1.bf16.msra.mxu1 %v5564_v9  ;;  %4255 = vmatprep.subr.bf16.mxu0 %v5571_v61  ;;  %v1103_v9 = vld [vmem:[#allocation10 + $0xc30] sm:$0xff]  ;;  %v1100_v61 = vld [vmem:[#allocation10 + $0xc18] sm:$0xff] }
 0x2da   :  { %4419 = vmatprep.subr.bf16.mxu1 %v5573_v15  ;;  %v1104_v15 = vld [vmem:[#allocation10 + $0xc38] sm:$0xff]  ;;  %v5627_v18 = vcombine.high %v1099_v5, %v1103_v9  ;;  %v1151_v30 = vld [vmem:[#allocation10 + $0xdb0] sm:$0xff] }
 0x2db   :  { %v5629_v19 = vcombine.high %v1100_v61, %v1104_v15  ;;  %v5628_v27 = vcombine.low %v1100_v61, %v1104_v15  ;;  %v1155_v15 = vld [vmem:[#allocation10 + $0xdd0] sm:$0xff] }
 0x2dc   :  { %4256 = vmatpush1.bf16.msra.mxu0 %v5570_v23  ;;  %v1107_v23 = vld [vmem:[#allocation10 + $0xc50] sm:$0xff] }
 0x2dd   :  { %4420 = vmatpush1.bf16.msra.mxu1 %v5572_v31  ;;  %4257 = vmatprep.subr.bf16.mxu0 %v5579_v21  ;;  %v1111_v31 = vld [vmem:[#allocation10 + $0xc70] sm:$0xff]  ;;  %v5626_v21 = vcombine.low %v1099_v5, %v1103_v9  ;;  %v5675_v5 = vcombine.high %v1147_v60, %v1151_v30 }
 0x2de   :  { %4421 = vmatprep.subr.bf16.mxu1 %v5581_v26  ;;  %v1108_v26 = vld [vmem:[#allocation10 + $0xc58] sm:$0xff]  ;;  %v5635_v24 = vcombine.high %v1107_v23, %v1111_v31  ;;  %v5634_v38 = vcombine.low %v1107_v23, %v1111_v31 }
 0x2df   :  { %v5636_v40 = vcombine.low %v1108_v26, %v1112_v17  ;;  %v1160_v23 = vld [vmem:[#allocation10 + $0xdf8] sm:$0xff] }
 0x2e0   :  { %4258 = vmatpush1.bf16.msra.mxu0 %v5578_v34  ;;  %v1119_v34 = vld [vmem:[#allocation10 + $0xcb0] sm:$0xff] }
 0x2e1   :  { %4422 = vmatpush1.bf16.msra.mxu1 %v5580_v35  ;;  %4259 = vmatprep.subr.bf16.mxu0 %v5587_v36  ;;  %v5637_v35 = vcombine.high %v1108_v26, %v1112_v17  ;;  %v1116_v36 = vld [vmem:[#allocation10 + $0xc98] sm:$0xff]  ;;  %v5643_v41 = vcombine.high %v1115_v33, %v1119_v34  ;;  %v5642_v43 = vcombine.low %v1115_v33, %v1119_v34 }
 0x2e2   :  { %4423 = vmatprep.subr.bf16.mxu1 %v5589_v37  ;;  %v1120_v37 = vld [vmem:[#allocation10 + $0xcb8] sm:$0xff]  ;;  %v5674_v26 = vcombine.low %v1147_v60, %v1151_v30 }
 0x2e3   :  { %v5645_v6 = vcombine.high %v1116_v36, %v1120_v37 }
 0x2e4   :  { %4260 = vmatpush1.bf16.msra.mxu0 %v5586_v11  ;;  %v1123_v11 = vld [vmem:[#allocation10 + $0xcd0] sm:$0xff] }
 0x2e5   :  { %4424 = vmatpush1.bf16.msra.mxu1 %v5588_v8  ;;  %4261 = vmatprep.subr.bf16.mxu0 %v5595_v10  ;;  %v1127_v8 = vld [vmem:[#allocation10 + $0xcf0] sm:$0xff]  ;;  %v1124_v10 = vld [vmem:[#allocation10 + $0xcd8] sm:$0xff] }
 0x2e6   :  { %4425 = vmatprep.subr.bf16.mxu1 %v5597_v12  ;;  %v1128_v12 = vld [vmem:[#allocation10 + $0xcf8] sm:$0xff]  ;;  %v5651_v4 = vcombine.high %v1123_v11, %v1127_v8 }
 0x2e7   :  { %v5653_v47 = vcombine.high %v1124_v10, %v1128_v12 }
 0x2e8   :  { %4262 = vmatpush1.bf16.msra.mxu0 %v5594_v52  ;;  %v1135_v52 = vld [vmem:[#allocation10 + $0xd30] sm:$0xff] }
 0x2e9   :  { %4426 = vmatpush1.bf16.msra.mxu1 %v5596_v49  ;;  %4263 = vmatprep.subr.bf16.mxu0 %v5603_v50  ;;  %v1132_v49 = vld [vmem:[#allocation10 + $0xd18] sm:$0xff]  ;;  %v5659_v7 = vcombine.high %v1131_v48, %v1135_v52 }
 0x2ea   :  { %4427 = vmatprep.subr.bf16.mxu1 %v5605_v51  ;;  %v1136_v50 = vld [vmem:[#allocation10 + $0xd38] sm:$0xff]  ;;  %v5652_v51 = vcombine.low %v1124_v10, %v1128_v12  ;;  %v1171_v10 = vld [vmem:[#allocation10 + $0xe50] sm:$0xff] }
 0x2eb   :  { %v5661_v53 = vcombine.high %v1132_v49, %v1136_v50  ;;  %v1175_v12 = vld [vmem:[#allocation10 + $0xe70] sm:$0xff] }
 0x2ec   :  { %4264 = vmatpush1.bf16.msra.mxu0 %v5602_v55  ;;  %v1140_v55 = vld [vmem:[#allocation10 + $0xd58] sm:$0xff] }
 0x2ed   :  { %4428 = vmatpush1.bf16.msra.mxu1 %v5604_v32  ;;  %4265 = vmatprep.subr.bf16.mxu0 %v5611_v56  ;;  %v1144_v32 = vld [vmem:[#allocation10 + $0xd78] sm:$0xff]  ;;  %v5658_v56 = vcombine.low %v1131_v48, %v1135_v52  ;;  %v5699_v48 = vcombine.high %v1171_v10, %v1175_v12 }
 0x2ee   :  { %4429 = vmatprep.subr.bf16.mxu1 %v5613_v58  ;;  %v5660_v58 = vcombine.low %v1132_v49, %v1136_v50  ;;  %v5669_v59 = vcombine.high %v1140_v55, %v1144_v32  ;;  %v1179_v49 = vld [vmem:[#allocation10 + $0xe90] sm:$0xff] }
 0x2ef   :  { %v1183_v50 = vld [vmem:[#allocation10 + $0xeb0] sm:$0xff] }
 0x2f0   :  { %4266 = vmatpush1.bf16.msra.mxu0 %v5610_v63  ;;  %v1148_v63 = vld [vmem:[#allocation10 + $0xd98] sm:$0xff] }
 0x2f1   :  { %4430 = vmatpush1.bf16.msra.mxu1 %v5612_v1  ;;  %4267 = vmatprep.subr.bf16.mxu0 %v5619_v2  ;;  %v1152_v1 = vld [vmem:[#allocation10 + $0xdb8] sm:$0xff]  ;;  %v5666_v2 = vcombine.low %v1139_v54, %v1143_v28  ;;  %v5707_v54 = vcombine.high %v1179_v49, %v1183_v50 }
 0x2f2   :  { %4431 = vmatprep.subr.bf16.mxu1 %v5621_v3  ;;  %v5668_v3 = vcombine.low %v1140_v55, %v1144_v32  ;;  %v5677_v61 = vcombine.high %v1148_v63, %v1152_v1  ;;  %v1187_v55 = vld [vmem:[#allocation10 + $0xed0] sm:$0xff] }
 0x2f3   :  { %v1191_v32 = vld [vmem:[#allocation10 + $0xef0] sm:$0xff] }
 0x2f4   :  { %4268 = vmatpush1.bf16.msra.mxu0 %v5618_v14  ;;  %v1159_v14 = vld [vmem:[#allocation10 + $0xdf0] sm:$0xff]  ;;  %v5715_v60 = vcombine.high %v1187_v55, %v1191_v32 }
 0x2f5   :  { %4432 = vmatpush1.bf16.msra.mxu1 %v5620_v13  ;;  %4278 = vmatprep.subr.bf16.mxu0 %v5627_v18  ;;  %v5683_v33 = vcombine.high %v1155_v15, %v1159_v14 }
 0x2f6   :  { %4442 = vmatprep.subr.bf16.mxu1 %v5629_v19  ;;  %v1156_v19 = vld [vmem:[#allocation10 + $0xdd8] sm:$0xff] }
 0x2f7   :  { %4270 = vmatmul.mubr.bf16.vlgmr.msra.gmra.mrb[20].mxu0 %v6486_v57 }
 0x2f8   :  { %4434 = vmatmul.mubr.bf16.vlgmr.msra.gmra.mrb[20].mxu1 %v6486_v57  ;;  %4279 = vmatpush1.bf16.msra.mxu0 %v5626_v21  ;;  %v5644_v57 = vcombine.low %v1116_v36, %v1120_v37  ;;  %v1163_v36 = vld [vmem:[#allocation10 + $0xe10] sm:$0xff] }
 0x2f9   :  { %4310 = vmatprep.mubr.bf16.mxu0 %v6488_v62  ;;  %4443 = vmatpush1.bf16.msra.mxu1 %v5628_v27  ;;  %v1167_v37 = vld [vmem:[#allocation10 + $0xe30] sm:$0xff] }
 0x2fa   :  { %4474 = vmatprep.mubr.bf16.mxu1 %v6488_v62  ;;  %4280 = vmatprep.subr.bf16.mxu0 %v5635_v24  ;;  %v5650_v62 = vcombine.low %v1123_v11, %v1127_v8  ;;  %v5676_v24 = vcombine.low %v1148_v63, %v1152_v1  ;;  %v5691_v11 = vcombine.high %v1163_v36, %v1167_v37  ;;  %v1195_v63 = vld [vmem:[#allocation10 + $0xf10] sm:$0xff] }
 0x2fb   :  { %4444 = vmatprep.subr.bf16.mxu1 %v5637_v35  ;;  %v5685_v35 = vcombine.high %v1156_v19, %v1160_v23  ;;  %v1199_v1 = vld [vmem:[#allocation10 + $0xf30] sm:$0xff] }
 0x2fc   :  { %4281 = vmatpush1.bf16.msra.mxu0 %v5634_v38  ;;  %v1164_v38 = vld [vmem:[#allocation10 + $0xe18] sm:$0xff] }
 0x2fd   :  { %4445 = vmatpush1.bf16.msra.mxu1 %v5636_v40  ;;  %4282 = vmatprep.subr.bf16.mxu0 %v5643_v41  ;;  %v1168_v40 = vld [vmem:[#allocation10 + $0xe38] sm:$0xff]  ;;  %v5682_v41 = vcombine.low %v1155_v15, %v1159_v14  ;;  %v5723_v15 = vcombine.high %v1195_v63, %v1199_v1 }
 0x2fe   :  { %4446 = vmatprep.subr.bf16.mxu1 %v5645_v6  ;;  %v5684_v6 = vcombine.low %v1156_v19, %v1160_v23  ;;  %v5693_v8 = vcombine.high %v1164_v38, %v1168_v40  ;;  %v1203_v19 = vld [vmem:[#allocation10 + $0xf50] sm:$0xff] }
 0x2ff   :  { %v1207_v23 = vld [vmem:[#allocation10 + $0xf70] sm:$0xff] }
 0x300   :  { %4283 = vmatpush1.bf16.msra.mxu0 %v5642_v43  ;;  %v1172_v43 = vld [vmem:[#allocation10 + $0xe58] sm:$0xff] }
 0x301   :  { %4447 = vmatpush1.bf16.msra.mxu1 %v5644_v57  ;;  %4284 = vmatprep.subr.bf16.mxu0 %v5651_v4  ;;  %v1176_v57 = vld [vmem:[#allocation10 + $0xe78] sm:$0xff]  ;;  %v5690_v4 = vcombine.low %v1163_v36, %v1167_v37 }
 0x302   :  { %4448 = vmatprep.subr.bf16.mxu1 %v5653_v47  ;;  %v5692_v47 = vcombine.low %v1164_v38, %v1168_v40  ;;  %v5701_v52 = vcombine.high %v1172_v43, %v1176_v57  ;;  %v1212_v36 = vld [vmem:[#allocation10 + $0xf98] sm:$0xff]  ;;  %v6521_v38 = vld [vmem:[#allocation11] sm:$0xff]  ;;  %v5730_v40 = vcombine.low %v1203_v19, %v1207_v23 }
 0x303   :  { %v1216_v37 = vld [vmem:[#allocation10 + $0xfb8] sm:$0xff] }
 0x304   :  { %4285 = vmatpush1.bf16.msra.mxu0 %v5650_v62  ;;  %v1180_v62 = vld [vmem:[#allocation10 + $0xe98] sm:$0xff] }
 0x305   :  { %4449 = vmatpush1.bf16.msra.mxu1 %v5652_v51  ;;  %4286 = vmatprep.subr.bf16.mxu0 %v5659_v7  ;;  %v1184_v51 = vld [vmem:[#allocation10 + $0xeb8] sm:$0xff]  ;;  %v5698_v7 = vcombine.low %v1171_v10, %v1175_v12  ;;  %v1223_v10 = vld [vmem:[#allocation10 + $0xff0] sm:$0xff]  ;;  %v1234_v12 = vrot.slane %v6521_v38, %v655_v29 }
 0x306   :  { %4450 = vmatprep.subr.bf16.mxu1 %v5661_v53  ;;  %v5700_v53 = vcombine.low %v1172_v43, %v1176_v57  ;;  %v5709_v28 = vcombine.high %v1180_v62, %v1184_v51  ;;  %v1220_v43 = vld [vmem:[#allocation10 + $0xfd8] sm:$0xff] }
 0x307   :  { %v1224_v57 = vld [vmem:[#allocation10 + $0xff8] sm:$0xff] }
 0x308   :  { %4287 = vmatpush1.bf16.msra.mxu0 %v5658_v56  ;;  %v1188_v56 = vld [vmem:[#allocation10 + $0xed8] sm:$0xff] }
 0x309   :  { %4451 = vmatpush1.bf16.msra.mxu1 %v5660_v58  ;;  %4288 = vmatprep.subr.bf16.mxu0 %v5667_v22  ;;  %v1192_v58 = vld [vmem:[#allocation10 + $0xef8] sm:$0xff]  ;;  %v5706_v22 = vcombine.low %v1179_v49, %v1183_v50  ;;  %v5749_v49 = vcombine.high %v1220_v43, %v1224_v57 }
 0x30a   :  { %v6513_v9 = vpop.f32.mrb[16].mxu0  ;;  %4452 = vmatprep.subr.bf16.mxu1 %v5669_v59  ;;  %v5708_v59 = vcombine.low %v1180_v62, %v1184_v51  ;;  %v5717_v30 = vcombine.high %v1188_v56, %v1192_v58  ;;  %v5748_v51 = vcombine.low %v1220_v43, %v1224_v57  ;;  %v6006_v43 = vld [vmem:[%s6763_s6 + $0x148] sm:$0xff]  }
 0x30b   :  { %v6515_v13 = vpop.f32.mrb[16].mxu1  ;;  %v6517_v18 = vpop.f32.mrb[17].mxu0 }
 0x30c   :  { %v6519_v31 = vpop.f32.mrb[17].mxu1  ;;  %v3988_v21 = vpop.f32.mrb[18].mxu0  ;;  %4289 = vmatpush1.bf16.msra.mxu0 %v5666_v2  ;;  %v1196_v2 = vld [vmem:[#allocation10 + $0xf18] sm:$0xff]  ;;  %v5904_v50 = vadd.f32 %v6517_v18, %v1234_v12  ;;  %v5972_v18 = vld [vmem:[%s6763_s6] sm:$0xff]  }
 0x30d   :  { %v4152_v17 = vpop.f32.mrb[18].mxu1  ;;  %4453 = vmatpush1.bf16.msra.mxu1 %v5668_v3  ;;  %v3989_v27 = vpop.f32.mrb[19].mxu0  ;;  %4290 = vmatprep.subr.bf16.mxu0 %v5675_v5  ;;  %v1200_v3 = vld [vmem:[#allocation10 + $0xf38] sm:$0xff]  ;;  %v5714_v5 = vcombine.low %v1187_v55, %v1191_v32  ;;  %v5975_v32 = vld [vmem:[%s6763_s6 + $0xc8] sm:$0xff]   ;;  %v6005_v12 = vld [vmem:[%s6763_s6 + $0x180] sm:$0xff]  }
 0x30e   :  { %v4153_v34 = vpop.f32.mrb[19].mxu1  ;;  %4454 = vmatprep.subr.bf16.mxu1 %v5677_v61  ;;  %v5716_v61 = vcombine.low %v1188_v56, %v1192_v58  ;;  %v5725_v14 = vcombine.high %v1196_v2, %v1200_v3  ;;  %v1204_v21 = vld [vmem:[#allocation10 + $0xf58] sm:$0xff]  ;;  %v5722_v17 = vcombine.low %v1195_v63, %v1199_v1  ;;  %v5724_v27 = vcombine.low %v1196_v2, %v1200_v3  ;;  %v5976_v58 = vld [vmem:[%s6763_s6 + $0x8] sm:$0xff]   ;;  %v5982_v63 = vld [vmem:[%s6763_s6 + $0x58] sm:$0xff]  }
 0x30f   :  { %v1211_v34 = vld [vmem:[#allocation10 + $0xf90] sm:$0xff]  ;;  %v5983_v1 = vld [vmem:[%s6763_s6 + $0xd8] sm:$0xff]  }
 0x310   :  { %4291 = vmatpush1.bf16.msra.mxu0 %v5674_v26  ;;  %v1208_v26 = vld [vmem:[#allocation10 + $0xf78] sm:$0xff]  ;;  %v5984_v2 = vld [vmem:[%s6763_s6 + $0x18] sm:$0xff]  }
 0x311   :  { %4455 = vmatpush1.bf16.msra.mxu1 %v5676_v24  ;;  %4292 = vmatprep.subr.bf16.mxu0 %v5683_v33  ;;  %v5731_v24 = vcombine.high %v1203_v19, %v1207_v23  ;;  %v5733_v33 = vcombine.high %v1204_v21, %v1208_v26  ;;  %v5985_v3 = vld [vmem:[%s6763_s6 + $0x98] sm:$0xff]   ;;  %v5990_v19 = vld [vmem:[%s6763_s6 + $0x68] sm:$0xff]  }
 0x312   :  { %4456 = vmatprep.subr.bf16.mxu1 %v5685_v35  ;;  %v1215_v35 = vld [vmem:[#allocation10 + $0xfb0] sm:$0xff] }
 0x313   :  { %v5991_v23 = vld [vmem:[%s6763_s6 + $0xe8] sm:$0xff]  }
 0x314   :  { %4293 = vmatpush1.bf16.msra.mxu0 %v5682_v41  ;;  %v5732_v41 = vcombine.low %v1204_v21, %v1208_v26  ;;  %v5992_v21 = vld [vmem:[%s6763_s6 + $0x28] sm:$0xff]   ;;  %v1230_v26 = vrot.slane %v6521_v38, %v651_v0  ;;  %v5996_v0 = vld [vmem:[%s6763_s6 + $0x30] sm:$0xff]  }
 0x315   :  { %4457 = vmatpush1.bf16.msra.mxu1 %v5684_v6  ;;  %4294 = vmatprep.subr.bf16.mxu0 %v5691_v11  ;;  %v5739_v6 = vcombine.high %v1211_v34, %v1215_v35  ;;  %v5741_v11 = vcombine.high %v1212_v36, %v1216_v37 }
 0x316   :  { %4458 = vmatprep.subr.bf16.mxu1 %v5693_v8  ;;  %v1219_v8 = vld [vmem:[#allocation10 + $0xfd0] sm:$0xff] }
 0x317   :  { %v5746_v29 = vcombine.low %v1219_v8, %v1223_v10 }
 0x318   :  { %4295 = vmatpush1.bf16.msra.mxu0 %v5690_v4  ;;  %v1242_v4 = vrot.slane %v6521_v38, %v663_v42  ;;  %v5970_v42 = vld [vmem:[%s6763_s6 + $0x40] sm:$0xff]  }
 0x319   :  { %4459 = vmatpush1.bf16.msra.mxu1 %v5692_v47  ;;  %4296 = vmatprep.subr.bf16.mxu0 %v5699_v48  ;;  %v5738_v47 = vcombine.low %v1211_v34, %v1215_v35  ;;  %v5740_v48 = vcombine.low %v1212_v36, %v1216_v37  ;;  %v5903_v34 = vadd.f32 %v6513_v9, %v1230_v26  ;;  %v5997_v35 = vld [vmem:[%s6763_s6 + $0xb0] sm:$0xff]   ;;  %v5999_v37 = vld [vmem:[%s6763_s6 + $0xf8] sm:$0xff]  }
 0x31a   :  { %4460 = vmatprep.subr.bf16.mxu1 %v5701_v52  ;;  %v5747_v52 = vcombine.high %v1219_v8, %v1223_v10  ;;  %v5906_v62 = vadd.f32 %v6519_v31, %v1242_v4  ;;  %v5973_v31 = vld [vmem:[%s6763_s6 + $0x80] sm:$0xff]   ;;  %v6000_v9 = vld [vmem:[%s6763_s6 + $0x38] sm:$0xff]   ;;  %v6007_v4 = vld [vmem:[%s6763_s6 + $0x1c8] sm:$0xff]  }
 0x31b   :  { %v6004_v8 = vld [vmem:[%s6763_s6 + $0x100] sm:$0xff]  }
 0x31c   :  { %4297 = vmatpush1.bf16.msra.mxu0 %v5698_v7  ;;  %v5971_v7 = vld [vmem:[%s6763_s6 + $0xc0] sm:$0xff]  }
 0x31d   :  { %4461 = vmatpush1.bf16.msra.mxu1 %v5700_v53  ;;  %4298 = vmatprep.subr.bf16.mxu0 %v5707_v54  ;;  %v4484_v53 = vmax.f32 %v5904_v50, 0.0  ;;  %v4486_v54 = vmax.f32 %v5906_v62, 0.0  ;;  %v6012_v50 = vld [vmem:[%s6763_s6 + $0x110] sm:$0xff]  }
 0x31e   :  { %4462 = vmatprep.subr.bf16.mxu1 %v5709_v28  ;;  %v5974_v28 = vld [vmem:[%s6763_s6 + $0x48] sm:$0xff]   ;;  %v6013_v62 = vld [vmem:[%s6763_s6 + $0x190] sm:$0xff]  }
 0x31f   :  { %v4492_v55 = vpack.c.bf16 %v4484_v53, %v4484_v53  ;;  %v4494_v56 = vpack.c.bf16 %v4486_v54, %v4486_v54  ;;  %v6018_v53 = vld [vmem:[%s6763_s6 + $0x160] sm:$0xff]  }
 0x320   :  { %4299 = vmatpush1.bf16.msra.mxu0 %v5706_v22  ;;  %v5977_v22 = vld [vmem:[%s6763_s6 + $0x88] sm:$0xff]   ;;  %v6019_v54 = vld [vmem:[%s6763_s6 + $0x1e0] sm:$0xff]  }
 0x321   :  { %4463 = vmatpush1.bf16.msra.mxu1 %v5708_v59  ;;  %4300 = vmatprep.subr.bf16.mxu0 %v5715_v60  ;;  %v5978_v59 = vld [vmem:[%s6763_s6 + $0x50] sm:$0xff]  }
 0x322   :  { %4464 = vmatprep.subr.bf16.mxu1 %v5717_v30  ;;  %v5980_v60 = vld [vmem:[%s6763_s6 + $0x10] sm:$0xff]  }
 0x323   :  { %v5981_v30 = vld [vmem:[%s6763_s6 + $0x90] sm:$0xff]  }
 0x324   :  { %4301 = vmatpush1.bf16.msra.mxu0 %v5714_v5  ;;  %v5986_v5 = vld [vmem:[%s6763_s6 + $0x60] sm:$0xff]  }
 0x325   :  { %4465 = vmatpush1.bf16.msra.mxu1 %v5716_v61  ;;  %4302 = vmatprep.subr.bf16.mxu0 %v5723_v15  ;;  %v5987_v61 = vld [vmem:[%s6763_s6 + $0xe0] sm:$0xff]  }
 0x326   :  { %4466 = vmatprep.subr.bf16.mxu1 %v5725_v14  ;;  %v5988_v15 = vld [vmem:[%s6763_s6 + $0x20] sm:$0xff]  }
 0x327   :  { %v5989_v14 = vld [vmem:[%s6763_s6 + $0xa0] sm:$0xff]  }
 0x328   :  { %4303 = vmatpush1.bf16.msra.mxu0 %v5722_v17  ;;  %v5993_v17 = vld [vmem:[%s6763_s6 + $0xa8] sm:$0xff]  }
 0x329   :  { %4467 = vmatpush1.bf16.msra.mxu1 %v5724_v27  ;;  %4304 = vmatprep.subr.bf16.mxu0 %v5731_v24  ;;  %v5994_v27 = vld [vmem:[%s6763_s6 + $0x70] sm:$0xff]   ;;  %v1238_v24 = vrot.slane %v6521_v38, %v659_v39  ;;  %v5998_v39 = vld [vmem:[%s6763_s6 + $0x78] sm:$0xff]  }
 0x32a   :  { %4468 = vmatprep.subr.bf16.mxu1 %v5733_v33  ;;  %v5995_v33 = vld [vmem:[%s6763_s6 + $0xf0] sm:$0xff]  }
 0x32b   :  { %v5905_v36 = vadd.f32 %v6515_v13, %v1238_v24  ;;  %v6002_v13 = vld [vmem:[%s6763_s6 + $0x140] sm:$0xff]  }
 0x32c   :  { %4305 = vmatpush1.bf16.msra.mxu0 %v5730_v40  ;;  %v4483_v40 = vmax.f32 %v5903_v34, 0.0 }
 0x32d   :  { %4469 = vmatpush1.bf16.msra.mxu1 %v5732_v41  ;;  %4306 = vmatprep.subr.bf16.mxu0 %v5739_v6  ;;  %v6001_v41 = vld [vmem:[%s6763_s6 + $0xb8] sm:$0xff]   ;;  %v4485_v6 = vmax.f32 %v5905_v36, 0.0 }
 0x32e   :  { %4470 = vmatprep.subr.bf16.mxu1 %v5741_v11  ;;  %v6003_v11 = vld [vmem:[%s6763_s6 + $0x1c0] sm:$0xff]   ;;  %v4491_v10 = vpack.c.bf16 %v4483_v40, %v4483_v40 }
 0x32f   :  { %v4493_v57 = vpack.c.bf16 %v4485_v6, %v4485_v6 }
 0x330   :  { %4307 = vmatpush1.bf16.msra.mxu0 %v5738_v47  ;;  %v6008_v47 = vld [vmem:[%s6763_s6 + $0x108] sm:$0xff]  }
 0x331   :  { %4471 = vmatpush1.bf16.msra.mxu1 %v5740_v48  ;;  %4308 = vmatprep.subr.bf16.mxu0 %v5747_v52  ;;  %v6009_v48 = vld [vmem:[%s6763_s6 + $0x188] sm:$0xff]   ;;  %v6010_v52 = vld [vmem:[%s6763_s6 + $0x150] sm:$0xff]  }
 0x332   :  { %4472 = vmatprep.subr.bf16.mxu1 %v5749_v49  ;;  %v6011_v49 = vld [vmem:[%s6763_s6 + $0x1d0] sm:$0xff]  }
 0x334   :  { %4309 = vmatpush1.bf16.msra.mxu0 %v5746_v29  ;;  %v6014_v29 = vld [vmem:[%s6763_s6 + $0x158] sm:$0xff]  }
 0x335   :  { %4473 = vmatpush1.bf16.msra.mxu1 %v5748_v51  ;;  %5815 = vmatprep.subr.bf16.mxu0 %v5970_v42  ;;  %v6015_v51 = vld [vmem:[%s6763_s6 + $0x1d8] sm:$0xff]  }
 0x336   :  { %5837 = vmatprep.subr.bf16.mxu1 %v5971_v7  ;;  %v6016_v42 = vld [vmem:[%s6763_s6 + $0x118] sm:$0xff]  }
 0x337   :  { %4311 = vmatmul.mubr.bf16.vlgmr.msra.gmra.mrb[20].mxu0 %v6495_v44  ;;  %v6017_v7 = vld [vmem:[%s6763_s6 + $0x198] sm:$0xff]  }
 0x338   :  { %4475 = vmatmul.mubr.bf16.vlgmr.msra.gmra.mrb[20].mxu1 %v6495_v44  ;;  %5816 = vmatpush3.bf16.msra.mxu0 %v5972_v18  ;;  %v5979_v44 = vld [vmem:[%s6763_s6 + $0xd0] sm:$0xff]   ;;  %v6020_v18 = vld [vmem:[%s6763_s6 + $0x120] sm:$0xff]  }
 0x339   :  { %5050 = vmatprep.mubr.bf16.mxu0 %v4492_v55  ;;  %5838 = vmatpush3.bf16.msra.mxu1 %v5973_v31  ;;  %v6021_v31 = vld [vmem:[%s6763_s6 + $0x1a0] sm:$0xff]   ;;  %v6023_v55 = vld [vmem:[%s6763_s6 + $0x1e8] sm:$0xff]  }
 0x33a   :  { %5090 = vmatprep.mubr.bf16.mxu1 %v4494_v56  ;;  %5817 = vmatprep.subr.bf16.mxu0 %v5974_v28  ;;  %v6022_v28 = vld [vmem:[%s6763_s6 + $0x168] sm:$0xff]  }
 0x33b   :  { %5839 = vmatprep.subr.bf16.mxu1 %v5975_v32  ;;  %v6024_v32 = vld [vmem:[%s6763_s6 + $0x128] sm:$0xff]  }
 0x33c   :  { %5818 = vmatpush3.bf16.msra.mxu0 %v5976_v58  ;;  %v6025_v56 = vld [vmem:[%s6763_s6 + $0x1a8] sm:$0xff]   ;;  %v6026_v58 = vld [vmem:[%s6763_s6 + $0x170] sm:$0xff]  }
 0x33d   :  { %5840 = vmatpush3.bf16.msra.mxu1 %v5977_v22  ;;  %5819 = vmatprep.subr.bf16.mxu0 %v5978_v59  ;;  %v6027_v22 = vld [vmem:[%s6763_s6 + $0x1f0] sm:$0xff]  }
 0x33e   :  { %5841 = vmatprep.subr.bf16.mxu1 %v5979_v44  ;;  %v6028_v59 = vld [vmem:[%s6763_s6 + $0x130] sm:$0xff]  }
 0x33f   :  { %v6029_v44 = vld [vmem:[%s6763_s6 + $0x1b0] sm:$0xff]  }
 0x340   :  { %5820 = vmatpush3.bf16.msra.mxu0 %v5980_v60  ;;  %v6030_v60 = vld [vmem:[%s6763_s6 + $0x178] sm:$0xff]  }
 0x341   :  { %5842 = vmatpush3.bf16.msra.mxu1 %v5981_v30  ;;  %5821 = vmatprep.subr.bf16.mxu0 %v5982_v63  ;;  %v6031_v30 = vld [vmem:[%s6763_s6 + $0x1f8] sm:$0xff]  }
 0x342   :  { %5843 = vmatprep.subr.bf16.mxu1 %v5983_v1  ;;  %v6032_v63 = vld [vmem:[%s6763_s6 + $0x138] sm:$0xff]  }
 0x343   :  { %v6033_v1 = vld [vmem:[%s6763_s6 + $0x1b8] sm:$0xff]   ;;  %s6230_s6 = smov [#allocation14]  }
 0x344   :  { %5822 = vmatpush3.bf16.msra.mxu0 %v5984_v2  ;;  %v1246_v2 = vrot.slane %v6521_v38, %v667_v45  ;;  %s5186_s25 = sshll.u32 %s6230_s6, 4  ;;  %s5187_s25 = int_to_ptr.vmem [resolvable:$true] %s5186_s25 }
 0x345   :  { %5844 = vmatpush3.bf16.msra.mxu1 %v5985_v3  ;;  %5823 = vmatprep.subr.bf16.mxu0 %v5986_v5  ;;  %v1254_v3 = vrot.slane %v6521_v38, %v675_v16  ;;  %v1250_v5 = vrot.slane %v6521_v38, %v671_v46  ;;  %s6188_s26 = scalar_lea.vmem %s5187_s25, 128  ;;  %p6193_p1 = scmp.lt.s32.totalorder %s5187_s25, %s5187_s25 }
 0x346   :  { %5845 = vmatprep.subr.bf16.mxu1 %v5987_v61  ;;  %v1258_v61 = vrot.slane %v6521_v38, %v679_v25  ;;  %p6189_p0 = scmp.ne.s32.totalorder %s5187_s25, %s6188_s26  ;;  %p6194_p2 = scmp.lt.s32.totalorder %s6188_s26, %s6188_s26 }
 0x348   :  { %5824 = vmatpush3.bf16.msra.mxu0 %v5988_v15  ;;  %p6195_p3 = por %p6194_p2, %p6193_p1 }
 0x349   :  { %5846 = vmatpush3.bf16.msra.mxu1 %v5989_v14  ;;  %5825 = vmatprep.subr.bf16.mxu0 %v5990_v19 }
 0x34a   :  { %5847 = vmatprep.subr.bf16.mxu1 %v5991_v23  ;;  %p6196_p4 = pnand %p6195_p3, %p6189_p0 }
 0x34c   :  { %5826 = vmatpush3.bf16.msra.mxu0 %v5992_v21 }
 0x34d   :  { %5848 = vmatpush3.bf16.msra.mxu1 %v5993_v17  ;;  %5827 = vmatprep.subr.bf16.mxu0 %v5994_v27 }
 0x34e   :  { %5849 = vmatprep.subr.bf16.mxu1 %v5995_v33 }
 0x350   :  { %5828 = vmatpush3.bf16.msra.mxu0 %v5996_v0 }
 0x351   :  { %5850 = vmatpush3.bf16.msra.mxu1 %v5997_v35  ;;  %5829 = vmatprep.subr.bf16.mxu0 %v5998_v39 }
 0x352   :  { %5851 = vmatprep.subr.bf16.mxu1 %v5999_v37 }
 0x354   :  { %5830 = vmatpush3.bf16.msra.mxu0 %v6000_v9  ;;  %v5750_v9 = vld [vmem:[#allocation13] ss:$0 sm:$0xff] }
 0x355   :  { %5852 = vmatpush3.bf16.msra.mxu1 %v6001_v41  ;;  %5859 = vmatprep.subr.bf16.mxu0 %v6002_v13 }
 0x356   :  { %5881 = vmatprep.subr.bf16.mxu1 %v6003_v11 }
 0x357   :  { %5051 = vmatmul.mubr.bf16.vlgmr.msra.gmra.mrb[24].mxu0 %v4491_v10 }
 0x358   :  { %5091 = vmatmul.mubr.bf16.vlgmr.msra.gmra.mrb[24].mxu1 %v4493_v57  ;;  %5860 = vmatpush3.bf16.msra.mxu0 %v6004_v8 }
 0x359   :  { %5882 = vmatpush3.bf16.msra.mxu1 %v6005_v12  ;;  %5861 = vmatprep.subr.bf16.mxu0 %v6006_v43 }
 0x35a   :  { %5883 = vmatprep.subr.bf16.mxu1 %v6007_v4 }
 0x35c   :  { %5862 = vmatpush3.bf16.msra.mxu0 %v6008_v47 }
 0x35d   :  { %5884 = vmatpush3.bf16.msra.mxu1 %v6009_v48  ;;  %5863 = vmatprep.subr.bf16.mxu0 %v6010_v52 }
 0x35e   :  { %5885 = vmatprep.subr.bf16.mxu1 %v6011_v49 }
 0x360   :  { %5864 = vmatpush3.bf16.msra.mxu0 %v6012_v50 }
 0x361   :  { %5886 = vmatpush3.bf16.msra.mxu1 %v6013_v62  ;;  %5865 = vmatprep.subr.bf16.mxu0 %v6014_v29 }
 0x362   :  { %5887 = vmatprep.subr.bf16.mxu1 %v6015_v51 }
 0x364   :  { %5866 = vmatpush3.bf16.msra.mxu0 %v6016_v42 }
 0x365   :  { %5888 = vmatpush3.bf16.msra.mxu1 %v6017_v7  ;;  %5867 = vmatprep.subr.bf16.mxu0 %v6018_v53 }
 0x366   :  { %5889 = vmatprep.subr.bf16.mxu1 %v6019_v54 }
 0x368   :  { %5868 = vmatpush3.bf16.msra.mxu0 %v6020_v18 }
 0x369   :  { %5890 = vmatpush3.bf16.msra.mxu1 %v6021_v31  ;;  %5869 = vmatprep.subr.bf16.mxu0 %v6022_v28 }
 0x36a   :  { %5891 = vmatprep.subr.bf16.mxu1 %v6023_v55 }
 0x36c   :  { %5870 = vmatpush3.bf16.msra.mxu0 %v6024_v32 }
 0x36d   :  { %5892 = vmatpush3.bf16.msra.mxu1 %v6025_v56  ;;  %5871 = vmatprep.subr.bf16.mxu0 %v6026_v58 }
 0x36e   :  { %5893 = vmatprep.subr.bf16.mxu1 %v6027_v22 }
 0x370   :  { %5872 = vmatpush3.bf16.msra.mxu0 %v6028_v59 }
 0x371   :  { %5894 = vmatpush3.bf16.msra.mxu1 %v6029_v44  ;;  %5873 = vmatprep.subr.bf16.mxu0 %v6030_v60 }
 0x372   :  { %5895 = vmatprep.subr.bf16.mxu1 %v6031_v30 }
 0x374   :  { %5874 = vmatpush3.bf16.msra.mxu0 %v6032_v63 }
 0x375   :  { %5896 = vmatpush3.bf16.msra.mxu1 %v6033_v1 }
 0x40a   :  { %v4312_v15 = vpop.f32.mrb[20].mxu0 }
 0x40b   :  { %v5907_v14 = vadd.f32 %v4312_v15, %v1246_v2  ;;  %v4476_v19 = vpop.f32.mrb[20].mxu1  ;;  %v4314_v23 = vpop.f32.mrb[21].mxu0 }
 0x40c   :  { %v5909_v21 = vadd.f32 %v4476_v19, %v1254_v3  ;;  %v5908_v26 = vadd.f32 %v4314_v23, %v1250_v5  ;;  %v4478_v17 = vpop.f32.mrb[21].mxu1  ;;  %v4316_v45 = vpop.f32.mrb[22].mxu0 }
 0x40d   :  { %v4487_v27 = vmax.f32 %v5907_v14, 0.0  ;;  %v5910_v24 = vadd.f32 %v4478_v17, %v1258_v61  ;;  %v4480_v33 = vpop.f32.mrb[22].mxu1  ;;  %v4317_v16 = vpop.f32.mrb[23].mxu0 }
 0x40e   :  { %v4489_v0 = vmax.f32 %v5909_v21, 0.0  ;;  %v4488_v34 = vmax.f32 %v5908_v26, 0.0  ;;  %v4481_v35 = vpop.f32.mrb[23].mxu1 }
 0x40f   :  { %v4490_v46 = vmax.f32 %v5910_v24, 0.0  ;;  %v4495_v20 = vpack.c.bf16 %v4487_v27, %v4487_v27 }
 0x410   :  { %v4496_v39 = vpack.c.bf16 %v4488_v34, %v4488_v34  ;;  %v4497_v25 = vpack.c.bf16 %v4489_v0, %v4489_v0 }
 0x411   :  { %v4498_v36 = vpack.c.bf16 %v4490_v46, %v4490_v46 }
 0x412   :  { %5130 = vmatprep.mubr.bf16.mxu0 %v4496_v39 }
 0x413   :  { %5170 = vmatprep.mubr.bf16.mxu1 %v4498_v36  ;;  %5131 = vmatmul.mubr.bf16.vlgmr.msra.gmra.mrb[28].mxu0 %v4495_v20 }
 0x414   :  { %5171 = vmatmul.mubr.bf16.vlgmr.msra.gmra.mrb[28].mxu1 %v4497_v25 }
 0x42a   :  { %v5831_v38 = vpop.f32.mrb[24].mxu0 }
 0x42b   :  { %v5853_v37 = vpop.f32.mrb[24].mxu1  ;;  %v5832_v40 = vpop.f32.mrb[25].mxu0 }
 0x42c   :  { %v5833_v41 = vadd.f32 %v5832_v40, %v5831_v38  ;;  %v5854_v13 = vpop.f32.mrb[25].mxu1  ;;  %v5834_v6 = vpop.f32.mrb[26].mxu0 }
 0x42d   :  { %v5855_v11 = vadd.f32 %v5854_v13, %v5853_v37  ;;  %v5856_v8 = vpop.f32.mrb[26].mxu1  ;;  %v5835_v10 = vpop.f32.mrb[27].mxu0 }
 0x42e   :  { %v5053_v12 = vadd.f32 %v5833_v41, %v5750_v9  ;;  %v5857_v43 = vpop.f32.mrb[27].mxu1 }
 0x430   :  { %v5093_v57 = vadd.f32 %v5855_v11, %v5053_v12 }
 0x4e6   :  { %v5875_v4 = vpop.f32.mrb[28].mxu0 }
 0x4e7   :  { %v5897_v47 = vpop.f32.mrb[28].mxu1  ;;  %v5876_v48 = vpop.f32.mrb[29].mxu0 }
 0x4e8   :  { %v5877_v52 = vadd.f32 %v5876_v48, %v5875_v4  ;;  %v5898_v49 = vpop.f32.mrb[29].mxu1  ;;  %v5878_v50 = vpop.f32.mrb[30].mxu0 }
 0x4e9   :  { %v5899_v62 = vadd.f32 %v5898_v49, %v5897_v47  ;;  %v5900_v29 = vpop.f32.mrb[30].mxu1  ;;  %v5879_v51 = vpop.f32.mrb[31].mxu0 }
 0x4ea   :  { %v5133_v42 = vadd.f32 %v5877_v52, %v5093_v57  ;;  %v5901_v7 = vpop.f32.mrb[31].mxu1 }
 0x4ec   :  { %v5173_v53 = vadd.f32 %v5899_v62, %v5133_v42 }
 0x4ee   :  { %5179 = vst.msk [vmem:[#allocation14] sm:$0xff] %vm5178_vm1, %v5173_v53 }
 0x4ef   :  { %6199 = shalt.err (!%p6196_p4)
}
 0x4f0   :  { %s6200_s1 = scalar_lea.hbm %s6765_s8, 128 }
 0x4f1   :  { %p6201_p5 = scmp.ne.s32.totalorder %s6765_s8, %s6200_s1  ;;  %p6204_p6 = scmp.lt.u32.totalorder %s6200_s1, %s6765_s8 }
 0x4f3   :  { %p6206_p7 = pnand %p6204_p6, %p6201_p5 }
 0x4f5   :  { %6209 = shalt.err (!%p6206_p7)
}
 0x4f6   :  { %5189 = dma.vmem_to_hbm [thread:$0]  %s5187_s25, 128, %s6765_s8, [#allocation4]  }
 0x4f7   :  { %6218 = dma.done.wait [#allocation4], 128  }
 0x4f8   :  { %6219 = vsyncadd [#allocation4], 4294967168 }
 0x4f9   :  { %5193 = vsyncpa [#allocation3], 1 }
 0x4fa   :  { %5194 = vsyncpa [#allocation6], 1 }
 0x4fb   :  { %5195 = vsyncpa [#allocation9], 1 }
 0x4fc   :  { %5196 = vsyncpa [#allocation12], 1 }
 0x4fd   :  { %5197 = vsyncpa [#allocation4], 1 }

</bundles_post_ra>
